<compile_context>
chip_gen: v7x
topology: tpu7x:2x2x1
jax: 0.10.0
libtpu: 0.0.40
codegen_flags: <defaults>
</compile_context>

<pallas_src>
import functools

import jax
import jax.numpy as jnp
from jax import lax
from jax.experimental import pallas as pl
from jax.experimental.pallas import tpu as pltpu

LN_EPS = 1e-5  # torch.nn.LayerNorm default


def _silu(x):
    return x * jax.nn.sigmoid(x)


def _round_up(x, m):
    return ((x + m - 1) // m) * m


def mlp_resnet_kernel(
    x_ref,        # (TB, H)                f32
    w_in_ref,     # (H, H)                 bf16
    b_in_ref,     # (1, H)                 f32
    ln_g_ref,     # (num_blocks, 1, H)     f32
    ln_b_ref,     # (num_blocks, 1, H)     f32
    w1_ref,       # (num_blocks, H, 4H)    bf16
    b1_ref,       # (num_blocks, 1, 4H)    f32
    w2_ref,       # (num_blocks, 4H, H)    bf16
    b2_ref,       # (num_blocks, 1, H)     f32
    w_out_ref,    # (H, OUT_PAD)           bf16
    b_out_ref,    # (1, OUT_PAD)           f32
    out_ref,      # (TB, OUT_PAD)          f32
    *,
    num_blocks: int,
    use_layer_norm: bool,
):
    mxu_dtype = w_in_ref.dtype  # bf16 operands, f32 accumulation

    x = x_ref[...]
    # input_layer
    h = jnp.dot(x.astype(mxu_dtype), w_in_ref[...],
                preferred_element_type=jnp.float32) + b_in_ref[...]

    # residual blocks (num_blocks is static -> unrolled Python loop)
    for i in range(num_blocks):
        residual = h
        hn = h
        # dropout_rate is None (and eval mode) -> identity, nothing to do.
        if use_layer_norm:
            # single-pass LN: E[x] and E[x^2] in one sweep (f32 stats)
            mean = jnp.mean(hn, axis=-1, keepdims=True)
            mean_sq = jnp.mean(hn * hn, axis=-1, keepdims=True)
            var = mean_sq - mean * mean
            hn = (hn - mean) * lax.rsqrt(var + LN_EPS)
            hn = hn * ln_g_ref[i] + ln_b_ref[i]
        z = jnp.dot(hn.astype(mxu_dtype), w1_ref[i],
                    preferred_element_type=jnp.float32) + b1_ref[i]
        z = _silu(z)
        z = jnp.dot(z.astype(mxu_dtype), w2_ref[i],
                    preferred_element_type=jnp.float32) + b2_ref[i]
        # residual.shape == z.shape always (features -> features), so the
        # block's `residual` Linear is never applied (matches PyTorch branch).
        h = residual + z

    # final activation + output_layer (lane-dense padded output)
    h = _silu(h)
    out = jnp.dot(h.astype(mxu_dtype), w_out_ref[...],
                  preferred_element_type=jnp.float32) + b_out_ref[...]
    out_ref[...] = out.astype(out_ref.dtype)


def mlp_resnet_forward(x, params, *, num_blocks: int, use_layer_norm: bool,
                       tile_b: int = 256, lane_pad: int = 128):
    batch, hidden = x.shape
    out_dim = params["w_out"].shape[1]
    h4 = 4 * hidden
    nb = num_blocks

    # --- lane-dense output: zero-pad w_out/b_out to a multiple of 128 lanes ---
    out_pad = _round_up(max(out_dim, lane_pad), lane_pad)
    w_out = params["w_out"]
    b_out = params["b_out"]
    if out_pad != out_dim:
        w_out = jnp.pad(w_out, ((0, 0), (0, out_pad - out_dim)))
        b_out = jnp.pad(b_out, ((0, 0), (0, out_pad - out_dim)))

    # --- batch tiling: TILE_B up to 256, padded to a multiple of the tile ---
    tb = min(tile_b, _round_up(batch, 8))
    padded_b = _round_up(batch, tb)
    x_p = jnp.pad(x, ((0, padded_b - batch), (0, 0))) if padded_b != batch else x
    grid = (padded_b // tb,)

    const2 = lambda i: (0, 0)
    const3 = lambda i: (0, 0, 0)

    in_specs = [
        pl.BlockSpec((tb, hidden), lambda i: (i, 0)),        # x tile streams
        pl.BlockSpec((hidden, hidden), const2),              # weights resident
        pl.BlockSpec((1, hidden), const2),
        pl.BlockSpec((nb, 1, hidden), const3),
        pl.BlockSpec((nb, 1, hidden), const3),
        pl.BlockSpec((nb, hidden, h4), const3),
        pl.BlockSpec((nb, 1, h4), const3),
        pl.BlockSpec((nb, h4, hidden), const3),
        pl.BlockSpec((nb, 1, hidden), const3),
        pl.BlockSpec((hidden, out_pad), const2),
        pl.BlockSpec((1, out_pad), const2),
    ]
    out_specs = pl.BlockSpec((tb, out_pad), lambda i: (i, 0))

    kernel = functools.partial(
        mlp_resnet_kernel, num_blocks=num_blocks, use_layer_norm=use_layer_norm
    )

    out_padded = pl.pallas_call(
        kernel,
        out_shape=jax.ShapeDtypeStruct((padded_b, out_pad), jnp.float32),
        grid=grid,
        in_specs=in_specs,
        out_specs=out_specs,
        compiler_params=pltpu.CompilerParams(
            dimension_semantics=("parallel",),   # batch tiles are independent
            vmem_limit_bytes=32 << 20,           # safe on v5e/v6e/v7x
        ),
    )(
        x_p,
        params["w_in"], params["b_in"],
        params["ln_g"], params["ln_b"],
        params["w1"], params["b1"],
        params["w2"], params["b2"],
        w_out, b_out,
    )
    return out_padded[:batch, :out_dim]


def init_params(key, *, num_blocks, hidden_dim, out_dim):
    """Deterministic synthetic init (shapes match the PyTorch module).

    PyTorch stores Linear weights as (out, in); we store (in, out) so the
    kernel can do x @ W.  Matmul weights are bf16 (MXU-native), biases and
    LayerNorm affine params stay f32.  Orthogonal init of the torch module is
    replaced by a deterministic scaled-normal init (synthetic weights).
    """
    ks = jax.random.split(key, 8)
    h, h4 = hidden_dim, 4 * hidden_dim
    scale = lambda fan_in: 1.0 / jnp.sqrt(fan_in)
    wdt = jnp.bfloat16
    params = {
        "w_in": (jax.random.normal(ks[0], (h, h), jnp.float32) * scale(h)).astype(wdt),
        "b_in": jax.random.normal(ks[1], (1, h), jnp.float32) * 0.01,
        "ln_g": jnp.ones((num_blocks, 1, h), jnp.float32),
        "ln_b": jnp.zeros((num_blocks, 1, h), jnp.float32),
        "w1": (jax.random.normal(ks[2], (num_blocks, h, h4), jnp.float32) * scale(h)).astype(wdt),
        "b1": jax.random.normal(ks[3], (num_blocks, 1, h4), jnp.float32) * 0.01,
        "w2": (jax.random.normal(ks[4], (num_blocks, h4, h), jnp.float32) * scale(h4)).astype(wdt),
        "b2": jax.random.normal(ks[5], (num_blocks, 1, h), jnp.float32) * 0.01,
        "w_out": (jax.random.normal(ks[6], (h, out_dim), jnp.float32) * scale(h)).astype(wdt),
        "b_out": jax.random.normal(ks[7], (1, out_dim), jnp.float32) * 0.01,
    }
    return params


def reference_forward(x, params, *, num_blocks, use_layer_norm):
    """Pure-JAX reference mirroring the PyTorch forward (eval mode) with the
    same bf16-operand / f32-accumulation precision as the kernel."""
    def bdot(a, w):
        return jnp.dot(a.astype(jnp.bfloat16), w.astype(jnp.bfloat16),
                       preferred_element_type=jnp.float32)

    h = bdot(x, params["w_in"]) + params["b_in"]
    for i in range(num_blocks):
        residual = h
        hn = h
        if use_layer_norm:
            mean = jnp.mean(hn, axis=-1, keepdims=True)
            mean_sq = jnp.mean(hn * hn, axis=-1, keepdims=True)
            var = mean_sq - mean * mean
            hn = (hn - mean) / jnp.sqrt(var + LN_EPS)
            hn = hn * params["ln_g"][i] + params["ln_b"][i]
        z = bdot(hn, params["w1"][i]) + params["b1"][i]
        z = _silu(z)
        z = bdot(z, params["w2"][i]) + params["b2"][i]
        h = residual + z
    h = _silu(h)
    return bdot(h, params["w_out"]) + params["b_out"]


if __name__ == "__main__":
    NUM_BLOCKS = 2
    HIDDEN_DIM = 256   # module default
    OUT_DIM = 10
    BATCH = 8
    USE_LAYER_NORM = True

    key = jax.random.PRNGKey(0)
    k_x, k_p = jax.random.split(key)
    x = jax.random.normal(k_x, (BATCH, HIDDEN_DIM), jnp.float32)
    params = init_params(
        k_p, num_blocks=NUM_BLOCKS, hidden_dim=HIDDEN_DIM, out_dim=OUT_DIM
    )

    fwd = jax.jit(
        functools.partial(
            mlp_resnet_forward, num_blocks=NUM_BLOCKS, use_layer_norm=USE_LAYER_NORM
        )
    )
    out = fwd(x, params)
    jax.block_until_ready(out)

    ref = reference_forward(
        x, params, num_blocks=NUM_BLOCKS, use_layer_norm=USE_LAYER_NORM
    )
    assert out.shape == (BATCH, OUT_DIM)
    assert jnp.allclose(out, ref, atol=5e-3, rtol=5e-3), "mismatch vs JAX reference"

    print("KERNEL_OK")
</pallas_src>

<mosaic_0001>
module attributes {stable_mosaic.version = 11 : i64} {
  func.func @mlp_resnet_kernel(%arg0: i32, %arg1: memref<8x256xf32, #tpu.memory_space<vmem>>, %arg2: memref<256x256xbf16, #tpu.memory_space<vmem>>, %arg3: memref<1x256xf32, #tpu.memory_space<vmem>>, %arg4: memref<2x1x256xf32, #tpu.memory_space<vmem>>, %arg5: memref<2x1x256xf32, #tpu.memory_space<vmem>>, %arg6: memref<2x256x1024xbf16, #tpu.memory_space<vmem>>, %arg7: memref<2x1x1024xf32, #tpu.memory_space<vmem>>, %arg8: memref<2x1024x256xbf16, #tpu.memory_space<vmem>>, %arg9: memref<2x1x256xf32, #tpu.memory_space<vmem>>, %arg10: memref<256x128xbf16, #tpu.memory_space<vmem>>, %arg11: memref<1x128xf32, #tpu.memory_space<vmem>>, %arg12: memref<8x128xf32, #tpu.memory_space<vmem>>) attributes {dimension_semantics = [#tpu.dimension_semantics<parallel>], iteration_bounds = array<i64: 1>, scalar_prefetch = 0 : i64, scratch_operands = 0 : i64, tpu.core_type = #tpu.core_type<tc>, window_params = [{transform_indices = @transform_0, window_bounds = array<i64: 8, 256>}, {pipeline_mode = #tpu.pipeline_mode<synchronous>, transform_indices = @transform_1, window_bounds = array<i64: 256, 256>}, {pipeline_mode = #tpu.pipeline_mode<synchronous>, transform_indices = @transform_2, window_bounds = array<i64: 1, 256>}, {pipeline_mode = #tpu.pipeline_mode<synchronous>, transform_indices = @transform_3, window_bounds = array<i64: 2, 1, 256>}, {pipeline_mode = #tpu.pipeline_mode<synchronous>, transform_indices = @transform_4, window_bounds = array<i64: 2, 1, 256>}, {pipeline_mode = #tpu.pipeline_mode<synchronous>, transform_indices = @transform_5, window_bounds = array<i64: 2, 256, 1024>}, {pipeline_mode = #tpu.pipeline_mode<synchronous>, transform_indices = @transform_6, window_bounds = array<i64: 2, 1, 1024>}, {pipeline_mode = #tpu.pipeline_mode<synchronous>, transform_indices = @transform_7, window_bounds = array<i64: 2, 1024, 256>}, {pipeline_mode = #tpu.pipeline_mode<synchronous>, transform_indices = @transform_8, window_bounds = array<i64: 2, 1, 256>}, {pipeline_mode = #tpu.pipeline_mode<synchronous>, transform_indices = @transform_9, window_bounds = array<i64: 256, 128>}, {pipeline_mode = #tpu.pipeline_mode<synchronous>, transform_indices = @transform_10, window_bounds = array<i64: 1, 128>}, {transform_indices = @transform_11, window_bounds = array<i64: 8, 128>}]} {
    %c0 = arith.constant 0 : index
    %c0_0 = arith.constant 0 : index
    %0 = vector.load %arg1[%c0, %c0_0] : memref<8x256xf32, #tpu.memory_space<vmem>>, vector<8x256xf32>
    %1 = arith.truncf %0 : vector<8x256xf32> to vector<8x256xbf16>
    %c0_1 = arith.constant 0 : index
    %c0_2 = arith.constant 0 : index
    %2 = vector.load %arg2[%c0_1, %c0_2] : memref<256x256xbf16, #tpu.memory_space<vmem>>, vector<256x256xbf16>
    %cst = arith.constant dense<0.000000e+00> : vector<8x256xf32>
    %3 = tpu.matmul %1, %2, %cst {dimension_numbers = #tpu.dot_dimension_numbers<[1], [0], [0], [1], [0, 0, 1, 1], [], []>} : vector<8x256xbf16>, vector<256x256xbf16>, vector<8x256xf32> -> vector<8x256xf32>
    %c0_3 = arith.constant 0 : index
    %c0_4 = arith.constant 0 : index
    %4 = vector.load %arg3[%c0_3, %c0_4] : memref<1x256xf32, #tpu.memory_space<vmem>>, vector<1x256xf32>
    %5 = vector.broadcast %4 : vector<1x256xf32> to vector<8x256xf32>
    %6 = arith.addf %3, %5 : vector<8x256xf32>
    %cst_5 = arith.constant dense<0.000000e+00> : vector<8xf32>
    %7 = vector.multi_reduction <add>, %6, %cst_5 [1] : vector<8x256xf32> to vector<8xf32>
    %8 = vector.shape_cast %7 : vector<8xf32> to vector<8x1xf32>
    %cst_6 = arith.constant 2.560000e+02 : f32
    %9 = vector.broadcast %cst_6 : f32 to vector<8x1xf32>
    %10 = arith.divf %8, %9 : vector<8x1xf32>
    %11 = arith.mulf %6, %6 : vector<8x256xf32>
    %cst_7 = arith.constant dense<0.000000e+00> : vector<8xf32>
    %12 = vector.multi_reduction <add>, %11, %cst_7 [1] : vector<8x256xf32> to vector<8xf32>
    %13 = vector.shape_cast %12 : vector<8xf32> to vector<8x1xf32>
    %cst_8 = arith.constant 2.560000e+02 : f32
    %14 = vector.broadcast %cst_8 : f32 to vector<8x1xf32>
    %15 = arith.divf %13, %14 : vector<8x1xf32>
    %16 = arith.mulf %10, %10 : vector<8x1xf32>
    %17 = arith.subf %15, %16 : vector<8x1xf32>
    %18 = vector.broadcast %10 : vector<8x1xf32> to vector<8x256xf32>
    %19 = arith.subf %6, %18 : vector<8x256xf32>
    %cst_9 = arith.constant 9.99999974E-6 : f32
    %20 = vector.broadcast %cst_9 : f32 to vector<8x1xf32>
    %21 = arith.addf %17, %20 : vector<8x1xf32>
    %22 = math.rsqrt %21 : vector<8x1xf32>
    %23 = vector.broadcast %22 : vector<8x1xf32> to vector<8x256xf32>
    %24 = arith.mulf %19, %23 : vector<8x256xf32>
    %c0_10 = arith.constant 0 : index
    %c0_11 = arith.constant 0 : index
    %c0_12 = arith.constant 0 : index
    %25 = vector.load %arg4[%c0_10, %c0_11, %c0_12] : memref<2x1x256xf32, #tpu.memory_space<vmem>>, vector<1x1x256xf32>
    %26 = vector.shape_cast %25 : vector<1x1x256xf32> to vector<1x256xf32>
    %27 = vector.broadcast %26 : vector<1x256xf32> to vector<8x256xf32>
    %28 = arith.mulf %24, %27 : vector<8x256xf32>
    %c0_13 = arith.constant 0 : index
    %c0_14 = arith.constant 0 : index
    %c0_15 = arith.constant 0 : index
    %29 = vector.load %arg5[%c0_13, %c0_14, %c0_15] : memref<2x1x256xf32, #tpu.memory_space<vmem>>, vector<1x1x256xf32>
    %30 = vector.shape_cast %29 : vector<1x1x256xf32> to vector<1x256xf32>
    %31 = vector.broadcast %30 : vector<1x256xf32> to vector<8x256xf32>
    %32 = arith.addf %28, %31 : vector<8x256xf32>
    %33 = arith.truncf %32 : vector<8x256xf32> to vector<8x256xbf16>
    %c0_16 = arith.constant 0 : index
    %c0_17 = arith.constant 0 : index
    %c0_18 = arith.constant 0 : index
    %34 = vector.load %arg6[%c0_16, %c0_17, %c0_18] : memref<2x256x1024xbf16, #tpu.memory_space<vmem>>, vector<1x256x1024xbf16>
    %35 = vector.shape_cast %34 : vector<1x256x1024xbf16> to vector<256x1024xbf16>
    %cst_19 = arith.constant dense<0.000000e+00> : vector<8x1024xf32>
    %36 = tpu.matmul %33, %35, %cst_19 {dimension_numbers = #tpu.dot_dimension_numbers<[1], [0], [0], [1], [0, 0, 1, 1], [], []>} : vector<8x256xbf16>, vector<256x1024xbf16>, vector<8x1024xf32> -> vector<8x1024xf32>
    %c0_20 = arith.constant 0 : index
    %c0_21 = arith.constant 0 : index
    %c0_22 = arith.constant 0 : index
    %37 = vector.load %arg7[%c0_20, %c0_21, %c0_22] : memref<2x1x1024xf32, #tpu.memory_space<vmem>>, vector<1x1x1024xf32>
    %38 = vector.shape_cast %37 : vector<1x1x1024xf32> to vector<1x1024xf32>
    %39 = vector.broadcast %38 : vector<1x1024xf32> to vector<8x1024xf32>
    %40 = arith.addf %36, %39 : vector<8x1024xf32>
    %41 = arith.negf %40 : vector<8x1024xf32>
    %42 = math.exp %41 : vector<8x1024xf32>
    %cst_23 = arith.constant 1.000000e+00 : f32
    %43 = vector.broadcast %cst_23 : f32 to vector<8x1024xf32>
    %44 = arith.addf %43, %42 : vector<8x1024xf32>
    %45 = arith.divf %43, %44 : vector<8x1024xf32>
    %46 = arith.mulf %40, %45 : vector<8x1024xf32>
    %47 = arith.truncf %46 : vector<8x1024xf32> to vector<8x1024xbf16>
    %c0_24 = arith.constant 0 : index
    %c0_25 = arith.constant 0 : index
    %c0_26 = arith.constant 0 : index
    %48 = vector.load %arg8[%c0_24, %c0_25, %c0_26] : memref<2x1024x256xbf16, #tpu.memory_space<vmem>>, vector<1x1024x256xbf16>
    %49 = vector.shape_cast %48 : vector<1x1024x256xbf16> to vector<1024x256xbf16>
    %cst_27 = arith.constant dense<0.000000e+00> : vector<8x256xf32>
    %50 = tpu.matmul %47, %49, %cst_27 {dimension_numbers = #tpu.dot_dimension_numbers<[1], [0], [0], [1], [0, 0, 1, 1], [], []>} : vector<8x1024xbf16>, vector<1024x256xbf16>, vector<8x256xf32> -> vector<8x256xf32>
    %c0_28 = arith.constant 0 : index
    %c0_29 = arith.constant 0 : index
    %c0_30 = arith.constant 0 : index
    %51 = vector.load %arg9[%c0_28, %c0_29, %c0_30] : memref<2x1x256xf32, #tpu.memory_space<vmem>>, vector<1x1x256xf32>
    %52 = vector.shape_cast %51 : vector<1x1x256xf32> to vector<1x256xf32>
    %53 = vector.broadcast %52 : vector<1x256xf32> to vector<8x256xf32>
    %54 = arith.addf %50, %53 : vector<8x256xf32>
    %55 = arith.addf %6, %54 : vector<8x256xf32>
    %cst_31 = arith.constant dense<0.000000e+00> : vector<8xf32>
    %56 = vector.multi_reduction <add>, %55, %cst_31 [1] : vector<8x256xf32> to vector<8xf32>
    %57 = vector.shape_cast %56 : vector<8xf32> to vector<8x1xf32>
    %cst_32 = arith.constant 2.560000e+02 : f32
    %58 = vector.broadcast %cst_32 : f32 to vector<8x1xf32>
    %59 = arith.divf %57, %58 : vector<8x1xf32>
    %60 = arith.mulf %55, %55 : vector<8x256xf32>
    %cst_33 = arith.constant dense<0.000000e+00> : vector<8xf32>
    %61 = vector.multi_reduction <add>, %60, %cst_33 [1] : vector<8x256xf32> to vector<8xf32>
    %62 = vector.shape_cast %61 : vector<8xf32> to vector<8x1xf32>
    %cst_34 = arith.constant 2.560000e+02 : f32
    %63 = vector.broadcast %cst_34 : f32 to vector<8x1xf32>
    %64 = arith.divf %62, %63 : vector<8x1xf32>
    %65 = arith.mulf %59, %59 : vector<8x1xf32>
    %66 = arith.subf %64, %65 : vector<8x1xf32>
    %67 = vector.broadcast %59 : vector<8x1xf32> to vector<8x256xf32>
    %68 = arith.subf %55, %67 : vector<8x256xf32>
    %cst_35 = arith.constant 9.99999974E-6 : f32
    %69 = vector.broadcast %cst_35 : f32 to vector<8x1xf32>
    %70 = arith.addf %66, %69 : vector<8x1xf32>
    %71 = math.rsqrt %70 : vector<8x1xf32>
    %72 = vector.broadcast %71 : vector<8x1xf32> to vector<8x256xf32>
    %73 = arith.mulf %68, %72 : vector<8x256xf32>
    %c1 = arith.constant 1 : index
    %c0_36 = arith.constant 0 : index
    %c0_37 = arith.constant 0 : index
    %74 = vector.load %arg4[%c1, %c0_36, %c0_37] : memref<2x1x256xf32, #tpu.memory_space<vmem>>, vector<1x1x256xf32>
    %75 = vector.shape_cast %74 : vector<1x1x256xf32> to vector<1x256xf32>
    %76 = vector.broadcast %75 : vector<1x256xf32> to vector<8x256xf32>
    %77 = arith.mulf %73, %76 : vector<8x256xf32>
    %c1_38 = arith.constant 1 : index
    %c0_39 = arith.constant 0 : index
    %c0_40 = arith.constant 0 : index
    %78 = vector.load %arg5[%c1_38, %c0_39, %c0_40] : memref<2x1x256xf32, #tpu.memory_space<vmem>>, vector<1x1x256xf32>
    %79 = vector.shape_cast %78 : vector<1x1x256xf32> to vector<1x256xf32>
    %80 = vector.broadcast %79 : vector<1x256xf32> to vector<8x256xf32>
    %81 = arith.addf %77, %80 : vector<8x256xf32>
    %82 = arith.truncf %81 : vector<8x256xf32> to vector<8x256xbf16>
    %c1_41 = arith.constant 1 : index
    %c0_42 = arith.constant 0 : index
    %c0_43 = arith.constant 0 : index
    %83 = vector.load %arg6[%c1_41, %c0_42, %c0_43] : memref<2x256x1024xbf16, #tpu.memory_space<vmem>>, vector<1x256x1024xbf16>
    %84 = vector.shape_cast %83 : vector<1x256x1024xbf16> to vector<256x1024xbf16>
    %cst_44 = arith.constant dense<0.000000e+00> : vector<8x1024xf32>
    %85 = tpu.matmul %82, %84, %cst_44 {dimension_numbers = #tpu.dot_dimension_numbers<[1], [0], [0], [1], [0, 0, 1, 1], [], []>} : vector<8x256xbf16>, vector<256x1024xbf16>, vector<8x1024xf32> -> vector<8x1024xf32>
    %c1_45 = arith.constant 1 : index
    %c0_46 = arith.constant 0 : index
    %c0_47 = arith.constant 0 : index
    %86 = vector.load %arg7[%c1_45, %c0_46, %c0_47] : memref<2x1x1024xf32, #tpu.memory_space<vmem>>, vector<1x1x1024xf32>
    %87 = vector.shape_cast %86 : vector<1x1x1024xf32> to vector<1x1024xf32>
    %88 = vector.broadcast %87 : vector<1x1024xf32> to vector<8x1024xf32>
    %89 = arith.addf %85, %88 : vector<8x1024xf32>
    %90 = arith.negf %89 : vector<8x1024xf32>
    %91 = math.exp %90 : vector<8x1024xf32>
    %cst_48 = arith.constant 1.000000e+00 : f32
    %92 = vector.broadcast %cst_48 : f32 to vector<8x1024xf32>
    %93 = arith.addf %92, %91 : vector<8x1024xf32>
    %94 = arith.divf %92, %93 : vector<8x1024xf32>
    %95 = arith.mulf %89, %94 : vector<8x1024xf32>
    %96 = arith.truncf %95 : vector<8x1024xf32> to vector<8x1024xbf16>
    %c1_49 = arith.constant 1 : index
    %c0_50 = arith.constant 0 : index
    %c0_51 = arith.constant 0 : index
    %97 = vector.load %arg8[%c1_49, %c0_50, %c0_51] : memref<2x1024x256xbf16, #tpu.memory_space<vmem>>, vector<1x1024x256xbf16>
    %98 = vector.shape_cast %97 : vector<1x1024x256xbf16> to vector<1024x256xbf16>
    %cst_52 = arith.constant dense<0.000000e+00> : vector<8x256xf32>
    %99 = tpu.matmul %96, %98, %cst_52 {dimension_numbers = #tpu.dot_dimension_numbers<[1], [0], [0], [1], [0, 0, 1, 1], [], []>} : vector<8x1024xbf16>, vector<1024x256xbf16>, vector<8x256xf32> -> vector<8x256xf32>
    %c1_53 = arith.constant 1 : index
    %c0_54 = arith.constant 0 : index
    %c0_55 = arith.constant 0 : index
    %100 = vector.load %arg9[%c1_53, %c0_54, %c0_55] : memref<2x1x256xf32, #tpu.memory_space<vmem>>, vector<1x1x256xf32>
    %101 = vector.shape_cast %100 : vector<1x1x256xf32> to vector<1x256xf32>
    %102 = vector.broadcast %101 : vector<1x256xf32> to vector<8x256xf32>
    %103 = arith.addf %99, %102 : vector<8x256xf32>
    %104 = arith.addf %55, %103 : vector<8x256xf32>
    %105 = arith.negf %104 : vector<8x256xf32>
    %106 = math.exp %105 : vector<8x256xf32>
    %cst_56 = arith.constant 1.000000e+00 : f32
    %107 = vector.broadcast %cst_56 : f32 to vector<8x256xf32>
    %108 = arith.addf %107, %106 : vector<8x256xf32>
    %109 = arith.divf %107, %108 : vector<8x256xf32>
    %110 = arith.mulf %104, %109 : vector<8x256xf32>
    %111 = arith.truncf %110 : vector<8x256xf32> to vector<8x256xbf16>
    %c0_57 = arith.constant 0 : index
    %c0_58 = arith.constant 0 : index
    %112 = vector.load %arg10[%c0_57, %c0_58] : memref<256x128xbf16, #tpu.memory_space<vmem>>, vector<256x128xbf16>
    %cst_59 = arith.constant dense<0.000000e+00> : vector<8x128xf32>
    %113 = tpu.matmul %111, %112, %cst_59 {dimension_numbers = #tpu.dot_dimension_numbers<[1], [0], [0], [1], [0, 0, 1, 1], [], []>} : vector<8x256xbf16>, vector<256x128xbf16>, vector<8x128xf32> -> vector<8x128xf32>
    %c0_60 = arith.constant 0 : index
    %c0_61 = arith.constant 0 : index
    %114 = vector.load %arg11[%c0_60, %c0_61] : memref<1x128xf32, #tpu.memory_space<vmem>>, vector<1x128xf32>
    %115 = vector.broadcast %114 : vector<1x128xf32> to vector<8x128xf32>
    %116 = arith.addf %113, %115 : vector<8x128xf32>
    %c0_62 = arith.constant 0 : index
    %c0_63 = arith.constant 0 : index
    %117 = vector.load %arg12[%c0_62, %c0_63] : memref<8x128xf32, #tpu.memory_space<vmem>>, vector<8x128xf32>
    tpu.vector_store %arg12[%c0_62, %c0_63], %116 {strides = array<i32>} : memref<8x128xf32, #tpu.memory_space<vmem>>, vector<8x128xf32>,
    return
  }
  func.func @transform_0(%arg0: i32) -> (i32, i32) {
    %c0_i32 = arith.constant 0 : i32
    %c0_i32_0 = arith.constant 0 : i32
    return %arg0, %c0_i32 : i32, i32
  }
  func.func @transform_1(%arg0: i32) -> (i32, i32) {
    %c0_i32 = arith.constant 0 : i32
    %c0_i32_0 = arith.constant 0 : i32
    %c0_i32_1 = arith.constant 0 : i32
    return %c0_i32, %c0_i32_0 : i32, i32
  }
  func.func @transform_2(%arg0: i32) -> (i32, i32) {
    %c0_i32 = arith.constant 0 : i32
    %c0_i32_0 = arith.constant 0 : i32
    %c0_i32_1 = arith.constant 0 : i32
    return %c0_i32, %c0_i32_0 : i32, i32
  }
  func.func @transform_3(%arg0: i32) -> (i32, i32, i32) {
    %c0_i32 = arith.constant 0 : i32
    %c0_i32_0 = arith.constant 0 : i32
    %c0_i32_1 = arith.constant 0 : i32
    %c0_i32_2 = arith.constant 0 : i32
    return %c0_i32, %c0_i32_0, %c0_i32_1 : i32, i32, i32
  }
  func.func @transform_4(%arg0: i32) -> (i32, i32, i32) {
    %c0_i32 = arith.constant 0 : i32
    %c0_i32_0 = arith.constant 0 : i32
    %c0_i32_1 = arith.constant 0 : i32
    %c0_i32_2 = arith.constant 0 : i32
    return %c0_i32, %c0_i32_0, %c0_i32_1 : i32, i32, i32
  }
  func.func @transform_5(%arg0: i32) -> (i32, i32, i32) {
    %c0_i32 = arith.constant 0 : i32
    %c0_i32_0 = arith.constant 0 : i32
    %c0_i32_1 = arith.constant 0 : i32
    %c0_i32_2 = arith.constant 0 : i32
    return %c0_i32, %c0_i32_0, %c0_i32_1 : i32, i32, i32
  }
  func.func @transform_6(%arg0: i32) -> (i32, i32, i32) {
    %c0_i32 = arith.constant 0 : i32
    %c0_i32_0 = arith.constant 0 : i32
    %c0_i32_1 = arith.constant 0 : i32
    %c0_i32_2 = arith.constant 0 : i32
    return %c0_i32, %c0_i32_0, %c0_i32_1 : i32, i32, i32
  }
  func.func @transform_7(%arg0: i32) -> (i32, i32, i32) {
    %c0_i32 = arith.constant 0 : i32
    %c0_i32_0 = arith.constant 0 : i32
    %c0_i32_1 = arith.constant 0 : i32
    %c0_i32_2 = arith.constant 0 : i32
    return %c0_i32, %c0_i32_0, %c0_i32_1 : i32, i32, i32
  }
  func.func @transform_8(%arg0: i32) -> (i32, i32, i32) {
    %c0_i32 = arith.constant 0 : i32
    %c0_i32_0 = arith.constant 0 : i32
    %c0_i32_1 = arith.constant 0 : i32
    %c0_i32_2 = arith.constant 0 : i32
    return %c0_i32, %c0_i32_0, %c0_i32_1 : i32, i32, i32
  }
  func.func @transform_9(%arg0: i32) -> (i32, i32) {
    %c0_i32 = arith.constant 0 : i32
    %c0_i32_0 = arith.constant 0 : i32
    %c0_i32_1 = arith.constant 0 : i32
    return %c0_i32, %c0_i32_0 : i32, i32
  }
  func.func @transform_10(%arg0: i32) -> (i32, i32) {
    %c0_i32 = arith.constant 0 : i32
    %c0_i32_0 = arith.constant 0 : i32
    %c0_i32_1 = arith.constant 0 : i32
    return %c0_i32, %c0_i32_0 : i32, i32
  }
  func.func @transform_11(%arg0: i32) -> (i32, i32) {
    %c0_i32 = arith.constant 0 : i32
    %c0_i32_0 = arith.constant 0 : i32
    return %arg0, %c0_i32 : i32, i32
  }
}

</mosaic_0001>

<bundles_post_ra>
// kernel: mlp_resnet_forward.1
= control target key start
LH: loop header
LB: loop body
LE: loop exit
PB: predicated region body
PF: predicated region fallthrough
CT: control target
= control target key end

     0   :  { %16 = vsyncpa [#allocation3], 0  ;;  %s6235_s0 = inlined_call_operand.vmem [shape: f32[8,256], index: 0, kind: input, shape index: {}]   ;;  %s6236_s1 = inlined_call_operand.vmem [shape: bf16[256,256], index: 1, kind: input, shape index: {}]   ;;  %s6237_s2 = inlined_call_operand.vmem [shape: f32[1,256], index: 2, kind: input, shape index: {}]   ;;  %s6238_s3 = inlined_call_operand.vmem [shape: f32[2,1,256], index: 3, kind: input, shape index: {}]   ;;  %s6239_s4 = inlined_call_operand.vmem [shape: f32[2,1,256], index: 4, kind: input, shape index: {}]   ;;  %s6240_s5 = inlined_call_operand.hbm [shape: bf16[2,256,1024], index: 5, kind: input, shape index: {}]   ;;  %s6241_s6 = inlined_call_operand.vmem [shape: f32[2,1,1024], index: 6, kind: input, shape index: {}]   ;;  %s6242_s7 = inlined_call_operand.hbm [shape: bf16[2,1024,256], index: 7, kind: input, shape index: {}]   ;;  %s6243_s8 = inlined_call_operand.vmem [shape: f32[2,1,256], index: 8, kind: input, shape index: {}]   ;;  %s6244_s9 = inlined_call_operand.vmem [shape: bf16[256,128], index: 9, kind: input, shape index: {}]   ;;  %s6245_s10 = inlined_call_operand.vmem [shape: f32[1,128], index: 10, kind: input, shape index: {}]   ;;  %s6246_s11 = inlined_call_operand.hbm [shape: f32[8,128], index: 11, kind: output, shape index: {}]  }
   0x1   :  { %17 = vsyncpa [#allocation6], 0 }
   0x2   :  { %18 = vsyncpa [#allocation4], 0  ;;  %s5804_s17 = smov [#allocation2]   ;;  %s5732_s21 = scalar_lea.hbm %s6240_s5, 32768 }
   0x3   :  { %s34_s18 = sshll.u32 %s5804_s17, 4  ;;  %p5733_p0 = scmp.ne.s32.totalorder %s6240_s5, %s5732_s21  ;;  %s35_s18 = int_to_ptr.vmem [resolvable:$true] %s34_s18 }
   0x4   :  { %p5736_p1 = scmp.lt.u32.totalorder %s5732_s21, %s6240_s5 }
   0x6   :  { %p5738_p2 = pnand %p5736_p1, %p5733_p0 }
   0x8   :  { %5741 = shalt.err (!%p5738_p2)
}
   0x9   :  { %s5742_s26 = scalar_lea.vmem %s35_s18, 32768  ;;  %p5747_p4 = scmp.lt.s32.totalorder %s35_s18, %s35_s18 }
   0xa   :  { %p5743_p3 = scmp.ne.s32.totalorder %s35_s18, %s5742_s26  ;;  %p5748_p5 = scmp.lt.s32.totalorder %s5742_s26, %s5742_s26 }
   0xc   :  { %p5749_p6 = por %p5748_p5, %p5747_p4 }
   0xe   :  { %p5750_p7 = pnand %p5749_p6, %p5743_p3 }
  0x10   :  { %5753 = shalt.err (!%p5750_p7)
}
  0x11   :  { %s5805_s27 = smov 512   ;;  %s5806_s28 = smov 32  }
  0x12   :  { %40 = dma.hbm_to_vmem [thread:$0]  %s6240_s5, 32768, %s35_s18, [#allocation3], %s5805_s27, %s5805_s27, %s5806_s28  }
  0x13   :  { %s5807_s12 = smov [#allocation5]   ;;  %s5754_s16 = scalar_lea.hbm %s6242_s7, 32768 }
  0x14   :  { %s48_s13 = sshll.u32 %s5807_s12, 4  ;;  %p5755_p8 = scmp.ne.s32.totalorder %s6242_s7, %s5754_s16  ;;  %s49_s13 = int_to_ptr.vmem [resolvable:$true] %s48_s13 }
  0x15   :  { %p5758_p9 = scmp.lt.u32.totalorder %s5754_s16, %s6242_s7 }
  0x17   :  { %p5760_p10 = pnand %p5758_p9, %p5755_p8 }
  0x19   :  { %5763 = shalt.err (!%p5760_p10)
}
  0x1a   :  { %s5764_s22 = scalar_lea.vmem %s49_s13, 32768  ;;  %p5769_p12 = scmp.lt.s32.totalorder %s49_s13, %s49_s13 }
  0x1b   :  { %p5765_p11 = scmp.ne.s32.totalorder %s49_s13, %s5764_s22  ;;  %p5770_p13 = scmp.lt.s32.totalorder %s5764_s22, %s5764_s22 }
  0x1d   :  { %p5771_p0 = por %p5770_p13, %p5769_p12 }
  0x1f   :  { %p5772_p1 = pnand %p5771_p0, %p5765_p11 }
  0x21   :  { %5775 = shalt.err (!%p5772_p1)
}
  0x22   :  { %s5808_s5 = smov 128   ;;  %s5809_s18 = smov 8  }
  0x23   :  { %54 = dma.hbm_to_vmem [thread:$0]  %s6242_s7, 32768, %s49_s13, [#allocation6], %s5808_s5, %s5808_s5, %s5809_s18  }
  0x24   :  { %5798 = dma.done.wait [#allocation3], 32768  }
  0x25   :  { %5799 = vsyncadd [#allocation3], 4294934528 }
  0x26   :  { %5800 = dma.done.wait [#allocation6], 32768  }
  0x27   :  { %5801 = vsyncadd [#allocation6], 4294934528  ;;  %v5208_v0 = vld [vmem:[%s6236_s1 + $0x4] ss:$8 sps:$4 sm:$0xff]   ;;  %v5210_v1 = vld [vmem:[%s6236_s1] ss:$8 sps:$4 sm:$0xff]  }
  0x28   :  { %276 = vmatprep.subr.bf16.mxu0 %v5208_v0  ;;  %v5211_v2 = vld [vmem:[%s6236_s1 + $0x14] ss:$8 sps:$4 sm:$0xff]   ;;  %v5213_v3 = vld [vmem:[%s6236_s1 + $0x10] ss:$8 sps:$4 sm:$0xff]   ;;  %v5214_v4 = vld [vmem:[%s6236_s1 + $0x24] ss:$8 sps:$4 sm:$0xff]  }
  0x29   :  { %277 = vmatpush1.bf16.msra.mxu0 %v5210_v1  ;;  %v5216_v5 = vld [vmem:[%s6236_s1 + $0x20] ss:$8 sps:$4 sm:$0xff]   ;;  %v5217_v6 = vld [vmem:[%s6236_s1 + $0x34] ss:$8 sps:$4 sm:$0xff]   ;;  %v5219_v7 = vld [vmem:[%s6236_s1 + $0x30] ss:$8 sps:$4 sm:$0xff]  }
  0x2a   :  { %278 = vmatprep.subr.bf16.mxu0 %v5211_v2  ;;  %v5220_v8 = vld [vmem:[%s6236_s1 + $0x44] ss:$8 sps:$4 sm:$0xff]   ;;  %v5222_v9 = vld [vmem:[%s6236_s1 + $0x40] ss:$8 sps:$4 sm:$0xff]   ;;  %v5223_v10 = vld [vmem:[%s6236_s1 + $0x54] ss:$8 sps:$4 sm:$0xff]  }
  0x2b   :  { %v5225_v11 = vld [vmem:[%s6236_s1 + $0x50] ss:$8 sps:$4 sm:$0xff]   ;;  %v5226_v12 = vld [vmem:[%s6236_s1 + $0x64] ss:$8 sps:$4 sm:$0xff]   ;;  %v5228_v13 = vld [vmem:[%s6236_s1 + $0x60] ss:$8 sps:$4 sm:$0xff]  }
  0x2c   :  { %v69_v14 = vld [vmem:[%s6235_s0 + $0x8] sm:$0xff]  ;;  %v5229_v15 = vld [vmem:[%s6236_s1 + $0x74] ss:$8 sps:$4 sm:$0xff]   ;;  %v5231_v17 = vld [vmem:[%s6236_s1 + $0x70] ss:$8 sps:$4 sm:$0xff]   ;;  %s5810_s26 = smov [#allocation7]  }
  0x2d   :  { %279 = vmatpush1.bf16.msra.mxu0 %v5213_v3  ;;  %v71_v16 = vpack.c.bf16 %v69_v14, %v69_v14  ;;  %v5232_v18 = vld [vmem:[%s6236_s1 + $0x84] ss:$8 sps:$4 sm:$0xff]   ;;  %v5234_v19 = vld [vmem:[%s6236_s1 + $0x80] ss:$8 sps:$4 sm:$0xff]   ;;  %v5235_v20 = vld [vmem:[%s6236_s1 + $0x94] ss:$8 sps:$4 sm:$0xff]  }
  0x2e   :  { %280 = vmatprep.subr.bf16.mxu0 %v5214_v4  ;;  %v5237_v21 = vld [vmem:[%s6236_s1 + $0x90] ss:$8 sps:$4 sm:$0xff]   ;;  %v5238_v22 = vld [vmem:[%s6236_s1 + $0xa4] ss:$8 sps:$4 sm:$0xff]   ;;  %v5240_v23 = vld [vmem:[%s6236_s1 + $0xa0] ss:$8 sps:$4 sm:$0xff]  }
  0x2f   :  { %308 = vmatprep.mubr.bf16.mxu0 %v71_v16  ;;  %v5241_v24 = vld [vmem:[%s6236_s1 + $0xb4] ss:$8 sps:$4 sm:$0xff]   ;;  %v5243_v25 = vld [vmem:[%s6236_s1 + $0xb0] ss:$8 sps:$4 sm:$0xff]   ;;  %v5244_v26 = vld [vmem:[%s6236_s1 + $0xc4] ss:$8 sps:$4 sm:$0xff]  }
  0x30   :  { %v5246_v27 = vld [vmem:[%s6236_s1 + $0xc0] ss:$8 sps:$4 sm:$0xff]   ;;  %v5247_v28 = vld [vmem:[%s6236_s1 + $0xd4] ss:$8 sps:$4 sm:$0xff]   ;;  %v5249_v29 = vld [vmem:[%s6236_s1 + $0xd0] ss:$8 sps:$4 sm:$0xff]  }
  0x31   :  { %281 = vmatpush1.bf16.msra.mxu0 %v5216_v5  ;;  %v5250_v30 = vld [vmem:[%s6236_s1 + $0xe4] ss:$8 sps:$4 sm:$0xff]   ;;  %v5252_v31 = vld [vmem:[%s6236_s1 + $0xe0] ss:$8 sps:$4 sm:$0xff]   ;;  %v5253_v32 = vld [vmem:[%s6236_s1 + $0xf4] ss:$8 sps:$4 sm:$0xff]  }
  0x32   :  { %282 = vmatprep.subr.bf16.mxu0 %v5217_v6  ;;  %v5255_v33 = vld [vmem:[%s6236_s1 + $0xf0] ss:$8 sps:$4 sm:$0xff]   ;;  %v68_v34 = vld [vmem:[%s6235_s0] sm:$0xff]  ;;  %v367_v38 = vld [vmem:[#allocation2 + $0x8] sm:$0xff]  ;;  %s4586_s27 = sshll.u32 %s5810_s26, 4  ;;  %s4587_s27 = int_to_ptr.vmem [resolvable:$true] %s4586_s27 }
  0x33   :  { %v70_v35 = vpack.c.bf16 %v68_v34, %v68_v34  ;;  %v366_v36 = vld [vmem:[#allocation2] sm:$0xff]  ;;  %v371_v40 = vld [vmem:[#allocation2 + $0x28] sm:$0xff]  ;;  %s5776_s28 = scalar_lea.vmem %s4587_s27, 128  ;;  %p5781_p3 = scmp.lt.s32.totalorder %s4587_s27, %s4587_s27 }
  0x34   :  { %v370_v37 = vld [vmem:[#allocation2 + $0x20] sm:$0xff]  ;;  %v4630_v44 = vcombine.low %v367_v38, %v371_v40  ;;  %v4631_v45 = vcombine.high %v367_v38, %v371_v40  ;;  %v375_v47 = vld [vmem:[#allocation2 + $0x48] sm:$0xff]  ;;  %p5777_p2 = scmp.ne.s32.totalorder %s4587_s27, %s5776_s28  ;;  %p5782_p4 = scmp.lt.s32.totalorder %s5776_s28, %s5776_s28 }
  0x35   :  { %283 = vmatpush1.bf16.msra.mxu0 %v5219_v7  ;;  %v4629_v39 = vcombine.high %v366_v36, %v370_v37  ;;  %v4628_v41 = vcombine.low %v366_v36, %v370_v37  ;;  %v374_v42 = vld [vmem:[#allocation2 + $0x40] sm:$0xff]  ;;  %v379_v48 = vld [vmem:[#allocation2 + $0x68] sm:$0xff] }
  0x36   :  { %284 = vmatprep.subr.bf16.mxu0 %v5220_v8  ;;  %v378_v43 = vld [vmem:[#allocation2 + $0x60] sm:$0xff]  ;;  %v4639_v50 = vcombine.high %v375_v47, %v379_v48  ;;  %v383_v52 = vld [vmem:[#allocation2 + $0x88] sm:$0xff]  ;;  %v4638_v55 = vcombine.low %v375_v47, %v379_v48  ;;  %p5783_p5 = por %p5782_p4, %p5781_p3 }
  0x37   :  { %v4637_v46 = vcombine.high %v374_v42, %v378_v43  ;;  %v382_v49 = vld [vmem:[#allocation2 + $0x80] sm:$0xff]  ;;  %1176 = vmatprep.subr.bf16.mxu1 %v4629_v39  ;;  %v387_v53 = vld [vmem:[#allocation2 + $0xa8] sm:$0xff]  ;;  %v4636_v54 = vcombine.low %v374_v42, %v378_v43 }
  0x38   :  { %v386_v51 = vld [vmem:[#allocation2 + $0xa0] sm:$0xff]  ;;  %1177 = vmatpush1.bf16.msra.mxu1 %v4628_v41  ;;  %v4647_v57 = vcombine.high %v383_v52, %v387_v53  ;;  %v391_v60 = vld [vmem:[#allocation2 + $0xc8] sm:$0xff]  ;;  %v4646_v63 = vcombine.low %v383_v52, %v387_v53  ;;  %p5784_p6 = pnand %p5783_p5, %p5777_p2 }
  0x39   :  { %285 = vmatpush1.bf16.msra.mxu0 %v5222_v9  ;;  %1178 = vmatprep.subr.bf16.mxu1 %v4637_v46  ;;  %v4645_v56 = vcombine.high %v382_v49, %v386_v51  ;;  %v390_v58 = vld [vmem:[#allocation2 + $0xc0] sm:$0xff]  ;;  %v395_v61 = vld [vmem:[#allocation2 + $0xe8] sm:$0xff]  ;;  %v4644_v62 = vcombine.low %v382_v49, %v386_v51 }
  0x3a   :  { %286 = vmatprep.subr.bf16.mxu0 %v5223_v10  ;;  %v394_v59 = vld [vmem:[#allocation2 + $0xe0] sm:$0xff]  ;;  %v4655_v1 = vcombine.high %v391_v60, %v395_v61  ;;  %v399_v4 = vld [vmem:[#allocation2 + $0x108] sm:$0xff]  ;;  %v4654_v7 = vcombine.low %v391_v60, %v395_v61 }
  0x3b   :  { %v4653_v0 = vcombine.high %v390_v58, %v394_v59  ;;  %v398_v2 = vld [vmem:[#allocation2 + $0x100] sm:$0xff]  ;;  %v403_v5 = vld [vmem:[#allocation2 + $0x128] sm:$0xff]  ;;  %v4652_v6 = vcombine.low %v390_v58, %v394_v59 }
  0x3c   :  { %1179 = vmatpush1.bf16.msra.mxu1 %v4636_v54  ;;  %v402_v3 = vld [vmem:[#allocation2 + $0x120] sm:$0xff]  ;;  %v4663_v9 = vcombine.high %v399_v4, %v403_v5  ;;  %v431_v36 = vld [vmem:[#allocation2 + $0x208] sm:$0xff] }
  0x3d   :  { %287 = vmatpush1.bf16.msra.mxu0 %v5225_v11  ;;  %1180 = vmatprep.subr.bf16.mxu1 %v4645_v56  ;;  %v4661_v8 = vcombine.high %v398_v2, %v402_v3  ;;  %v406_v10 = vld [vmem:[#allocation2 + $0x140] sm:$0xff]  ;;  %v4660_v14 = vcombine.low %v398_v2, %v402_v3  ;;  %v435_v37 = vld [vmem:[#allocation2 + $0x228] sm:$0xff] }
  0x3e   :  { %288 = vmatprep.subr.bf16.mxu0 %v5226_v12  ;;  %v410_v11 = vld [vmem:[#allocation2 + $0x160] sm:$0xff]  ;;  %v407_v12 = vld [vmem:[#allocation2 + $0x148] sm:$0xff]  ;;  %v4695_v41 = vcombine.high %v431_v36, %v435_v37  ;;  %v4694_v43 = vcombine.low %v431_v36, %v435_v37 }
  0x3f   :  { %v4669_v16 = vcombine.high %v406_v10, %v410_v11  ;;  %v430_v34 = vld [vmem:[#allocation2 + $0x200] sm:$0xff]  ;;  %v479_v37 = vld [vmem:[#allocation2 + $0x388] sm:$0xff] }
  0x40   :  { %1181 = vmatpush1.bf16.msra.mxu1 %v4644_v62  ;;  %v104_v47 = vld [vmem:[%s6237_s2] sm:$0x3] }
  0x41   :  { %289 = vmatpush1.bf16.msra.mxu0 %v5228_v13  ;;  %1182 = vmatprep.subr.bf16.mxu1 %v4653_v0  ;;  %v411_v13 = vld [vmem:[#allocation2 + $0x168] sm:$0xff]  ;;  %v438_v61 = vld [vmem:[#allocation2 + $0x240] sm:$0xff] }
  0x42   :  { %290 = vmatprep.subr.bf16.mxu0 %v5229_v15  ;;  %v4662_v15 = vcombine.low %v399_v4, %v403_v5  ;;  %v442_v62 = vld [vmem:[#allocation2 + $0x260] sm:$0xff] }
  0x43   :  { %v4701_v0 = vcombine.high %v438_v61, %v442_v62  ;;  %v4700_v4 = vcombine.low %v438_v61, %v442_v62  ;;  %v446_v5 = vld [vmem:[#allocation2 + $0x280] sm:$0xff]  ;;  %v373_v62 = vld [vmem:[#allocation2 + $0x38] sm:$0xff] }
  0x44   :  { %1183 = vmatpush1.bf16.msra.mxu1 %v4652_v6  ;;  %v450_v6 = vld [vmem:[#allocation2 + $0x2a0] sm:$0xff] }
  0x45   :  { %291 = vmatpush1.bf16.msra.mxu0 %v5231_v17  ;;  %1184 = vmatprep.subr.bf16.mxu1 %v4661_v8  ;;  %v4671_v17 = vcombine.high %v407_v12, %v411_v13  ;;  %v4709_v8 = vcombine.high %v446_v5, %v450_v6  ;;  %v482_v36 = vld [vmem:[#allocation2 + $0x3a0] sm:$0xff] }
  0x46   :  { %292 = vmatprep.subr.bf16.mxu0 %v5232_v18  ;;  %v414_v18 = vld [vmem:[#allocation2 + $0x180] sm:$0xff] }
  0x48   :  { %1185 = vmatpush1.bf16.msra.mxu1 %v4660_v14  ;;  %v458_v14 = vld [vmem:[#allocation2 + $0x2e0] sm:$0xff] }
  0x49   :  { %293 = vmatpush1.bf16.msra.mxu0 %v5234_v19  ;;  %v418_v19 = vld [vmem:[#allocation2 + $0x1a0] sm:$0xff]  ;;  %1186 = vmatprep.subr.bf16.mxu1 %v4669_v16 }
  0x4a   :  { %294 = vmatprep.subr.bf16.mxu0 %v5235_v20  ;;  %v415_v20 = vld [vmem:[#allocation2 + $0x188] sm:$0xff] }
  0x4d   :  { %295 = vmatpush1.bf16.msra.mxu0 %v5237_v21  ;;  %v419_v21 = vld [vmem:[#allocation2 + $0x1a8] sm:$0xff] }
  0x4e   :  { %296 = vmatprep.subr.bf16.mxu0 %v5238_v22  ;;  %v4668_v22 = vcombine.low %v406_v10, %v410_v11 }
  0x50   :  { %1187 = vmatpush1.bf16.msra.mxu1 %v4668_v22  ;;  %v466_v22 = vld [vmem:[#allocation2 + $0x320] sm:$0xff] }
  0x51   :  { %297 = vmatpush1.bf16.msra.mxu0 %v5240_v23  ;;  %v4670_v23 = vcombine.low %v407_v12, %v411_v13  ;;  %v4708_v12 = vcombine.low %v446_v5, %v450_v6  ;;  %v454_v13 = vld [vmem:[#allocation2 + $0x2c0] sm:$0xff] }
  0x52   :  { %298 = vmatprep.subr.bf16.mxu0 %v5241_v24  ;;  %v4677_v24 = vcombine.high %v414_v18, %v418_v19  ;;  %v4717_v16 = vcombine.high %v454_v13, %v458_v14 }
  0x54   :  { %1188 = vmatprep.subr.bf16.mxu1 %v4677_v24 }
  0x55   :  { %299 = vmatpush1.bf16.msra.mxu0 %v5243_v25  ;;  %v4679_v25 = vcombine.high %v415_v20, %v419_v21 }
  0x56   :  { %300 = vmatprep.subr.bf16.mxu0 %v5244_v26  ;;  %v422_v26 = vld [vmem:[#allocation2 + $0x1c0] sm:$0xff] }
  0x59   :  { %301 = vmatpush1.bf16.msra.mxu0 %v5246_v27  ;;  %v426_v27 = vld [vmem:[#allocation2 + $0x1e0] sm:$0xff] }
  0x5a   :  { %302 = vmatprep.subr.bf16.mxu0 %v5247_v28  ;;  %v423_v28 = vld [vmem:[#allocation2 + $0x1c8] sm:$0xff]  ;;  %v4684_v38 = vcombine.low %v422_v26, %v426_v27 }
  0x5d   :  { %303 = vmatpush1.bf16.msra.mxu0 %v5249_v29  ;;  %v427_v29 = vld [vmem:[#allocation2 + $0x1e8] sm:$0xff] }
  0x5e   :  { %304 = vmatprep.subr.bf16.mxu0 %v5250_v30  ;;  %v4676_v30 = vcombine.low %v414_v18, %v418_v19  ;;  %v4686_v39 = vcombine.low %v423_v28, %v427_v29 }
  0x60   :  { %1189 = vmatpush1.bf16.msra.mxu1 %v4676_v30 }
  0x61   :  { %305 = vmatpush1.bf16.msra.mxu0 %v5252_v31  ;;  %v4678_v31 = vcombine.low %v415_v20, %v419_v21  ;;  %v4716_v20 = vcombine.low %v454_v13, %v458_v14  ;;  %v462_v21 = vld [vmem:[#allocation2 + $0x300] sm:$0xff] }
  0x62   :  { %306 = vmatprep.subr.bf16.mxu0 %v5253_v32  ;;  %v4685_v32 = vcombine.high %v422_v26, %v426_v27  ;;  %v4725_v24 = vcombine.high %v462_v21, %v466_v22  ;;  %v4724_v26 = vcombine.low %v462_v21, %v466_v22  ;;  %v470_v27 = vld [vmem:[#allocation2 + $0x340] sm:$0xff] }
  0x64   :  { %1190 = vmatprep.subr.bf16.mxu1 %v4685_v32  ;;  %v471_v32 = vld [vmem:[#allocation2 + $0x348] sm:$0xff] }
  0x65   :  { %307 = vmatpush1.bf16.msra.mxu0 %v5255_v33  ;;  %v4687_v33 = vcombine.high %v423_v28, %v427_v29  ;;  %1191 = vmatpush1.bf16.msra.mxu1 %v4684_v38  ;;  %v474_v28 = vld [vmem:[#allocation2 + $0x360] sm:$0xff]  ;;  %v483_v38 = vld [vmem:[#allocation2 + $0x3a8] sm:$0xff] }
  0x66   :  { %1217 = vmatprep.subr.bf16.mxu0 %v4631_v45 }
  0x68   :  { %309 = vmatmul.mubr.bf16.vlgmr.msra.gmra.mrb[0].mxu0 %v70_v35  ;;  %v434_v35 = vld [vmem:[#allocation2 + $0x220] sm:$0xff] }
  0x69   :  { %1218 = vmatpush1.bf16.msra.mxu0 %v4630_v44  ;;  %v4693_v40 = vcombine.high %v430_v34, %v434_v35  ;;  %v4692_v42 = vcombine.low %v430_v34, %v434_v35  ;;  %v106_v44 = vlaneseq  ;;  %v478_v34 = vld [vmem:[#allocation2 + $0x380] sm:$0xff] }
  0x6a   :  { %1219 = vmatprep.subr.bf16.mxu0 %v4639_v50 }
  0x6b   :  { %1192 = vmatprep.subr.bf16.mxu1 %v4693_v40  ;;  %v5997_v45 = vshrl.u32 %v106_v44, 7  ;;  %v490_v44 = vld [vmem:[#allocation2 + $0x3e0] sm:$0xff] }
  0x6c   :  { %1193 = vmatpush1.bf16.msra.mxu1 %v4692_v42  ;;  %v4743_v42 = vcombine.high %v479_v37, %v483_v38 }
  0x6d   :  { %1220 = vmatpush1.bf16.msra.mxu0 %v4638_v55  ;;  %v6000_v46 = vsub.s32 0, %v5997_v45  ;;  %v6006_v48 = vsub.s32 1, %v5997_v45  ;;  %1194 = vmatprep.subr.bf16.mxu1 %v4701_v0 }
  0x6e   :  { %1221 = vmatprep.subr.bf16.mxu0 %v4647_v57 }
  0x6f   :  { %v109_v49 = vrot.slane %v104_v47, %v6000_v46  ;;  %v113_v50 = vrot.slane %v104_v47, %v6006_v48  ;;  %v487_v47 = vld [vmem:[#allocation2 + $0x3c8] sm:$0xff] }
  0x70   :  { %1195 = vmatpush1.bf16.msra.mxu1 %v4700_v4 }
  0x71   :  { %1222 = vmatpush1.bf16.msra.mxu0 %v4646_v63  ;;  %v439_v63 = vld [vmem:[#allocation2 + $0x248] sm:$0xff]  ;;  %1196 = vmatprep.subr.bf16.mxu1 %v4709_v8 }
  0x72   :  { %1223 = vmatprep.subr.bf16.mxu0 %v4655_v1  ;;  %v443_v1 = vld [vmem:[#allocation2 + $0x268] sm:$0xff] }
  0x73   :  { %v4702_v2 = vcombine.low %v439_v63, %v443_v1  ;;  %v4703_v3 = vcombine.high %v439_v63, %v443_v1 }
  0x74   :  { %1197 = vmatpush1.bf16.msra.mxu1 %v4708_v12 }
  0x75   :  { %1224 = vmatpush1.bf16.msra.mxu0 %v4654_v7  ;;  %v447_v7 = vld [vmem:[#allocation2 + $0x288] sm:$0xff]  ;;  %1198 = vmatprep.subr.bf16.mxu1 %v4717_v16 }
  0x76   :  { %1225 = vmatprep.subr.bf16.mxu0 %v4663_v9  ;;  %v451_v9 = vld [vmem:[#allocation2 + $0x2a8] sm:$0xff] }
  0x77   :  { %v4710_v10 = vcombine.low %v447_v7, %v451_v9  ;;  %v4711_v11 = vcombine.high %v447_v7, %v451_v9  ;;  %v336_v9 = vld [vmem:[%s6238_s3] sm:$0x3] }
  0x78   :  { %1199 = vmatpush1.bf16.msra.mxu1 %v4716_v20  ;;  %v345_v13 = vrot.slane %v336_v9, %v6006_v48  ;;  %v341_v14 = vrot.slane %v336_v9, %v6000_v46 }
  0x79   :  { %1226 = vmatpush1.bf16.msra.mxu0 %v4662_v15  ;;  %v455_v15 = vld [vmem:[#allocation2 + $0x2c8] sm:$0xff]  ;;  %1200 = vmatprep.subr.bf16.mxu1 %v4725_v24  ;;  %v376_v24 = vld [vmem:[#allocation2 + $0x50] sm:$0xff] }
  0x7a   :  { %1227 = vmatprep.subr.bf16.mxu0 %v4671_v17  ;;  %v459_v17 = vld [vmem:[#allocation2 + $0x2e8] sm:$0xff] }
  0x7b   :  { %v4718_v18 = vcombine.low %v455_v15, %v459_v17  ;;  %v4719_v19 = vcombine.high %v455_v15, %v459_v17 }
  0x7c   :  { %1201 = vmatpush1.bf16.msra.mxu1 %v4724_v26  ;;  %v377_v26 = vld [vmem:[#allocation2 + $0x58] sm:$0xff] }
  0x7d   :  { %1228 = vmatpush1.bf16.msra.mxu0 %v4670_v23  ;;  %v463_v23 = vld [vmem:[#allocation2 + $0x308] sm:$0xff] }
  0x7e   :  { %1229 = vmatprep.subr.bf16.mxu0 %v4679_v25  ;;  %v467_v25 = vld [vmem:[#allocation2 + $0x328] sm:$0xff] }
  0x7f   :  { %v4726_v29 = vcombine.low %v463_v23, %v467_v25  ;;  %v4727_v30 = vcombine.high %v463_v23, %v467_v25  ;;  %v380_v25 = vld [vmem:[#allocation2 + $0x70] sm:$0xff] }
  0x81   :  { %1230 = vmatpush1.bf16.msra.mxu0 %v4678_v31  ;;  %v4733_v31 = vcombine.high %v470_v27, %v474_v28 }
  0x82   :  { %1231 = vmatprep.subr.bf16.mxu0 %v4687_v33  ;;  %v475_v33 = vld [vmem:[#allocation2 + $0x368] sm:$0xff] }
  0x83   :  { %v4735_v35 = vcombine.high %v471_v32, %v475_v33  ;;  %1202 = vmatprep.subr.bf16.mxu1 %v4733_v31  ;;  %v4734_v40 = vcombine.low %v471_v32, %v475_v33  ;;  %v4641_v31 = vcombine.high %v376_v24, %v380_v25  ;;  %v388_v33 = vld [vmem:[#allocation2 + $0xb0] sm:$0xff] }
  0x85   :  { %1232 = vmatpush1.bf16.msra.mxu0 %v4686_v39  ;;  %v4732_v39 = vcombine.low %v470_v27, %v474_v28  ;;  %v381_v27 = vld [vmem:[#allocation2 + $0x78] sm:$0xff] }
  0x86   :  { %1233 = vmatprep.subr.bf16.mxu0 %v4695_v41  ;;  %v4741_v41 = vcombine.high %v478_v34, %v482_v36  ;;  %v4643_v32 = vcombine.high %v377_v26, %v381_v27 }
  0x87   :  { %1203 = vmatpush1.bf16.msra.mxu1 %v4732_v39 }
  0x88   :  { %1204 = vmatprep.subr.bf16.mxu1 %v4741_v41  ;;  %v396_v41 = vld [vmem:[#allocation2 + $0xf0] sm:$0xff] }
  0x89   :  { %1234 = vmatpush1.bf16.msra.mxu0 %v4694_v43  ;;  %v486_v43 = vld [vmem:[#allocation2 + $0x3c0] sm:$0xff] }
  0x8a   :  { %1235 = vmatprep.subr.bf16.mxu0 %v4703_v3 }
  0x8d   :  { %1236 = vmatpush1.bf16.msra.mxu0 %v4702_v2 }
  0x8e   :  { %1237 = vmatprep.subr.bf16.mxu0 %v4711_v11 }
  0x91   :  { %1238 = vmatpush1.bf16.msra.mxu0 %v4710_v10  ;;  %v350_v10 = vld [vmem:[%s6239_s4] sm:$0x3] }
  0x92   :  { %1239 = vmatprep.subr.bf16.mxu0 %v4719_v19  ;;  %v359_v17 = vrot.slane %v350_v10, %v6006_v48  ;;  %v355_v19 = vrot.slane %v350_v10, %v6000_v46 }
  0x95   :  { %1240 = vmatpush1.bf16.msra.mxu0 %v4718_v18 }
  0x96   :  { %1241 = vmatprep.subr.bf16.mxu0 %v4727_v30  ;;  %v384_v30 = vld [vmem:[#allocation2 + $0x90] sm:$0xff] }
  0x99   :  { %1242 = vmatpush1.bf16.msra.mxu0 %v4726_v29 }
  0x9a   :  { %1243 = vmatprep.subr.bf16.mxu0 %v4735_v35  ;;  %v389_v35 = vld [vmem:[#allocation2 + $0xb8] sm:$0xff] }
  0x9d   :  { %1244 = vmatpush1.bf16.msra.mxu0 %v4734_v40  ;;  %v392_v40 = vld [vmem:[#allocation2 + $0xd0] sm:$0xff] }
  0x9e   :  { %1245 = vmatprep.subr.bf16.mxu0 %v4743_v42  ;;  %v393_v42 = vld [vmem:[#allocation2 + $0xd8] sm:$0xff] }
 0x13b   :  { %v310_v51 = vpop.f32.mrb[0].mxu0 }
 0x13c   :  { %v6010_v52 = vadd.f32 %v310_v51, %v109_v49  ;;  %v312_v53 = vpop.f32.mrb[1].mxu0  ;;  %v491_v49 = vld [vmem:[#allocation2 + $0x3e8] sm:$0xff]  ;;  %v4742_v51 = vcombine.low %v479_v37, %v483_v38  ;;  %v4642_v37 = vcombine.low %v377_v26, %v381_v27  ;;  %v4649_v38 = vcombine.high %v384_v30, %v388_v33 }
 0x13d   :  { %v6012_v54 = vadd.f32 %v312_v53, %v113_v50  ;;  %v314_v55 = vpop.f32.mrb[2].mxu0  ;;  %v4740_v50 = vcombine.low %v478_v34, %v482_v36  ;;  %v4749_v53 = vcombine.high %v486_v43, %v490_v44  ;;  %v385_v34 = vld [vmem:[#allocation2 + $0x98] sm:$0xff]  ;;  %v4640_v36 = vcombine.low %v376_v24, %v380_v25 }
 0x13e   :  { %v315_v56 = vpop.f32.mrb[3].mxu0  ;;  %v322_v58 = vmul.f32 %v6010_v52, %v6010_v52  ;;  %v4751_v55 = vcombine.high %v487_v47, %v491_v49  ;;  %1246 = vmatpush1.bf16.msra.mxu0 %v4742_v51  ;;  %v4651_v39 = vcombine.high %v385_v34, %v389_v35  ;;  %v400_v51 = vld [vmem:[#allocation2 + $0x110] sm:$0xff]  ;;  %v437_v24 = vld [vmem:[#allocation2 + $0x238] sm:$0xff] }
 0x13f   :  { %v317_v57 = vadd.f32 %v6012_v54, %v6010_v52  ;;  %v323_v59 = vmul.f32 %v6012_v54, %v6012_v54  ;;  %1205 = vmatpush1.bf16.msra.mxu1 %v4740_v50  ;;  %v4748_v56 = vcombine.low %v486_v43, %v490_v44  ;;  %v397_v43 = vld [vmem:[#allocation2 + $0xf8] sm:$0xff]  ;;  %v4648_v44 = vcombine.low %v384_v30, %v388_v33  ;;  %v440_v30 = vld [vmem:[#allocation2 + $0x250] sm:$0xff] }
 0x140   :  { %1206 = vmatprep.subr.bf16.mxu1 %v4749_v53  ;;  %1247 = vmatprep.subr.bf16.mxu0 %v4751_v55  ;;  %v4659_v50 = vcombine.high %v393_v42, %v397_v43  ;;  %v404_v53 = vld [vmem:[#allocation2 + $0x130] sm:$0xff]  ;;  %v401_v55 = vld [vmem:[#allocation2 + $0x118] sm:$0xff] }
 0x141   :  { %318 = vadd.xlane.f32.xlu0 %v317_v57  ;;  %v324_v60 = vadd.f32 %v323_v59, %v322_v58  ;;  %v4750_v57 = vcombine.low %v487_v47, %v491_v49  ;;  %v368_v58 = vld [vmem:[#allocation2 + $0x10] sm:$0xff]  ;;  %v4650_v47 = vcombine.low %v385_v34, %v389_v35  ;;  %v4657_v49 = vcombine.high %v392_v40, %v396_v41  ;;  %v445_v33 = vld [vmem:[#allocation2 + $0x278] sm:$0xff] }
 0x142   :  { %v372_v59 = vld [vmem:[#allocation2 + $0x30] sm:$0xff] }
 0x143   :  { %1207 = vmatpush1.bf16.msra.mxu1 %v4748_v56  ;;  %1248 = vmatpush1.bf16.msra.mxu0 %v4750_v57  ;;  %v4633_v61 = vcombine.high %v368_v58, %v372_v59  ;;  %v4632_v63 = vcombine.low %v368_v58, %v372_v59  ;;  %v405_v56 = vld [vmem:[#allocation2 + $0x138] sm:$0xff]  ;;  %v4656_v57 = vcombine.low %v392_v40, %v396_v41 }
 0x144   :  { %v4658_v58 = vcombine.low %v393_v42, %v397_v43  ;;  %v4665_v59 = vcombine.high %v400_v51, %v404_v53  ;;  %v449_v40 = vld [vmem:[#allocation2 + $0x298] sm:$0xff] }
 0x145   :  { %325 = vadd.xlane.f32.xlu0 %v324_v60  ;;  %v369_v60 = vld [vmem:[#allocation2 + $0x18] sm:$0xff]  ;;  %1258 = vmatprep.subr.bf16.mxu1 %v4633_v61  ;;  %v408_v61 = vld [vmem:[#allocation2 + $0x150] sm:$0xff] }
 0x146   :  { %v4634_v0 = vcombine.low %v369_v60, %v373_v62  ;;  %v4635_v1 = vcombine.high %v369_v60, %v373_v62  ;;  %v4667_v60 = vcombine.high %v401_v55, %v405_v56  ;;  %v412_v62 = vld [vmem:[#allocation2 + $0x170] sm:$0xff]  ;;  %v453_v41 = vld [vmem:[#allocation2 + $0x2b8] sm:$0xff] }
 0x147   :  { %v4672_v9 = vcombine.low %v408_v61, %v412_v62 }
 0x148   :  { %1299 = vmatprep.subr.bf16.mxu0 %v4635_v1  ;;  %v4664_v1 = vcombine.low %v400_v51, %v404_v53  ;;  %v457_v51 = vld [vmem:[#allocation2 + $0x2d8] sm:$0xff] }
 0x149   :  { %v461_v53 = vld [vmem:[#allocation2 + $0x2f8] sm:$0xff] }
 0x1ce   :  { %v319_v2 = vpop.xlane.xlu0 %318 }
 0x1cf   :  { %v321_v3 = vmul.f32 0.00390625, %v319_v2  ;;  %v4666_v2 = vcombine.low %v401_v55, %v405_v56  ;;  %v4714_v56 = vcombine.low %v449_v40, %v453_v41 }
 0x1d1   :  { %v328_v5 = vmul.f32 %v321_v3, %v321_v3  ;;  %v330_v11 = vsub.f32 %v6010_v52, %v321_v3  ;;  %v331_v12 = vsub.f32 %v6012_v54, %v321_v3  ;;  %v4673_v3 = vcombine.high %v408_v61, %v412_v62  ;;  %v465_v61 = vld [vmem:[#allocation2 + $0x318] sm:$0xff] }
 0x1d2   :  { %v326_v4 = vpop.xlane.xlu0 %325  ;;  %v469_v62 = vld [vmem:[#allocation2 + $0x338] sm:$0xff] }
 0x1d3   :  { %v327_v6 = vmul.f32 0.00390625, %v326_v4 }
 0x1d5   :  { %v329_v7 = vsub.f32 %v327_v6, %v328_v5  ;;  %v416_v5 = vld [vmem:[#allocation2 + $0x190] sm:$0xff] }
 0x1d6   :  { %v420_v6 = vld [vmem:[#allocation2 + $0x1b0] sm:$0xff] }
 0x1d7   :  { %v332_v8 = vadd.f32 1e-05, %v329_v7  ;;  %v417_v7 = vld [vmem:[#allocation2 + $0x198] sm:$0xff] }
 0x1d9   :  { %5656 = vrsqrt.f32 %v332_v8  ;;  %v421_v8 = vld [vmem:[#allocation2 + $0x1b8] sm:$0xff] }
 0x1e3   :  { %v5657_v15 = vpop.eup %5656 }
 0x1e4   :  { %v335_v16 = vmul.f32 %v5657_v15, %v331_v12  ;;  %v334_v18 = vmul.f32 %v5657_v15, %v330_v11  ;;  %v4681_v11 = vcombine.high %v416_v5, %v420_v6  ;;  %v4683_v12 = vcombine.high %v417_v7, %v421_v8  ;;  %v425_v15 = vld [vmem:[#allocation2 + $0x1d8] sm:$0xff] }
 0x1e6   :  { %v349_v20 = vmul.f32 %v345_v13, %v335_v16  ;;  %v348_v21 = vmul.f32 %v341_v14, %v334_v18  ;;  %v424_v13 = vld [vmem:[#allocation2 + $0x1d0] sm:$0xff]  ;;  %v429_v16 = vld [vmem:[#allocation2 + $0x1f8] sm:$0xff]  ;;  %v4682_v18 = vcombine.low %v417_v7, %v421_v8  ;;  %v4730_v8 = vcombine.low %v465_v61, %v469_v62 }
 0x1e7   :  { %v428_v14 = vld [vmem:[#allocation2 + $0x1f0] sm:$0xff]  ;;  %v4690_v26 = vcombine.low %v425_v15, %v429_v16 }
 0x1e8   :  { %v363_v22 = vadd.f32 %v359_v17, %v349_v20  ;;  %v362_v23 = vadd.f32 %v355_v19, %v348_v21  ;;  %v4680_v17 = vcombine.low %v416_v5, %v420_v6  ;;  %v4689_v19 = vcombine.high %v424_v13, %v428_v14  ;;  %v432_v21 = vld [vmem:[#allocation2 + $0x210] sm:$0xff]  ;;  %v473_v5 = vld [vmem:[#allocation2 + $0x358] sm:$0xff] }
 0x1e9   :  { %v4691_v20 = vcombine.high %v425_v15, %v429_v16  ;;  %v4688_v25 = vcombine.low %v424_v13, %v428_v14  ;;  %v477_v6 = vld [vmem:[#allocation2 + $0x378] sm:$0xff] }
 0x1ea   :  { %v365_v28 = vpack.c.bf16 %v363_v22, %v363_v22  ;;  %v6032_v29 = vpack.c.bf16 %v362_v23, %v362_v23  ;;  %v436_v22 = vld [vmem:[#allocation2 + $0x230] sm:$0xff]  ;;  %v433_v23 = vld [vmem:[#allocation2 + $0x218] sm:$0xff]  ;;  %v4738_v16 = vcombine.low %v473_v5, %v477_v6 }
 0x1eb   :  { %v4697_v27 = vcombine.high %v432_v21, %v436_v22  ;;  %v4696_v34 = vcombine.low %v432_v21, %v436_v22  ;;  %v4698_v35 = vcombine.low %v433_v23, %v437_v24  ;;  %v481_v13 = vld [vmem:[#allocation2 + $0x398] sm:$0xff] }
 0x1ec   :  { %1208 = vmatprep.mubr.bf16.mxu1 %v365_v28  ;;  %1249 = vmatprep.mubr.bf16.mxu0 %v365_v28  ;;  %v485_v14 = vld [vmem:[#allocation2 + $0x3b8] sm:$0xff] }
 0x1ed   :  { %1209 = vmatmul.mubr.bf16.vlgmr.msra.gmra.mrb[0].mxu1 %v6032_v29  ;;  %1250 = vmatmul.mubr.bf16.vlgmr.msra.gmra.mrb[4].mxu0 %v6032_v29  ;;  %v489_v21 = vld [vmem:[#allocation2 + $0x3d8] sm:$0xff] }
 0x1ee   :  { %1259 = vmatpush1.bf16.msra.mxu1 %v4632_v63  ;;  %1300 = vmatpush1.bf16.msra.mxu0 %v4634_v0  ;;  %v409_v63 = vld [vmem:[#allocation2 + $0x158] sm:$0xff] }
 0x1ef   :  { %1290 = vmatprep.mubr.bf16.mxu1 %v365_v28  ;;  %1331 = vmatprep.mubr.bf16.mxu0 %v365_v28  ;;  %v413_v0 = vld [vmem:[#allocation2 + $0x178] sm:$0xff]  ;;  %v4699_v28 = vcombine.high %v433_v23, %v437_v24  ;;  %v4746_v24 = vcombine.low %v481_v13, %v485_v14 }
 0x1f0   :  { %1260 = vmatprep.subr.bf16.mxu1 %v4641_v31  ;;  %1301 = vmatprep.subr.bf16.mxu0 %v4643_v32  ;;  %v4675_v4 = vcombine.high %v409_v63, %v413_v0  ;;  %v4674_v10 = vcombine.low %v409_v63, %v413_v0  ;;  %v444_v31 = vld [vmem:[#allocation2 + $0x270] sm:$0xff]  ;;  %v441_v32 = vld [vmem:[#allocation2 + $0x258] sm:$0xff]  ;;  %v4722_v0 = vcombine.low %v457_v51, %v461_v53 }
 0x1f1   :  { %v4704_v42 = vcombine.low %v440_v30, %v444_v31  ;;  %v4706_v43 = vcombine.low %v441_v32, %v445_v33  ;;  %v493_v22 = vld [vmem:[#allocation2 + $0x3f8] sm:$0xff] }
 0x1f2   :  { %1261 = vmatpush1.bf16.msra.mxu1 %v4640_v36  ;;  %1302 = vmatpush1.bf16.msra.mxu0 %v4642_v37  ;;  %v4705_v36 = vcombine.high %v440_v30, %v444_v31  ;;  %v4707_v37 = vcombine.high %v441_v32, %v445_v33  ;;  %v5258_v30 = vld [vmem:[#allocation5 + $0x4] ss:$8 sps:$4 sm:$0xff]   ;;  %v5256_v32 = vld [vmem:[#allocation5] ss:$8 sps:$4 sm:$0xff]  }
 0x1f3   :  { %1262 = vmatprep.subr.bf16.mxu1 %v4649_v38  ;;  %1303 = vmatprep.subr.bf16.mxu0 %v4651_v39  ;;  %v448_v38 = vld [vmem:[#allocation2 + $0x290] sm:$0xff]  ;;  %v5261_v31 = vld [vmem:[#allocation5 + $0x104] ss:$8 sps:$4 sm:$0xff]   ;;  %v5259_v33 = vld [vmem:[#allocation5 + $0x100] ss:$8 sps:$4 sm:$0xff]  }
 0x1f4   :  { %v452_v39 = vld [vmem:[#allocation2 + $0x2b0] sm:$0xff] }
 0x1f5   :  { %v4712_v55 = vcombine.low %v448_v38, %v452_v39 }
 0x1f6   :  { %1263 = vmatpush1.bf16.msra.mxu1 %v4648_v44  ;;  %1304 = vmatpush1.bf16.msra.mxu0 %v4650_v47  ;;  %v4713_v44 = vcombine.high %v448_v38, %v452_v39  ;;  %v4715_v47 = vcombine.high %v449_v40, %v453_v41  ;;  %v5270_v38 = vld [vmem:[#allocation5 + $0x24] ss:$8 sps:$4 sm:$0xff]   ;;  %v5268_v40 = vld [vmem:[#allocation5 + $0x20] ss:$8 sps:$4 sm:$0xff]  }
 0x1f7   :  { %1264 = vmatprep.subr.bf16.mxu1 %v4657_v49  ;;  %1305 = vmatprep.subr.bf16.mxu0 %v4659_v50  ;;  %v456_v49 = vld [vmem:[#allocation2 + $0x2d0] sm:$0xff]  ;;  %v5273_v39 = vld [vmem:[#allocation5 + $0x124] ss:$8 sps:$4 sm:$0xff]   ;;  %v5271_v41 = vld [vmem:[#allocation5 + $0x120] ss:$8 sps:$4 sm:$0xff]  }
 0x1f8   :  { %v460_v50 = vld [vmem:[#allocation2 + $0x2f0] sm:$0xff] }
 0x1f9   :  { %v4720_v63 = vcombine.low %v456_v49, %v460_v50 }
 0x1fa   :  { %1265 = vmatpush1.bf16.msra.mxu1 %v4656_v57  ;;  %1306 = vmatpush1.bf16.msra.mxu0 %v4658_v58  ;;  %v4721_v57 = vcombine.high %v456_v49, %v460_v50  ;;  %v4723_v58 = vcombine.high %v457_v51, %v461_v53  ;;  %v5285_v49 = vld [vmem:[#allocation5 + $0x144] ss:$8 sps:$4 sm:$0xff]   ;;  %v5280_v50 = vld [vmem:[#allocation5 + $0x40] ss:$8 sps:$4 sm:$0xff]   ;;  %v5288_v53 = vld [vmem:[#allocation5 + $0x54] ss:$8 sps:$4 sm:$0xff]  }
 0x1fb   :  { %1266 = vmatprep.subr.bf16.mxu1 %v4665_v59  ;;  %1307 = vmatprep.subr.bf16.mxu0 %v4667_v60  ;;  %v464_v59 = vld [vmem:[#allocation2 + $0x310] sm:$0xff]  ;;  %v5283_v51 = vld [vmem:[#allocation5 + $0x140] ss:$8 sps:$4 sm:$0xff]  }
 0x1fc   :  { %v468_v60 = vld [vmem:[#allocation2 + $0x330] sm:$0xff] }
 0x1fd   :  { %v4728_v7 = vcombine.low %v464_v59, %v468_v60 }
 0x1fe   :  { %1267 = vmatpush1.bf16.msra.mxu1 %v4664_v1  ;;  %1308 = vmatpush1.bf16.msra.mxu0 %v4666_v2  ;;  %v4729_v1 = vcombine.high %v464_v59, %v468_v60  ;;  %v4731_v2 = vcombine.high %v465_v61, %v469_v62  ;;  %v5297_v59 = vld [vmem:[#allocation5 + $0x164] ss:$8 sps:$4 sm:$0xff]   ;;  %v5292_v60 = vld [vmem:[#allocation5 + $0x60] ss:$8 sps:$4 sm:$0xff]   ;;  %v5300_v62 = vld [vmem:[#allocation5 + $0x74] ss:$8 sps:$4 sm:$0xff]  }
 0x1ff   :  { %1268 = vmatprep.subr.bf16.mxu1 %v4673_v3  ;;  %1309 = vmatprep.subr.bf16.mxu0 %v4675_v4  ;;  %v472_v3 = vld [vmem:[#allocation2 + $0x350] sm:$0xff]  ;;  %v5295_v61 = vld [vmem:[#allocation5 + $0x160] ss:$8 sps:$4 sm:$0xff]  }
 0x200   :  { %v476_v4 = vld [vmem:[#allocation2 + $0x370] sm:$0xff] }
 0x201   :  { %v4736_v15 = vcombine.low %v472_v3, %v476_v4 }
 0x202   :  { %1269 = vmatpush1.bf16.msra.mxu1 %v4672_v9  ;;  %1310 = vmatpush1.bf16.msra.mxu0 %v4674_v10  ;;  %v4737_v9 = vcombine.high %v472_v3, %v476_v4  ;;  %v4739_v10 = vcombine.high %v473_v5, %v477_v6  ;;  %v5309_v3 = vld [vmem:[#allocation5 + $0x184] ss:$8 sps:$4 sm:$0xff]   ;;  %v5304_v4 = vld [vmem:[#allocation5 + $0x80] ss:$8 sps:$4 sm:$0xff]   ;;  %v5312_v6 = vld [vmem:[#allocation5 + $0x94] ss:$8 sps:$4 sm:$0xff]  }
 0x203   :  { %1270 = vmatprep.subr.bf16.mxu1 %v4681_v11  ;;  %1311 = vmatprep.subr.bf16.mxu0 %v4683_v12  ;;  %v480_v11 = vld [vmem:[#allocation2 + $0x390] sm:$0xff]  ;;  %v5307_v5 = vld [vmem:[#allocation5 + $0x180] ss:$8 sps:$4 sm:$0xff]  }
 0x204   :  { %v484_v12 = vld [vmem:[#allocation2 + $0x3b0] sm:$0xff] }
 0x205   :  { %v4744_v23 = vcombine.low %v480_v11, %v484_v12 }
 0x206   :  { %1271 = vmatpush1.bf16.msra.mxu1 %v4680_v17  ;;  %1312 = vmatpush1.bf16.msra.mxu0 %v4682_v18  ;;  %v4745_v17 = vcombine.high %v480_v11, %v484_v12  ;;  %v4747_v18 = vcombine.high %v481_v13, %v485_v14  ;;  %v5321_v11 = vld [vmem:[#allocation5 + $0x1a4] ss:$8 sps:$4 sm:$0xff]   ;;  %v5316_v12 = vld [vmem:[#allocation5 + $0xa0] ss:$8 sps:$4 sm:$0xff]   ;;  %v5324_v14 = vld [vmem:[#allocation5 + $0xb4] ss:$8 sps:$4 sm:$0xff]  }
 0x207   :  { %1272 = vmatprep.subr.bf16.mxu1 %v4689_v19  ;;  %1313 = vmatprep.subr.bf16.mxu0 %v4691_v20  ;;  %v488_v19 = vld [vmem:[#allocation2 + $0x3d0] sm:$0xff]  ;;  %v5319_v13 = vld [vmem:[#allocation5 + $0x1a0] ss:$8 sps:$4 sm:$0xff]  }
 0x208   :  { %v492_v20 = vld [vmem:[#allocation2 + $0x3f0] sm:$0xff] }
 0x20a   :  { %1273 = vmatpush1.bf16.msra.mxu1 %v4688_v25  ;;  %1314 = vmatpush1.bf16.msra.mxu0 %v4690_v26  ;;  %v4753_v25 = vcombine.high %v488_v19, %v492_v20  ;;  %v4755_v26 = vcombine.high %v489_v21, %v493_v22 }
 0x20b   :  { %1274 = vmatprep.subr.bf16.mxu1 %v4697_v27  ;;  %1315 = vmatprep.subr.bf16.mxu0 %v4699_v28  ;;  %v4752_v27 = vcombine.low %v488_v19, %v492_v20  ;;  %v4754_v28 = vcombine.low %v489_v21, %v493_v22  ;;  %v5333_v19 = vld [vmem:[#allocation5 + $0x1c4] ss:$8 sps:$4 sm:$0xff]   ;;  %v5328_v20 = vld [vmem:[#allocation5 + $0xc0] ss:$8 sps:$4 sm:$0xff]   ;;  %v5336_v22 = vld [vmem:[#allocation5 + $0xd4] ss:$8 sps:$4 sm:$0xff]  }
 0x20c   :  { %v5331_v21 = vld [vmem:[#allocation5 + $0x1c0] ss:$8 sps:$4 sm:$0xff]  }
 0x20e   :  { %1275 = vmatpush1.bf16.msra.mxu1 %v4696_v34  ;;  %1316 = vmatpush1.bf16.msra.mxu0 %v4698_v35  ;;  %v5264_v34 = vld [vmem:[#allocation5 + $0x14] ss:$8 sps:$4 sm:$0xff]  }
 0x20f   :  { %1276 = vmatprep.subr.bf16.mxu1 %v4705_v36  ;;  %1317 = vmatprep.subr.bf16.mxu0 %v4707_v37  ;;  %v5267_v35 = vld [vmem:[#allocation5 + $0x114] ss:$8 sps:$4 sm:$0xff]   ;;  %v5262_v36 = vld [vmem:[#allocation5 + $0x10] ss:$8 sps:$4 sm:$0xff]  }
 0x210   :  { %v5265_v37 = vld [vmem:[#allocation5 + $0x110] ss:$8 sps:$4 sm:$0xff]  }
 0x212   :  { %1277 = vmatpush1.bf16.msra.mxu1 %v4704_v42  ;;  %1318 = vmatpush1.bf16.msra.mxu0 %v4706_v43  ;;  %v5276_v42 = vld [vmem:[#allocation5 + $0x34] ss:$8 sps:$4 sm:$0xff]  }
 0x213   :  { %1278 = vmatprep.subr.bf16.mxu1 %v4713_v44  ;;  %1319 = vmatprep.subr.bf16.mxu0 %v4715_v47  ;;  %v5279_v43 = vld [vmem:[#allocation5 + $0x134] ss:$8 sps:$4 sm:$0xff]   ;;  %v5274_v44 = vld [vmem:[#allocation5 + $0x30] ss:$8 sps:$4 sm:$0xff]   ;;  %v5282_v47 = vld [vmem:[#allocation5 + $0x44] ss:$8 sps:$4 sm:$0xff]  }
 0x216   :  { %1279 = vmatpush1.bf16.msra.mxu1 %v4712_v55  ;;  %1320 = vmatpush1.bf16.msra.mxu0 %v4714_v56  ;;  %v5291_v55 = vld [vmem:[#allocation5 + $0x154] ss:$8 sps:$4 sm:$0xff]   ;;  %v5286_v56 = vld [vmem:[#allocation5 + $0x50] ss:$8 sps:$4 sm:$0xff]  }
 0x217   :  { %1280 = vmatprep.subr.bf16.mxu1 %v4721_v57  ;;  %1321 = vmatprep.subr.bf16.mxu0 %v4723_v58  ;;  %v5289_v57 = vld [vmem:[#allocation5 + $0x150] ss:$8 sps:$4 sm:$0xff]   ;;  %v5294_v58 = vld [vmem:[#allocation5 + $0x64] ss:$8 sps:$4 sm:$0xff]  }
 0x21a   :  { %1281 = vmatpush1.bf16.msra.mxu1 %v4720_v63  ;;  %1322 = vmatpush1.bf16.msra.mxu0 %v4722_v0  ;;  %v5303_v63 = vld [vmem:[#allocation5 + $0x174] ss:$8 sps:$4 sm:$0xff]   ;;  %v5298_v0 = vld [vmem:[#allocation5 + $0x70] ss:$8 sps:$4 sm:$0xff]  }
 0x21b   :  { %1282 = vmatprep.subr.bf16.mxu1 %v4729_v1  ;;  %1323 = vmatprep.subr.bf16.mxu0 %v4731_v2  ;;  %v5301_v1 = vld [vmem:[#allocation5 + $0x170] ss:$8 sps:$4 sm:$0xff]   ;;  %v5306_v2 = vld [vmem:[#allocation5 + $0x84] ss:$8 sps:$4 sm:$0xff]  }
 0x21e   :  { %1283 = vmatpush1.bf16.msra.mxu1 %v4728_v7  ;;  %1324 = vmatpush1.bf16.msra.mxu0 %v4730_v8  ;;  %v5315_v7 = vld [vmem:[#allocation5 + $0x194] ss:$8 sps:$4 sm:$0xff]   ;;  %v5310_v8 = vld [vmem:[#allocation5 + $0x90] ss:$8 sps:$4 sm:$0xff]  }
 0x21f   :  { %1284 = vmatprep.subr.bf16.mxu1 %v4737_v9  ;;  %1325 = vmatprep.subr.bf16.mxu0 %v4739_v10  ;;  %v5313_v9 = vld [vmem:[#allocation5 + $0x190] ss:$8 sps:$4 sm:$0xff]   ;;  %v5318_v10 = vld [vmem:[#allocation5 + $0xa4] ss:$8 sps:$4 sm:$0xff]  }
 0x222   :  { %1285 = vmatpush1.bf16.msra.mxu1 %v4736_v15  ;;  %1326 = vmatpush1.bf16.msra.mxu0 %v4738_v16  ;;  %v5327_v15 = vld [vmem:[#allocation5 + $0x1b4] ss:$8 sps:$4 sm:$0xff]   ;;  %v5322_v16 = vld [vmem:[#allocation5 + $0xb0] ss:$8 sps:$4 sm:$0xff]  }
 0x223   :  { %1286 = vmatprep.subr.bf16.mxu1 %v4745_v17  ;;  %1327 = vmatprep.subr.bf16.mxu0 %v4747_v18  ;;  %v5325_v17 = vld [vmem:[#allocation5 + $0x1b0] ss:$8 sps:$4 sm:$0xff]   ;;  %v5330_v18 = vld [vmem:[#allocation5 + $0xc4] ss:$8 sps:$4 sm:$0xff]  }
 0x226   :  { %1287 = vmatpush1.bf16.msra.mxu1 %v4744_v23  ;;  %1328 = vmatpush1.bf16.msra.mxu0 %v4746_v24  ;;  %v5339_v23 = vld [vmem:[#allocation5 + $0x1d4] ss:$8 sps:$4 sm:$0xff]   ;;  %v5334_v24 = vld [vmem:[#allocation5 + $0xd0] ss:$8 sps:$4 sm:$0xff]  }
 0x227   :  { %1288 = vmatprep.subr.bf16.mxu1 %v4753_v25  ;;  %1329 = vmatprep.subr.bf16.mxu0 %v4755_v26  ;;  %v5337_v25 = vld [vmem:[#allocation5 + $0x1d0] ss:$8 sps:$4 sm:$0xff]   ;;  %v5342_v26 = vld [vmem:[#allocation5 + $0xe4] ss:$8 sps:$4 sm:$0xff]  }
 0x22a   :  { %1289 = vmatpush1.bf16.msra.mxu1 %v4752_v27  ;;  %1330 = vmatpush1.bf16.msra.mxu0 %v4754_v28  ;;  %v5345_v27 = vld [vmem:[#allocation5 + $0x1e4] ss:$8 sps:$4 sm:$0xff]   ;;  %v5340_v28 = vld [vmem:[#allocation5 + $0xe0] ss:$8 sps:$4 sm:$0xff]  }
 0x22b   :  { %2184 = vmatprep.subr.bf16.mxu1 %v5258_v30  ;;  %2225 = vmatprep.subr.bf16.mxu0 %v5261_v31  ;;  %v5343_v30 = vld [vmem:[#allocation5 + $0x1e0] ss:$8 sps:$4 sm:$0xff]   ;;  %v5348_v31 = vld [vmem:[#allocation5 + $0xf4] ss:$8 sps:$4 sm:$0xff]  }
 0x22d   :  { %1291 = vmatmul.mubr.bf16.vlgmr.msra.gmra.mrb[4].mxu1 %v6032_v29  ;;  %1332 = vmatmul.mubr.bf16.vlgmr.msra.gmra.mrb[8].mxu0 %v6032_v29  ;;  %v5277_v29 = vld [vmem:[#allocation5 + $0x130] ss:$8 sps:$4 sm:$0xff]  }
 0x22e   :  { %2185 = vmatpush1.bf16.msra.mxu1 %v5256_v32  ;;  %2226 = vmatpush1.bf16.msra.mxu0 %v5259_v33  ;;  %v5351_v32 = vld [vmem:[#allocation5 + $0x1f4] ss:$8 sps:$4 sm:$0xff]   ;;  %v5346_v33 = vld [vmem:[#allocation5 + $0xf0] ss:$8 sps:$4 sm:$0xff]  }
 0x22f   :  { %2186 = vmatprep.subr.bf16.mxu1 %v5264_v34  ;;  %2227 = vmatprep.subr.bf16.mxu0 %v5267_v35  ;;  %v5349_v34 = vld [vmem:[#allocation5 + $0x1f0] ss:$8 sps:$4 sm:$0xff]   ;;  %v5354_v35 = vld [vmem:[#allocation5 + $0x204] ss:$8 sps:$4 sm:$0xff]  }
 0x232   :  { %2187 = vmatpush1.bf16.msra.mxu1 %v5262_v36  ;;  %2228 = vmatpush1.bf16.msra.mxu0 %v5265_v37  ;;  %v5357_v36 = vld [vmem:[#allocation5 + $0x304] ss:$8 sps:$4 sm:$0xff]   ;;  %v506_v37 = vsub.s32 2, %v5997_v45 }
 0x233   :  { %2188 = vmatprep.subr.bf16.mxu1 %v5270_v38  ;;  %2229 = vmatprep.subr.bf16.mxu0 %v5273_v39  ;;  %v6042_v38 = vld [vmem:[%s6241_s6] sm:$0xff]  ;;  %v510_v39 = vsub.s32 3, %v5997_v45 }
 0x236   :  { %2189 = vmatpush1.bf16.msra.mxu1 %v5268_v40  ;;  %2230 = vmatpush1.bf16.msra.mxu0 %v5271_v41  ;;  %v499_v40 = vrot.slane %v6042_v38, %v6000_v46  ;;  %v507_v41 = vrot.slane %v6042_v38, %v506_v37 }
 0x237   :  { %2190 = vmatprep.subr.bf16.mxu1 %v5276_v42  ;;  %2231 = vmatprep.subr.bf16.mxu0 %v5279_v43  ;;  %v503_v42 = vrot.slane %v6042_v38, %v6006_v48  ;;  %v511_v43 = vrot.slane %v6042_v38, %v510_v39 }
 0x23a   :  { %2191 = vmatpush1.bf16.msra.mxu1 %v5274_v44  ;;  %2232 = vmatpush1.bf16.msra.mxu0 %v5277_v29 }
 0x23b   :  { %2192 = vmatprep.subr.bf16.mxu1 %v5282_v47  ;;  %2233 = vmatprep.subr.bf16.mxu0 %v5285_v49 }
 0x23e   :  { %2193 = vmatpush1.bf16.msra.mxu1 %v5280_v50  ;;  %2234 = vmatpush1.bf16.msra.mxu0 %v5283_v51 }
 0x23f   :  { %2194 = vmatprep.subr.bf16.mxu1 %v5288_v53  ;;  %2235 = vmatprep.subr.bf16.mxu0 %v5291_v55 }
 0x242   :  { %2195 = vmatpush1.bf16.msra.mxu1 %v5286_v56  ;;  %2236 = vmatpush1.bf16.msra.mxu0 %v5289_v57 }
 0x243   :  { %2196 = vmatprep.subr.bf16.mxu1 %v5294_v58  ;;  %2237 = vmatprep.subr.bf16.mxu0 %v5297_v59 }
 0x246   :  { %2197 = vmatpush1.bf16.msra.mxu1 %v5292_v60  ;;  %2238 = vmatpush1.bf16.msra.mxu0 %v5295_v61 }
 0x247   :  { %2198 = vmatprep.subr.bf16.mxu1 %v5300_v62  ;;  %2239 = vmatprep.subr.bf16.mxu0 %v5303_v63 }
 0x24a   :  { %2199 = vmatpush1.bf16.msra.mxu1 %v5298_v0  ;;  %2240 = vmatpush1.bf16.msra.mxu0 %v5301_v1 }
 0x24b   :  { %2200 = vmatprep.subr.bf16.mxu1 %v5306_v2  ;;  %2241 = vmatprep.subr.bf16.mxu0 %v5309_v3 }
 0x24e   :  { %2201 = vmatpush1.bf16.msra.mxu1 %v5304_v4  ;;  %2242 = vmatpush1.bf16.msra.mxu0 %v5307_v5 }
 0x24f   :  { %2202 = vmatprep.subr.bf16.mxu1 %v5312_v6  ;;  %2243 = vmatprep.subr.bf16.mxu0 %v5315_v7 }
 0x252   :  { %2203 = vmatpush1.bf16.msra.mxu1 %v5310_v8  ;;  %2244 = vmatpush1.bf16.msra.mxu0 %v5313_v9 }
 0x253   :  { %2204 = vmatprep.subr.bf16.mxu1 %v5318_v10  ;;  %2245 = vmatprep.subr.bf16.mxu0 %v5321_v11 }
 0x256   :  { %2205 = vmatpush1.bf16.msra.mxu1 %v5316_v12  ;;  %2246 = vmatpush1.bf16.msra.mxu0 %v5319_v13 }
 0x257   :  { %2206 = vmatprep.subr.bf16.mxu1 %v5324_v14  ;;  %2247 = vmatprep.subr.bf16.mxu0 %v5327_v15 }
 0x25a   :  { %2207 = vmatpush1.bf16.msra.mxu1 %v5322_v16  ;;  %2248 = vmatpush1.bf16.msra.mxu0 %v5325_v17  ;;  %v5352_v17 = vld [vmem:[#allocation5 + $0x200] ss:$8 sps:$4 sm:$0xff]  }
 0x25b   :  { %2208 = vmatprep.subr.bf16.mxu1 %v5330_v18  ;;  %2249 = vmatprep.subr.bf16.mxu0 %v5333_v19 }
 0x25e   :  { %2209 = vmatpush1.bf16.msra.mxu1 %v5328_v20  ;;  %2250 = vmatpush1.bf16.msra.mxu0 %v5331_v21  ;;  %v5355_v20 = vld [vmem:[#allocation5 + $0x300] ss:$8 sps:$4 sm:$0xff]   ;;  %v5360_v21 = vld [vmem:[#allocation5 + $0x214] ss:$8 sps:$4 sm:$0xff]  }
 0x25f   :  { %2210 = vmatprep.subr.bf16.mxu1 %v5336_v22  ;;  %2251 = vmatprep.subr.bf16.mxu0 %v5339_v23  ;;  %v5363_v23 = vld [vmem:[#allocation5 + $0x314] ss:$8 sps:$4 sm:$0xff]  }
 0x262   :  { %2211 = vmatpush1.bf16.msra.mxu1 %v5334_v24  ;;  %2252 = vmatpush1.bf16.msra.mxu0 %v5337_v25  ;;  %v5358_v24 = vld [vmem:[#allocation5 + $0x210] ss:$8 sps:$4 sm:$0xff]  }
 0x263   :  { %2212 = vmatprep.subr.bf16.mxu1 %v5342_v26  ;;  %2253 = vmatprep.subr.bf16.mxu0 %v5345_v27  ;;  %v5361_v25 = vld [vmem:[#allocation5 + $0x310] ss:$8 sps:$4 sm:$0xff]   ;;  %v5366_v26 = vld [vmem:[#allocation5 + $0x224] ss:$8 sps:$4 sm:$0xff]  }
 0x264   :  { %v5369_v27 = vld [vmem:[#allocation5 + $0x324] ss:$8 sps:$4 sm:$0xff]  }
 0x266   :  { %2213 = vmatpush1.bf16.msra.mxu1 %v5340_v28  ;;  %2254 = vmatpush1.bf16.msra.mxu0 %v5343_v30  ;;  %v5364_v28 = vld [vmem:[#allocation5 + $0x220] ss:$8 sps:$4 sm:$0xff]  }
 0x267   :  { %2214 = vmatprep.subr.bf16.mxu1 %v5348_v31  ;;  %2255 = vmatprep.subr.bf16.mxu0 %v5351_v32  ;;  %v5367_v30 = vld [vmem:[#allocation5 + $0x320] ss:$8 sps:$4 sm:$0xff]   ;;  %v5372_v31 = vld [vmem:[#allocation5 + $0x234] ss:$8 sps:$4 sm:$0xff]  }
 0x268   :  { %v5375_v32 = vld [vmem:[#allocation5 + $0x334] ss:$8 sps:$4 sm:$0xff]  }
 0x26a   :  { %2215 = vmatpush1.bf16.msra.mxu1 %v5346_v33  ;;  %2256 = vmatpush1.bf16.msra.mxu0 %v5349_v34  ;;  %v5370_v33 = vld [vmem:[#allocation5 + $0x230] ss:$8 sps:$4 sm:$0xff]  }
 0x26b   :  { %2266 = vmatprep.subr.bf16.mxu1 %v5354_v35  ;;  %2307 = vmatprep.subr.bf16.mxu0 %v5357_v36  ;;  %v5373_v34 = vld [vmem:[#allocation5 + $0x330] ss:$8 sps:$4 sm:$0xff]   ;;  %v5378_v35 = vld [vmem:[#allocation5 + $0x244] ss:$8 sps:$4 sm:$0xff]  }
 0x26c   :  { %v5381_v36 = vld [vmem:[#allocation5 + $0x344] ss:$8 sps:$4 sm:$0xff]  }
 0x2c0   :  { %v1210_v44 = vpop.f32.mrb[0].mxu1  ;;  %v1251_v29 = vpop.f32.mrb[4].mxu0 }
 0x2c1   :  { %v1211_v47 = vadd.f32 %v1210_v44, %v499_v40  ;;  %v1252_v49 = vadd.f32 %v1251_v29, %v507_v41  ;;  %v1212_v50 = vpop.f32.mrb[1].mxu1  ;;  %v1253_v51 = vpop.f32.mrb[5].mxu0  ;;  %v5376_v40 = vld [vmem:[#allocation5 + $0x240] ss:$8 sps:$4 sm:$0xff]   ;;  %v5382_v44 = vld [vmem:[#allocation5 + $0x250] ss:$8 sps:$4 sm:$0xff]  }
 0x2c2   :  { %v1213_v53 = vadd.f32 %v1212_v50, %v503_v42  ;;  %v1254_v55 = vadd.f32 %v1253_v51, %v511_v43  ;;  %v1214_v56 = vpop.f32.mrb[2].mxu1  ;;  %v1255_v57 = vpop.f32.mrb[6].mxu0  ;;  %v5379_v41 = vld [vmem:[#allocation5 + $0x340] ss:$8 sps:$4 sm:$0xff]   ;;  %v5384_v42 = vld [vmem:[#allocation5 + $0x254] ss:$8 sps:$4 sm:$0xff]  }
 0x2c3   :  { %v4756_v58 = vmul.f32 -1.442695, %v1211_v47  ;;  %v4758_v59 = vmul.f32 -1.442695, %v1252_v49  ;;  %v1215_v60 = vpop.f32.mrb[3].mxu1  ;;  %v1256_v61 = vpop.f32.mrb[7].mxu0 }
 0x2c4   :  { %v4757_v62 = vmul.f32 -1.442695, %v1213_v53  ;;  %v4759_v63 = vmul.f32 -1.442695, %v1254_v55  ;;  %v5387_v43 = vld [vmem:[#allocation5 + $0x354] ss:$8 sps:$4 sm:$0xff]  }
 0x2c5   :  { %5658 = vpow2.f32 %v4756_v58  ;;  %v5385_v29 = vld [vmem:[#allocation5 + $0x350] ss:$8 sps:$4 sm:$0xff]   ;;  %v5388_v50 = vld [vmem:[#allocation5 + $0x260] ss:$8 sps:$4 sm:$0xff]   ;;  %v514_v51 = vsub.s32 4, %v5997_v45  ;;  %v518_v57 = vsub.s32 5, %v5997_v45 }
 0x2c6   :  { %5660 = vpow2.f32 %v4758_v59  ;;  %v5396_v56 = vld [vmem:[#allocation5 + $0x274] ss:$8 sps:$4 sm:$0xff]   ;;  %v526_v58 = vsub.s32 7, %v5997_v45  ;;  %v5394_v60 = vld [vmem:[#allocation5 + $0x270] ss:$8 sps:$4 sm:$0xff]  }
 0x2c7   :  { %5662 = vpow2.f32 %v4757_v62  ;;  %v5399_v59 = vld [vmem:[#allocation5 + $0x374] ss:$8 sps:$4 sm:$0xff]   ;;  %v515_v61 = vrot.slane %v6042_v38, %v514_v51 }
 0x2c8   :  { %5664 = vpow2.f32 %v4759_v63  ;;  %v5397_v63 = vld [vmem:[#allocation5 + $0x370] ss:$8 sps:$4 sm:$0xff]  }
 0x2cf   :  { %v5659_v0 = vpop.eup %5658 }
 0x2d0   :  { %v5661_v1 = vpop.eup %5660  ;;  %v1364_v2 = vadd.f32 1.0, %v5659_v0  ;;  %v519_v0 = vrot.slane %v6042_v38, %v518_v57 }
 0x2d1   :  { %v5663_v3 = vpop.eup %5662  ;;  %v1366_v4 = vadd.f32 1.0, %v5661_v1  ;;  %v527_v1 = vrot.slane %v6042_v38, %v526_v58 }
 0x2d2   :  { %v5665_v5 = vpop.eup %5664  ;;  %5666 = vrcp.f32 %v1364_v2  ;;  %v1365_v6 = vadd.f32 1.0, %v5663_v3  ;;  %v5402_v2 = vld [vmem:[#allocation5 + $0x284] ss:$8 sps:$4 sm:$0xff]  }
 0x2d3   :  { %5668 = vrcp.f32 %v1366_v4  ;;  %v1367_v7 = vadd.f32 1.0, %v5665_v5  ;;  %v5405_v3 = vld [vmem:[#allocation5 + $0x384] ss:$8 sps:$4 sm:$0xff]  }
 0x2d4   :  { %5670 = vrcp.f32 %v1365_v6 }
 0x2d5   :  { %5672 = vrcp.f32 %v1367_v7 }
 0x2dc   :  { %v5667_v8 = vpop.eup %5666 }
 0x2dd   :  { %v5669_v9 = vpop.eup %5668  ;;  %v1388_v11 = vmul.f32 %v5667_v8, %v1211_v47  ;;  %v5390_v47 = vld [vmem:[#allocation5 + $0x264] ss:$8 sps:$4 sm:$0xff]  }
 0x2de   :  { %v5671_v10 = vpop.eup %5670  ;;  %v1390_v13 = vmul.f32 %v5669_v9, %v1252_v49  ;;  %v5393_v49 = vld [vmem:[#allocation5 + $0x364] ss:$8 sps:$4 sm:$0xff]  }
 0x2df   :  { %v5673_v12 = vpop.eup %5672  ;;  %v1389_v14 = vmul.f32 %v5671_v10, %v1213_v53  ;;  %v1396_v18 = vpack.c.bf16 %v1388_v11, %v1388_v11  ;;  %v522_v53 = vsub.s32 6, %v5997_v45  ;;  %v5400_v10 = vld [vmem:[#allocation5 + $0x280] ss:$8 sps:$4 sm:$0xff]  }
 0x2e0   :  { %v1391_v15 = vmul.f32 %v5673_v12, %v1254_v55  ;;  %v1398_v22 = vpack.c.bf16 %v1390_v13, %v1390_v13  ;;  %v5391_v55 = vld [vmem:[#allocation5 + $0x360] ss:$8 sps:$4 sm:$0xff]  }
 0x2e1   :  { %v1397_v16 = vpack.c.bf16 %v1389_v14, %v1389_v14  ;;  %v523_v62 = vrot.slane %v6042_v38, %v522_v53  ;;  %v5403_v11 = vld [vmem:[#allocation5 + $0x380] ss:$8 sps:$4 sm:$0xff]  }
 0x2e2   :  { %v1399_v19 = vpack.c.bf16 %v1391_v15, %v1391_v15  ;;  %v5408_v15 = vld [vmem:[#allocation5 + $0x294] ss:$8 sps:$4 sm:$0xff]  }
 0x2e3   :  { %2216 = vmatprep.mubr.bf16.mxu1 %v1397_v16  ;;  %v5411_v16 = vld [vmem:[#allocation5 + $0x394] ss:$8 sps:$4 sm:$0xff]  }
 0x2e4   :  { %2257 = vmatprep.mubr.bf16.mxu0 %v1399_v19  ;;  %2217 = vmatmul.mubr.bf16.vlgmr.msra.gmra.mrb[8].mxu1 %v1396_v18 }
 0x2e5   :  { %2258 = vmatmul.mubr.bf16.vlgmr.msra.gmra.mrb[12].mxu0 %v1398_v22  ;;  %2267 = vmatpush1.bf16.msra.mxu1 %v5352_v17 }
 0x2e6   :  { %2308 = vmatpush1.bf16.msra.mxu0 %v5355_v20  ;;  %2268 = vmatprep.subr.bf16.mxu1 %v5360_v21 }
 0x2e7   :  { %2309 = vmatprep.subr.bf16.mxu0 %v5363_v23  ;;  %v5406_v23 = vld [vmem:[#allocation5 + $0x290] ss:$8 sps:$4 sm:$0xff]  }
 0x2e9   :  { %2269 = vmatpush1.bf16.msra.mxu1 %v5358_v24  ;;  %v5409_v24 = vld [vmem:[#allocation5 + $0x390] ss:$8 sps:$4 sm:$0xff]  }
 0x2ea   :  { %2310 = vmatpush1.bf16.msra.mxu0 %v5361_v25  ;;  %2270 = vmatprep.subr.bf16.mxu1 %v5366_v26  ;;  %v5414_v25 = vld [vmem:[#allocation5 + $0x2a4] ss:$8 sps:$4 sm:$0xff]  }
 0x2eb   :  { %2311 = vmatprep.subr.bf16.mxu0 %v5369_v27  ;;  %v5417_v26 = vld [vmem:[#allocation5 + $0x3a4] ss:$8 sps:$4 sm:$0xff]   ;;  %v5412_v27 = vld [vmem:[#allocation5 + $0x2a0] ss:$8 sps:$4 sm:$0xff]  }
 0x2ed   :  { %2271 = vmatpush1.bf16.msra.mxu1 %v5364_v28  ;;  %v5415_v28 = vld [vmem:[#allocation5 + $0x3a0] ss:$8 sps:$4 sm:$0xff]  }
 0x2ee   :  { %2312 = vmatpush1.bf16.msra.mxu0 %v5367_v30  ;;  %2272 = vmatprep.subr.bf16.mxu1 %v5372_v31  ;;  %v5420_v30 = vld [vmem:[#allocation5 + $0x2b4] ss:$8 sps:$4 sm:$0xff]  }
 0x2ef   :  { %2313 = vmatprep.subr.bf16.mxu0 %v5375_v32  ;;  %v5423_v31 = vld [vmem:[#allocation5 + $0x3b4] ss:$8 sps:$4 sm:$0xff]   ;;  %v5418_v32 = vld [vmem:[#allocation5 + $0x2b0] ss:$8 sps:$4 sm:$0xff]  }
 0x2f1   :  { %2273 = vmatpush1.bf16.msra.mxu1 %v5370_v33  ;;  %v5421_v33 = vld [vmem:[#allocation5 + $0x3b0] ss:$8 sps:$4 sm:$0xff]  }
 0x2f2   :  { %2314 = vmatpush1.bf16.msra.mxu0 %v5373_v34  ;;  %2274 = vmatprep.subr.bf16.mxu1 %v5378_v35  ;;  %v5426_v34 = vld [vmem:[#allocation5 + $0x2c4] ss:$8 sps:$4 sm:$0xff]  }
 0x2f3   :  { %2315 = vmatprep.subr.bf16.mxu0 %v5381_v36  ;;  %v5429_v36 = vld [vmem:[#allocation5 + $0x3c4] ss:$8 sps:$4 sm:$0xff]  }
 0x2f5   :  { %2275 = vmatpush1.bf16.msra.mxu1 %v5376_v40 }
 0x2f6   :  { %2316 = vmatpush1.bf16.msra.mxu0 %v5379_v41  ;;  %2276 = vmatprep.subr.bf16.mxu1 %v5384_v42 }
 0x2f7   :  { %2317 = vmatprep.subr.bf16.mxu0 %v5387_v43 }
 0x2f9   :  { %2277 = vmatpush1.bf16.msra.mxu1 %v5382_v44  ;;  %v5424_v44 = vld [vmem:[#allocation5 + $0x2c0] ss:$8 sps:$4 sm:$0xff]  }
 0x2fa   :  { %2318 = vmatpush1.bf16.msra.mxu0 %v5385_v29  ;;  %2278 = vmatprep.subr.bf16.mxu1 %v5390_v47 }
 0x2fb   :  { %2319 = vmatprep.subr.bf16.mxu0 %v5393_v49  ;;  %v5427_v49 = vld [vmem:[#allocation5 + $0x3c0] ss:$8 sps:$4 sm:$0xff]  }
 0x2fd   :  { %2279 = vmatpush1.bf16.msra.mxu1 %v5388_v50  ;;  %v5432_v50 = vld [vmem:[#allocation5 + $0x2d4] ss:$8 sps:$4 sm:$0xff]  }
 0x2fe   :  { %2320 = vmatpush1.bf16.msra.mxu0 %v5391_v55  ;;  %2280 = vmatprep.subr.bf16.mxu1 %v5396_v56  ;;  %v5435_v56 = vld [vmem:[#allocation5 + $0x3d4] ss:$8 sps:$4 sm:$0xff]  }
 0x2ff   :  { %2321 = vmatprep.subr.bf16.mxu0 %v5399_v59  ;;  %v5430_v59 = vld [vmem:[#allocation5 + $0x2d0] ss:$8 sps:$4 sm:$0xff]  }
 0x300   :  { %v1292_v4 = vpop.f32.mrb[4].mxu1  ;;  %v1333_v5 = vpop.f32.mrb[8].mxu0 }
 0x301   :  { %v6071_v6 = vadd.f32 %v1292_v4, %v515_v61  ;;  %v6073_v7 = vadd.f32 %v1333_v5, %v523_v62  ;;  %2281 = vmatpush1.bf16.msra.mxu1 %v5394_v60  ;;  %v1294_v8 = vpop.f32.mrb[5].mxu1  ;;  %v1335_v9 = vpop.f32.mrb[9].mxu0  ;;  %v5433_v60 = vld [vmem:[#allocation5 + $0x3d0] ss:$8 sps:$4 sm:$0xff]   ;;  %v5438_v61 = vld [vmem:[#allocation5 + $0x2e4] ss:$8 sps:$4 sm:$0xff]  }
 0x302   :  { %2322 = vmatpush1.bf16.msra.mxu0 %v5397_v63  ;;  %v6075_v12 = vadd.f32 %v1294_v8, %v519_v0  ;;  %v6077_v13 = vadd.f32 %v1335_v9, %v527_v1  ;;  %v1296_v38 = vpop.f32.mrb[6].mxu1  ;;  %v1337_v14 = vpop.f32.mrb[10].mxu0  ;;  %2282 = vmatprep.subr.bf16.mxu1 %v5402_v2  ;;  %v5441_v62 = vld [vmem:[#allocation5 + $0x3e4] ss:$8 sps:$4 sm:$0xff]   ;;  %v5436_v63 = vld [vmem:[#allocation5 + $0x2e0] ss:$8 sps:$4 sm:$0xff]  }
 0x303   :  { %v4760_v17 = vmul.f32 -1.442695, %v6071_v6  ;;  %v4762_v18 = vmul.f32 -1.442695, %v6073_v7  ;;  %v1297_v19 = vpop.f32.mrb[7].mxu1  ;;  %v1338_v20 = vpop.f32.mrb[11].mxu0  ;;  %2323 = vmatprep.subr.bf16.mxu0 %v5405_v3 }
 0x304   :  { %v4761_v21 = vmul.f32 -1.442695, %v6075_v12  ;;  %v4763_v22 = vmul.f32 -1.442695, %v6077_v13  ;;  %v5439_v0 = vld [vmem:[#allocation5 + $0x3e0] ss:$8 sps:$4 sm:$0xff]  }
 0x305   :  { %5674 = vpow2.f32 %v4760_v17  ;;  %2283 = vmatpush1.bf16.msra.mxu1 %v5400_v10  ;;  %v5444_v1 = vld [vmem:[#allocation5 + $0x2f4] ss:$8 sps:$4 sm:$0xff]   ;;  %v5442_v5 = vld [vmem:[#allocation5 + $0x2f0] ss:$8 sps:$4 sm:$0xff]   ;;  %v2405_v20 = vld [vmem:[#allocation2 + $0x420] sm:$0xff] }
 0x306   :  { %5676 = vpow2.f32 %v4762_v18  ;;  %2324 = vmatpush1.bf16.msra.mxu0 %v5403_v11  ;;  %2284 = vmatprep.subr.bf16.mxu1 %v5408_v15  ;;  %v5447_v2 = vld [vmem:[#allocation5 + $0x3f4] ss:$8 sps:$4 sm:$0xff]   ;;  %v5445_v10 = vld [vmem:[#allocation5 + $0x3f0] ss:$8 sps:$4 sm:$0xff]  }
 0x307   :  { %5678 = vpow2.f32 %v4761_v21  ;;  %2325 = vmatprep.subr.bf16.mxu0 %v5411_v16  ;;  %v2402_v21 = vld [vmem:[#allocation2 + $0x408] sm:$0xff] }
 0x308   :  { %5680 = vpow2.f32 %v4763_v22 }
 0x309   :  { %2285 = vmatpush1.bf16.msra.mxu1 %v5406_v23  ;;  %v2406_v23 = vld [vmem:[#allocation2 + $0x428] sm:$0xff] }
 0x30a   :  { %2326 = vmatpush1.bf16.msra.mxu0 %v5409_v24  ;;  %2286 = vmatprep.subr.bf16.mxu1 %v5414_v25  ;;  %v2413_v24 = vld [vmem:[#allocation2 + $0x460] sm:$0xff]  ;;  %v4897_v25 = vcombine.low %v2402_v21, %v2406_v23 }
 0x30b   :  { %2327 = vmatprep.subr.bf16.mxu0 %v5417_v26 }
 0x30d   :  { %2287 = vmatpush1.bf16.msra.mxu1 %v5412_v27  ;;  %v2410_v27 = vld [vmem:[#allocation2 + $0x448] sm:$0xff] }
 0x30e   :  { %2328 = vmatpush1.bf16.msra.mxu0 %v5415_v28  ;;  %2288 = vmatprep.subr.bf16.mxu1 %v5420_v30  ;;  %v2414_v28 = vld [vmem:[#allocation2 + $0x468] sm:$0xff]  ;;  %v2417_v30 = vld [vmem:[#allocation2 + $0x480] sm:$0xff] }
 0x30f   :  { %v5675_v35 = vpop.eup %5674  ;;  %2329 = vmatprep.subr.bf16.mxu0 %v5423_v31  ;;  %v4906_v31 = vcombine.high %v2410_v27, %v2414_v28 }
 0x310   :  { %v5677_v40 = vpop.eup %5676  ;;  %v1368_v41 = vadd.f32 1.0, %v5675_v35 }
 0x311   :  { %v5679_v42 = vpop.eup %5678  ;;  %v1370_v43 = vadd.f32 1.0, %v5677_v40  ;;  %2289 = vmatpush1.bf16.msra.mxu1 %v5418_v32  ;;  %v2421_v32 = vld [vmem:[#allocation2 + $0x4a0] sm:$0xff] }
 0x312   :  { %v5681_v29 = vpop.eup %5680  ;;  %5682 = vrcp.f32 %v1368_v41  ;;  %v1369_v47 = vadd.f32 1.0, %v5679_v42  ;;  %2330 = vmatpush1.bf16.msra.mxu0 %v5421_v33  ;;  %2290 = vmatprep.subr.bf16.mxu1 %v5426_v34  ;;  %v2418_v33 = vld [vmem:[#allocation2 + $0x488] sm:$0xff]  ;;  %v4912_v40 = vcombine.high %v2417_v30, %v2421_v32  ;;  %v2425_v42 = vld [vmem:[#allocation2 + $0x4c0] sm:$0xff] }
 0x313   :  { %5684 = vrcp.f32 %v1370_v43  ;;  %v1371_v55 = vadd.f32 1.0, %v5681_v29  ;;  %2331 = vmatprep.subr.bf16.mxu0 %v5429_v36  ;;  %v2422_v34 = vld [vmem:[#allocation2 + $0x4a8] sm:$0xff]  ;;  %v4905_v36 = vcombine.low %v2410_v27, %v2414_v28  ;;  %v2429_v43 = vld [vmem:[#allocation2 + $0x4e0] sm:$0xff] }
 0x314   :  { %5686 = vrcp.f32 %v1369_v47  ;;  %v4914_v41 = vcombine.high %v2418_v33, %v2422_v34  ;;  %v2430_v29 = vld [vmem:[#allocation2 + $0x4e8] sm:$0xff]  ;;  %v4911_v47 = vcombine.low %v2417_v30, %v2421_v32 }
 0x315   :  { %5688 = vrcp.f32 %v1371_v55  ;;  %2291 = vmatpush1.bf16.msra.mxu1 %v5424_v44  ;;  %v2426_v44 = vld [vmem:[#allocation2 + $0x4c8] sm:$0xff] }
 0x316   :  { %2332 = vmatpush1.bf16.msra.mxu0 %v5427_v49  ;;  %2292 = vmatprep.subr.bf16.mxu1 %v5432_v50  ;;  %v4913_v49 = vcombine.low %v2418_v33, %v2422_v34  ;;  %v4920_v50 = vcombine.high %v2425_v42, %v2429_v43  ;;  %v4922_v55 = vcombine.high %v2426_v44, %v2430_v29  ;;  %v2466_v27 = vld [vmem:[#allocation2 + $0x608] sm:$0xff] }
 0x317   :  { %2333 = vmatprep.subr.bf16.mxu0 %v5435_v56  ;;  %v2433_v56 = vld [vmem:[#allocation2 + $0x500] sm:$0xff]  ;;  %v2470_v28 = vld [vmem:[#allocation2 + $0x628] sm:$0xff] }
 0x318   :  { %v4962_v33 = vcombine.high %v2466_v27, %v2470_v28 }
 0x319   :  { %2293 = vmatpush1.bf16.msra.mxu1 %v5430_v59  ;;  %v2437_v59 = vld [vmem:[#allocation2 + $0x520] sm:$0xff] }
 0x31a   :  { %2334 = vmatpush1.bf16.msra.mxu0 %v5433_v60  ;;  %2294 = vmatprep.subr.bf16.mxu1 %v5438_v61  ;;  %v2434_v60 = vld [vmem:[#allocation2 + $0x508] sm:$0xff] }
 0x31b   :  { %2335 = vmatprep.subr.bf16.mxu0 %v5441_v62  ;;  %v2438_v61 = vld [vmem:[#allocation2 + $0x528] sm:$0xff]  ;;  %v4919_v62 = vcombine.low %v2425_v42, %v2429_v43 }
 0x31c   :  { %v5683_v3 = vpop.eup %5682 }
 0x31d   :  { %v5685_v4 = vpop.eup %5684  ;;  %2295 = vmatpush1.bf16.msra.mxu1 %v5436_v63  ;;  %v1392_v9 = vmul.f32 %v5683_v3, %v6071_v6  ;;  %v2401_v6 = vld [vmem:[#allocation2 + $0x400] sm:$0xff]  ;;  %v4921_v63 = vcombine.low %v2426_v44, %v2430_v29 }
 0x31e   :  { %v5687_v8 = vpop.eup %5686  ;;  %2336 = vmatpush1.bf16.msra.mxu0 %v5439_v0  ;;  %2296 = vmatprep.subr.bf16.mxu1 %v5444_v1  ;;  %v1394_v38 = vmul.f32 %v5685_v4, %v6073_v7  ;;  %v4895_v22 = vcombine.low %v2401_v6, %v2405_v20  ;;  %v4896_v7 = vcombine.high %v2401_v6, %v2405_v20  ;;  %v2445_v3 = vld [vmem:[#allocation2 + $0x560] sm:$0xff]  ;;  %v2442_v4 = vld [vmem:[#allocation2 + $0x548] sm:$0xff] }
 0x31f   :  { %v5689_v11 = vpop.eup %5688  ;;  %v1393_v14 = vmul.f32 %v5687_v8, %v6075_v12  ;;  %2337 = vmatprep.subr.bf16.mxu0 %v5447_v2  ;;  %v1400_v17 = vpack.c.bf16 %v1392_v9, %v1392_v9  ;;  %v2409_v12 = vld [vmem:[#allocation2 + $0x440] sm:$0xff]  ;;  %v4928_v0 = vcombine.high %v2433_v56, %v2437_v59  ;;  %v4930_v1 = vcombine.high %v2434_v60, %v2438_v61 }
 0x320   :  { %v1395_v15 = vmul.f32 %v5689_v11, %v6077_v13  ;;  %v1402_v19 = vpack.c.bf16 %v1394_v38, %v1394_v38  ;;  %v4898_v13 = vcombine.high %v2402_v21, %v2406_v23  ;;  %v4904_v26 = vcombine.high %v2409_v12, %v2413_v24  ;;  %v2441_v2 = vld [vmem:[#allocation2 + $0x540] sm:$0xff] }
 0x321   :  { %v1401_v16 = vpack.c.bf16 %v1393_v14, %v1393_v14  ;;  %2297 = vmatpush1.bf16.msra.mxu1 %v5442_v5  ;;  %v4903_v35 = vcombine.low %v2409_v12, %v2413_v24  ;;  %v2446_v5 = vld [vmem:[#allocation2 + $0x568] sm:$0xff]  ;;  %v4927_v8 = vcombine.low %v2433_v56, %v2437_v59  ;;  %v4929_v9 = vcombine.low %v2434_v60, %v2438_v61  ;;  %v2449_v38 = vld [vmem:[#allocation2 + $0x580] sm:$0xff] }
 0x322   :  { %v1403_v18 = vpack.c.bf16 %v1395_v15, %v1395_v15  ;;  %2338 = vmatpush1.bf16.msra.mxu0 %v5445_v10  ;;  %3212 = vmatprep.subr.bf16.mxu1 %v4896_v7  ;;  %v4936_v10 = vcombine.high %v2441_v2, %v2445_v3  ;;  %v4938_v11 = vcombine.high %v2442_v4, %v2446_v5  ;;  %v2453_v14 = vld [vmem:[#allocation2 + $0x5a0] sm:$0xff]  ;;  %v2450_v15 = vld [vmem:[#allocation2 + $0x588] sm:$0xff] }
 0x323   :  { %2298 = vmatprep.mubr.bf16.mxu1 %v1401_v16  ;;  %3253 = vmatprep.subr.bf16.mxu0 %v4898_v13  ;;  %v2454_v16 = vld [vmem:[#allocation2 + $0x5a8] sm:$0xff]  ;;  %v2457_v20 = vld [vmem:[#allocation2 + $0x5c0] sm:$0xff]  ;;  %v4943_v23 = vcombine.low %v2449_v38, %v2453_v14 }
 0x324   :  { %2339 = vmatprep.mubr.bf16.mxu0 %v1403_v18  ;;  %2299 = vmatmul.mubr.bf16.vlgmr.msra.gmra.mrb[12].mxu1 %v1400_v17  ;;  %v4935_v17 = vcombine.low %v2441_v2, %v2445_v3  ;;  %v4937_v18 = vcombine.low %v2442_v4, %v2446_v5  ;;  %v4946_v6 = vcombine.high %v2450_v15, %v2454_v16  ;;  %v2461_v21 = vld [vmem:[#allocation2 + $0x5e0] sm:$0xff]  ;;  %v2462_v7 = vld [vmem:[#allocation2 + $0x5e8] sm:$0xff] }
 0x325   :  { %2340 = vmatmul.mubr.bf16.vlgmr.msra.gmra.mrb[16].mxu0 %v1402_v19  ;;  %3213 = vmatpush1.bf16.msra.mxu1 %v4895_v22  ;;  %v4944_v19 = vcombine.high %v2449_v38, %v2453_v14  ;;  %v2458_v22 = vld [vmem:[#allocation2 + $0x5c8] sm:$0xff]  ;;  %v4945_v12 = vcombine.low %v2450_v15, %v2454_v16  ;;  %v4952_v24 = vcombine.high %v2457_v20, %v2461_v21  ;;  %v2465_v13 = vld [vmem:[#allocation2 + $0x600] sm:$0xff] }
 0x326   :  { %3254 = vmatpush1.bf16.msra.mxu0 %v4897_v25  ;;  %3214 = vmatprep.subr.bf16.mxu1 %v4904_v26  ;;  %v4954_v25 = vcombine.high %v2458_v22, %v2462_v7  ;;  %v2469_v26 = vld [vmem:[#allocation2 + $0x620] sm:$0xff]  ;;  %v4951_v30 = vcombine.low %v2457_v20, %v2461_v21  ;;  %v2474_v20 = vld [vmem:[#allocation2 + $0x648] sm:$0xff] }
 0x327   :  { %3255 = vmatprep.subr.bf16.mxu0 %v4906_v31  ;;  %v4953_v31 = vcombine.low %v2458_v22, %v2462_v7  ;;  %v4960_v32 = vcombine.high %v2465_v13, %v2469_v26  ;;  %v4959_v34 = vcombine.low %v2465_v13, %v2469_v26  ;;  %v2478_v21 = vld [vmem:[#allocation2 + $0x668] sm:$0xff] }
 0x328   :  { %v4970_v7 = vcombine.high %v2474_v20, %v2478_v21  ;;  %v2486_v13 = vld [vmem:[#allocation2 + $0x6a8] sm:$0xff] }
 0x329   :  { %3215 = vmatpush1.bf16.msra.mxu1 %v4903_v35  ;;  %v4961_v35 = vcombine.low %v2466_v27, %v2470_v28 }
 0x32a   :  { %3256 = vmatpush1.bf16.msra.mxu0 %v4905_v36  ;;  %3216 = vmatprep.subr.bf16.mxu1 %v4912_v40  ;;  %v1532_v36 = vld [vmem:[%s6243_s8] sm:$0x3] }
 0x32b   :  { %3257 = vmatprep.subr.bf16.mxu0 %v4914_v41  ;;  %v1537_v40 = vrot.slane %v1532_v36, %v6000_v46  ;;  %v1541_v41 = vrot.slane %v1532_v36, %v6006_v48 }
 0x32d   :  { %3217 = vmatpush1.bf16.msra.mxu1 %v4911_v47 }
 0x32e   :  { %3258 = vmatpush1.bf16.msra.mxu0 %v4913_v49  ;;  %3218 = vmatprep.subr.bf16.mxu1 %v4920_v50 }
 0x32f   :  { %3259 = vmatprep.subr.bf16.mxu0 %v4922_v55 }
 0x331   :  { %3219 = vmatpush1.bf16.msra.mxu1 %v4919_v62 }
 0x332   :  { %3260 = vmatpush1.bf16.msra.mxu0 %v4921_v63  ;;  %3220 = vmatprep.subr.bf16.mxu1 %v4928_v0 }
 0x333   :  { %3261 = vmatprep.subr.bf16.mxu0 %v4930_v1 }
 0x335   :  { %3221 = vmatpush1.bf16.msra.mxu1 %v4927_v8 }
 0x336   :  { %3262 = vmatpush1.bf16.msra.mxu0 %v4929_v9  ;;  %3222 = vmatprep.subr.bf16.mxu1 %v4936_v10 }
 0x337   :  { %3263 = vmatprep.subr.bf16.mxu0 %v4938_v11 }
 0x339   :  { %3223 = vmatpush1.bf16.msra.mxu1 %v4935_v17 }
 0x33a   :  { %3264 = vmatpush1.bf16.msra.mxu0 %v4937_v18  ;;  %3224 = vmatprep.subr.bf16.mxu1 %v4944_v19  ;;  %v2473_v19 = vld [vmem:[#allocation2 + $0x640] sm:$0xff] }
 0x33b   :  { %3265 = vmatprep.subr.bf16.mxu0 %v4946_v6  ;;  %v2477_v6 = vld [vmem:[#allocation2 + $0x660] sm:$0xff] }
 0x33c   :  { %v4967_v22 = vcombine.low %v2473_v19, %v2477_v6 }
 0x33d   :  { %3225 = vmatpush1.bf16.msra.mxu1 %v4943_v23  ;;  %v2481_v23 = vld [vmem:[#allocation2 + $0x680] sm:$0xff] }
 0x33e   :  { %3266 = vmatpush1.bf16.msra.mxu0 %v4945_v12  ;;  %3226 = vmatprep.subr.bf16.mxu1 %v4952_v24  ;;  %v2485_v12 = vld [vmem:[#allocation2 + $0x6a0] sm:$0xff]  ;;  %v2482_v24 = vld [vmem:[#allocation2 + $0x688] sm:$0xff] }
 0x33f   :  { %3267 = vmatprep.subr.bf16.mxu0 %v4954_v25  ;;  %v4976_v25 = vcombine.high %v2481_v23, %v2485_v12  ;;  %v4975_v26 = vcombine.low %v2481_v23, %v2485_v12  ;;  %v4977_v27 = vcombine.low %v2482_v24, %v2486_v13  ;;  %v4978_v28 = vcombine.high %v2482_v24, %v2486_v13 }
 0x341   :  { %3227 = vmatpush1.bf16.msra.mxu1 %v4951_v30  ;;  %v2489_v30 = vld [vmem:[#allocation2 + $0x6c0] sm:$0xff] }
 0x342   :  { %3268 = vmatpush1.bf16.msra.mxu0 %v4953_v31  ;;  %3228 = vmatprep.subr.bf16.mxu1 %v4960_v32  ;;  %v2493_v31 = vld [vmem:[#allocation2 + $0x6e0] sm:$0xff]  ;;  %v2490_v32 = vld [vmem:[#allocation2 + $0x6c8] sm:$0xff] }
 0x343   :  { %3269 = vmatprep.subr.bf16.mxu0 %v4962_v33  ;;  %v4984_v33 = vcombine.high %v2489_v30, %v2493_v31 }
 0x345   :  { %3229 = vmatpush1.bf16.msra.mxu1 %v4959_v34  ;;  %v2494_v34 = vld [vmem:[#allocation2 + $0x6e8] sm:$0xff] }
 0x346   :  { %3270 = vmatpush1.bf16.msra.mxu0 %v4961_v35  ;;  %v4983_v35 = vcombine.low %v2489_v30, %v2493_v31  ;;  %v4985_v36 = vcombine.low %v2490_v32, %v2494_v34 }
 0x347   :  { %3271 = vmatprep.subr.bf16.mxu0 %v4970_v7  ;;  %v2408_v7 = vld [vmem:[#allocation2 + $0x438] sm:$0xff] }
 0x3b7   :  { %v2218_v42 = vpop.f32.mrb[8].mxu1 }
 0x3b8   :  { %v2219_v43 = vadd.f32 %v2218_v42, %v1537_v40  ;;  %v2259_v44 = vpop.f32.mrb[12].mxu0  ;;  %v2220_v29 = vpop.f32.mrb[9].mxu1  ;;  %v4986_v40 = vcombine.high %v2490_v32, %v2494_v34  ;;  %v2501_v42 = vld [vmem:[#allocation2 + $0x720] sm:$0xff] }
 0x3b9   :  { %v2221_v47 = vadd.f32 %v2220_v29, %v1541_v41  ;;  %v2261_v49 = vpop.f32.mrb[13].mxu0  ;;  %v2222_v50 = vpop.f32.mrb[10].mxu1  ;;  %v2497_v41 = vld [vmem:[#allocation2 + $0x700] sm:$0xff] }
 0x3ba   :  { %v2260_v55 = vadd.f32 %v2259_v44, %v2219_v43  ;;  %v2263_v56 = vpop.f32.mrb[14].mxu0  ;;  %v2223_v59 = vpop.f32.mrb[11].mxu1  ;;  %v2498_v43 = vld [vmem:[#allocation2 + $0x708] sm:$0xff]  ;;  %v4991_v44 = vcombine.low %v2497_v41, %v2501_v42  ;;  %v4992_v29 = vcombine.high %v2497_v41, %v2501_v42  ;;  %v2509_v50 = vld [vmem:[#allocation2 + $0x760] sm:$0xff] }
 0x3bb   :  { %v2262_v60 = vadd.f32 %v2261_v49, %v2221_v47  ;;  %v2264_v61 = vpop.f32.mrb[15].mxu0  ;;  %v2502_v47 = vld [vmem:[#allocation2 + $0x728] sm:$0xff]  ;;  %v2505_v49 = vld [vmem:[#allocation2 + $0x740] sm:$0xff] }
 0x3bc   :  { %v4994_v56 = vcombine.high %v2498_v43, %v2502_v47  ;;  %v5000_v59 = vcombine.high %v2505_v49, %v2509_v50  ;;  %v2510_v61 = vld [vmem:[#allocation2 + $0x768] sm:$0xff]  ;;  %v4892_v32 = vld [vmem:[%s6238_s3 + $0x2] sm:$0x3] }
 0x3f7   :  { %v2300_v62 = vpop.f32.mrb[12].mxu1 }
 0x3f8   :  { %v2301_v63 = vadd.f32 %v2300_v62, %v2260_v55  ;;  %v2341_v0 = vpop.f32.mrb[16].mxu0  ;;  %v2302_v1 = vpop.f32.mrb[13].mxu1  ;;  %v4993_v55 = vcombine.low %v2498_v43, %v2502_v47 }
 0x3f9   :  { %v2303_v2 = vadd.f32 %v2302_v1, %v2262_v60  ;;  %v2343_v3 = vpop.f32.mrb[17].mxu0  ;;  %v2304_v4 = vpop.f32.mrb[14].mxu1  ;;  %v2506_v60 = vld [vmem:[#allocation2 + $0x748] sm:$0xff] }
 0x3fa   :  { %v2342_v5 = vadd.f32 %v2341_v0, %v2301_v63  ;;  %v2345_v8 = vpop.f32.mrb[18].mxu0  ;;  %v2305_v9 = vpop.f32.mrb[15].mxu1  ;;  %v5002_v62 = vcombine.high %v2506_v60, %v2510_v61  ;;  %v2513_v63 = vld [vmem:[#allocation2 + $0x780] sm:$0xff]  ;;  %v2514_v1 = vld [vmem:[#allocation2 + $0x788] sm:$0xff]  ;;  %v5001_v4 = vcombine.low %v2506_v60, %v2510_v61  ;;  %v2412_v60 = vld [vmem:[#allocation2 + $0x458] sm:$0xff] }
 0x3fb   :  { %v2344_v10 = vadd.f32 %v2343_v3, %v2303_v2  ;;  %v2346_v11 = vpop.f32.mrb[19].mxu0  ;;  %v2517_v0 = vld [vmem:[#allocation2 + $0x7a0] sm:$0xff]  ;;  %v2518_v2 = vld [vmem:[#allocation2 + $0x7a8] sm:$0xff]  ;;  %v4999_v3 = vcombine.low %v2505_v49, %v2509_v50  ;;  %v2416_v61 = vld [vmem:[#allocation2 + $0x478] sm:$0xff] }
 0x3fc   :  { %v6093_v38 = vadd.f32 %v2342_v5, %v6010_v52  ;;  %v4968_v52 = vcombine.high %v2473_v19, %v2477_v6  ;;  %v5008_v5 = vcombine.high %v2513_v63, %v2517_v0  ;;  %v5010_v8 = vcombine.high %v2514_v1, %v2518_v2  ;;  %v2521_v9 = vld [vmem:[#allocation2 + $0x7c0] sm:$0xff]  ;;  %v2522_v11 = vld [vmem:[#allocation2 + $0x7c8] sm:$0xff] }
 0x3fd   :  { %v6096_v14 = vadd.f32 %v2344_v10, %v6012_v54  ;;  %v4969_v54 = vcombine.low %v2474_v20, %v2478_v21  ;;  %v2525_v10 = vld [vmem:[#allocation2 + $0x7e0] sm:$0xff]  ;;  %v2407_v21 = vld [vmem:[#allocation2 + $0x430] sm:$0xff] }
 0x3fe   :  { %v2354_v16 = vmul.f32 %v6093_v38, %v6093_v38  ;;  %3230 = vmatprep.subr.bf16.mxu1 %v4968_v52  ;;  %v5015_v6 = vcombine.low %v2521_v9, %v2525_v10  ;;  %v2403_v52 = vld [vmem:[#allocation2 + $0x410] sm:$0xff] }
 0x3ff   :  { %v2350_v15 = vadd.f32 %v6096_v14, %v6093_v38  ;;  %v2355_v17 = vmul.f32 %v6096_v14, %v6096_v14  ;;  %3231 = vmatpush1.bf16.msra.mxu1 %v4967_v22  ;;  %3272 = vmatpush1.bf16.msra.mxu0 %v4969_v54  ;;  %v2404_v22 = vld [vmem:[#allocation2 + $0x418] sm:$0xff]  ;;  %v4900_v54 = vcombine.high %v2403_v52, %v2407_v21 }
 0x400   :  { %3232 = vmatprep.subr.bf16.mxu1 %v4976_v25  ;;  %3273 = vmatprep.subr.bf16.mxu0 %v4978_v28  ;;  %v4899_v23 = vcombine.low %v2403_v52, %v2407_v21  ;;  %v4901_v12 = vcombine.low %v2404_v22, %v2408_v7  ;;  %v4902_v24 = vcombine.high %v2404_v22, %v2408_v7  ;;  %v2435_v21 = vld [vmem:[#allocation2 + $0x510] sm:$0xff]  ;;  %v2440_v7 = vld [vmem:[#allocation2 + $0x538] sm:$0xff] }
 0x401   :  { %2351 = vadd.xlane.f32.xlu1 %v2350_v15  ;;  %v2356_v18 = vadd.f32 %v2355_v17, %v2354_v16  ;;  %v2526_v15 = vld [vmem:[#allocation2 + $0x7e8] sm:$0xff]  ;;  %v5007_v16 = vcombine.low %v2513_v63, %v2517_v0  ;;  %v5009_v17 = vcombine.low %v2514_v1, %v2518_v2  ;;  %v2419_v0 = vld [vmem:[#allocation2 + $0x490] sm:$0xff]  ;;  %v4910_v2 = vcombine.high %v2412_v60, %v2416_v61 }
 0x402   :  { %v5018_v19 = vcombine.high %v2522_v11, %v2526_v15  ;;  %v5017_v20 = vcombine.low %v2522_v11, %v2526_v15  ;;  %v2427_v15 = vld [vmem:[#allocation2 + $0x4d0] sm:$0xff] }
 0x403   :  { %3233 = vmatpush1.bf16.msra.mxu1 %v4975_v26  ;;  %3274 = vmatpush1.bf16.msra.mxu0 %v4977_v27  ;;  %v2439_v22 = vld [vmem:[#allocation2 + $0x530] sm:$0xff] }
 0x404   :  { %3234 = vmatprep.subr.bf16.mxu1 %v4984_v33  ;;  %3275 = vmatprep.subr.bf16.mxu0 %v4986_v40  ;;  %v4893_v33 = vld [vmem:[%s6239_s4 + $0x2] sm:$0x3]  ;;  %v2374_v40 = vrot.slane %v4892_v32, %v6000_v46 }
 0x405   :  { %2357 = vadd.xlane.f32.xlu1 %v2356_v18  ;;  %v5016_v18 = vcombine.high %v2521_v9, %v2525_v10  ;;  %v2393_v43 = vrot.slane %v4893_v33, %v6006_v48  ;;  %v4909_v9 = vcombine.low %v2412_v60, %v2416_v61  ;;  %v2467_v61 = vld [vmem:[#allocation2 + $0x610] sm:$0xff] }
 0x407   :  { %3235 = vmatpush1.bf16.msra.mxu1 %v4983_v35  ;;  %3276 = vmatpush1.bf16.msra.mxu0 %v4985_v36  ;;  %v2378_v36 = vrot.slane %v4892_v32, %v6006_v48 }
 0x408   :  { %3236 = vmatprep.subr.bf16.mxu1 %v4992_v29  ;;  %3277 = vmatprep.subr.bf16.mxu0 %v4994_v56  ;;  %v2389_v29 = vrot.slane %v4893_v33, %v6000_v46  ;;  %v2411_v56 = vld [vmem:[#allocation2 + $0x450] sm:$0xff] }
 0x40b   :  { %3237 = vmatpush1.bf16.msra.mxu1 %v4991_v44  ;;  %3278 = vmatpush1.bf16.msra.mxu0 %v4993_v55 }
 0x40c   :  { %3238 = vmatprep.subr.bf16.mxu1 %v5000_v59  ;;  %3279 = vmatprep.subr.bf16.mxu0 %v5002_v62  ;;  %v2415_v59 = vld [vmem:[#allocation2 + $0x470] sm:$0xff] }
 0x40d   :  { %v4908_v1 = vcombine.high %v2411_v56, %v2415_v59 }
 0x40f   :  { %3239 = vmatpush1.bf16.msra.mxu1 %v4999_v3  ;;  %3280 = vmatpush1.bf16.msra.mxu0 %v5001_v4  ;;  %v2423_v3 = vld [vmem:[#allocation2 + $0x4b0] sm:$0xff]  ;;  %v2420_v4 = vld [vmem:[#allocation2 + $0x498] sm:$0xff] }
 0x410   :  { %3240 = vmatprep.subr.bf16.mxu1 %v5008_v5  ;;  %3281 = vmatprep.subr.bf16.mxu0 %v5010_v8  ;;  %v2424_v5 = vld [vmem:[#allocation2 + $0x4b8] sm:$0xff]  ;;  %v4907_v8 = vcombine.low %v2411_v56, %v2415_v59  ;;  %v4916_v10 = vcombine.high %v2419_v0, %v2423_v3 }
 0x411   :  { %v4918_v11 = vcombine.high %v2420_v4, %v2424_v5 }
 0x413   :  { %3241 = vmatpush1.bf16.msra.mxu1 %v5007_v16  ;;  %3282 = vmatpush1.bf16.msra.mxu0 %v5009_v17  ;;  %v2431_v16 = vld [vmem:[#allocation2 + $0x4f0] sm:$0xff]  ;;  %v2428_v17 = vld [vmem:[#allocation2 + $0x4d8] sm:$0xff] }
 0x414   :  { %3242 = vmatprep.subr.bf16.mxu1 %v5016_v18  ;;  %3283 = vmatprep.subr.bf16.mxu0 %v5018_v19  ;;  %v2432_v18 = vld [vmem:[#allocation2 + $0x4f8] sm:$0xff]  ;;  %v4915_v19 = vcombine.low %v2419_v0, %v2423_v3 }
 0x415   :  { %v4926_v52 = vcombine.high %v2428_v17, %v2432_v18  ;;  %v2468_v0 = vld [vmem:[#allocation2 + $0x618] sm:$0xff] }
 0x417   :  { %3243 = vmatpush1.bf16.msra.mxu1 %v5015_v6  ;;  %3284 = vmatpush1.bf16.msra.mxu0 %v5017_v20  ;;  %v4917_v6 = vcombine.low %v2420_v4, %v2424_v5  ;;  %v4924_v20 = vcombine.high %v2427_v15, %v2431_v16 }
 0x418   :  { %3294 = vmatprep.subr.bf16.mxu1 %v4900_v54  ;;  %3335 = vmatprep.subr.bf16.mxu0 %v4902_v24  ;;  %v2436_v54 = vld [vmem:[#allocation2 + $0x518] sm:$0xff]  ;;  %v4932_v24 = vcombine.high %v2435_v21, %v2439_v22 }
 0x48e   :  { %v2352_v25 = vpop.xlane.xlu1 %2351 }
 0x48f   :  { %v2353_v13 = vmul.f32 0.00390625, %v2352_v25  ;;  %v4934_v25 = vcombine.high %v2436_v54, %v2440_v7 }
 0x491   :  { %v2360_v27 = vmul.f32 %v2353_v13, %v2353_v13  ;;  %v2362_v34 = vsub.f32 %v6093_v38, %v2353_v13  ;;  %v2363_v35 = vsub.f32 %v6096_v14, %v2353_v13  ;;  %v2443_v13 = vld [vmem:[#allocation2 + $0x550] sm:$0xff] }
 0x492   :  { %v2358_v26 = vpop.xlane.xlu1 %2357 }
 0x493   :  { %v2359_v28 = vmul.f32 0.00390625, %v2358_v26  ;;  %v2447_v26 = vld [vmem:[#allocation2 + $0x570] sm:$0xff] }
 0x494   :  { %v4940_v32 = vcombine.high %v2443_v13, %v2447_v26 }
 0x495   :  { %v2361_v30 = vsub.f32 %v2359_v28, %v2360_v27  ;;  %v2444_v27 = vld [vmem:[#allocation2 + $0x558] sm:$0xff] }
 0x496   :  { %v2448_v28 = vld [vmem:[#allocation2 + $0x578] sm:$0xff] }
 0x497   :  { %v2364_v31 = vadd.f32 1e-05, %v2361_v30  ;;  %v4931_v30 = vcombine.low %v2435_v21, %v2439_v22  ;;  %v4942_v33 = vcombine.high %v2444_v27, %v2448_v28 }
 0x499   :  { %5690 = vrsqrt.f32 %v2364_v31  ;;  %v4933_v31 = vcombine.low %v2436_v54, %v2440_v7 }
 0x4a3   :  { %v5691_v41 = vpop.eup %5690 }
 0x4a4   :  { %v2367_v42 = vmul.f32 %v5691_v41, %v2363_v35  ;;  %v2366_v44 = vmul.f32 %v5691_v41, %v2362_v34  ;;  %v2451_v34 = vld [vmem:[#allocation2 + $0x590] sm:$0xff]  ;;  %v4939_v41 = vcombine.low %v2443_v13, %v2447_v26 }
 0x4a5   :  { %v2455_v35 = vld [vmem:[#allocation2 + $0x5b0] sm:$0xff] }
 0x4a6   :  { %v2382_v47 = vmul.f32 %v2378_v36, %v2367_v42  ;;  %v2381_v49 = vmul.f32 %v2374_v40, %v2366_v44  ;;  %v2452_v36 = vld [vmem:[#allocation2 + $0x598] sm:$0xff]  ;;  %v4941_v42 = vcombine.low %v2444_v27, %v2448_v28 }
 0x4a7   :  { %v2456_v40 = vld [vmem:[#allocation2 + $0x5b8] sm:$0xff] }
 0x4a8   :  { %v2397_v50 = vadd.f32 %v2393_v43, %v2382_v47  ;;  %v2396_v55 = vadd.f32 %v2389_v29, %v2381_v49  ;;  %v4948_v43 = vcombine.high %v2451_v34, %v2455_v35  ;;  %v4950_v44 = vcombine.high %v2452_v36, %v2456_v40  ;;  %v2459_v29 = vld [vmem:[#allocation2 + $0x5d0] sm:$0xff]  ;;  %v2460_v49 = vld [vmem:[#allocation2 + $0x5d8] sm:$0xff] }
 0x4a9   :  { %v2463_v47 = vld [vmem:[#allocation2 + $0x5f0] sm:$0xff]  ;;  %v4949_v56 = vcombine.low %v2452_v36, %v2456_v40 }
 0x4aa   :  { %v2399_v62 = vpack.c.bf16 %v2397_v50, %v2397_v50  ;;  %v6116_v63 = vpack.c.bf16 %v2396_v55, %v2396_v55  ;;  %v2464_v50 = vld [vmem:[#allocation2 + $0x5f8] sm:$0xff]  ;;  %v4947_v55 = vcombine.low %v2451_v34, %v2455_v35  ;;  %v4956_v59 = vcombine.high %v2459_v29, %v2463_v47 }
 0x4ab   :  { %v4958_v60 = vcombine.high %v2460_v49, %v2464_v50  ;;  %v4957_v3 = vcombine.low %v2460_v49, %v2464_v50 }
 0x4ac   :  { %3244 = vmatprep.mubr.bf16.mxu1 %v2399_v62  ;;  %3285 = vmatprep.mubr.bf16.mxu0 %v2399_v62 }
 0x4ad   :  { %3245 = vmatmul.mubr.bf16.vlgmr.msra.gmra.mrb[16].mxu1 %v6116_v63  ;;  %3286 = vmatmul.mubr.bf16.vlgmr.msra.gmra.mrb[20].mxu0 %v6116_v63 }
 0x4ae   :  { %3295 = vmatpush1.bf16.msra.mxu1 %v4899_v23  ;;  %3336 = vmatpush1.bf16.msra.mxu0 %v4901_v12  ;;  %v4923_v23 = vcombine.low %v2427_v15, %v2431_v16  ;;  %v4925_v12 = vcombine.low %v2428_v17, %v2432_v18 }
 0x4af   :  { %3326 = vmatprep.mubr.bf16.mxu1 %v2399_v62  ;;  %3367 = vmatprep.mubr.bf16.mxu0 %v2399_v62  ;;  %v2471_v62 = vld [vmem:[#allocation2 + $0x630] sm:$0xff] }
 0x4b0   :  { %3296 = vmatprep.subr.bf16.mxu1 %v4908_v1  ;;  %3337 = vmatprep.subr.bf16.mxu0 %v4910_v2  ;;  %v2472_v1 = vld [vmem:[#allocation2 + $0x638] sm:$0xff]  ;;  %v4955_v2 = vcombine.low %v2459_v29, %v2463_v47  ;;  %v4964_v4 = vcombine.high %v2467_v61, %v2471_v62  ;;  %v4963_v15 = vcombine.low %v2467_v61, %v2471_v62 }
 0x4b1   :  { %v4966_v5 = vcombine.high %v2468_v0, %v2472_v1  ;;  %v4965_v16 = vcombine.low %v2468_v0, %v2472_v1 }
 0x4b2   :  { %3297 = vmatpush1.bf16.msra.mxu1 %v4907_v8  ;;  %3338 = vmatpush1.bf16.msra.mxu0 %v4909_v9  ;;  %v2475_v8 = vld [vmem:[#allocation2 + $0x650] sm:$0xff] }
 0x4b3   :  { %3298 = vmatprep.subr.bf16.mxu1 %v4916_v10  ;;  %3339 = vmatprep.subr.bf16.mxu0 %v4918_v11  ;;  %v2479_v9 = vld [vmem:[#allocation2 + $0x670] sm:$0xff]  ;;  %v2476_v10 = vld [vmem:[#allocation2 + $0x658] sm:$0xff] }
 0x4b4   :  { %v2480_v11 = vld [vmem:[#allocation2 + $0x678] sm:$0xff]  ;;  %v4972_v17 = vcombine.high %v2475_v8, %v2479_v9  ;;  %v4971_v21 = vcombine.low %v2475_v8, %v2479_v9 }
 0x4b5   :  { %v4974_v18 = vcombine.high %v2476_v10, %v2480_v11  ;;  %v4973_v22 = vcombine.low %v2476_v10, %v2480_v11 }
 0x4b6   :  { %3299 = vmatpush1.bf16.msra.mxu1 %v4915_v19  ;;  %3340 = vmatpush1.bf16.msra.mxu0 %v4917_v6  ;;  %v2483_v19 = vld [vmem:[#allocation2 + $0x690] sm:$0xff] }
 0x4b7   :  { %3300 = vmatprep.subr.bf16.mxu1 %v4924_v20  ;;  %3341 = vmatprep.subr.bf16.mxu0 %v4926_v52  ;;  %v2487_v6 = vld [vmem:[#allocation2 + $0x6b0] sm:$0xff]  ;;  %v2484_v20 = vld [vmem:[#allocation2 + $0x698] sm:$0xff] }
 0x4b8   :  { %v2488_v52 = vld [vmem:[#allocation2 + $0x6b8] sm:$0xff]  ;;  %v4980_v54 = vcombine.high %v2483_v19, %v2487_v6  ;;  %v4979_v13 = vcombine.low %v2483_v19, %v2487_v6  ;;  %v5448_v19 = vld [vmem:[#allocation5 + $0x400] ss:$8 sps:$4 sm:$0xff]  }
 0x4b9   :  { %v4982_v7 = vcombine.high %v2484_v20, %v2488_v52  ;;  %v4981_v26 = vcombine.low %v2484_v20, %v2488_v52  ;;  %v5451_v6 = vld [vmem:[#allocation5 + $0x500] ss:$8 sps:$4 sm:$0xff]   ;;  %v5456_v20 = vld [vmem:[#allocation5 + $0x414] ss:$8 sps:$4 sm:$0xff]  }
 0x4ba   :  { %3301 = vmatpush1.bf16.msra.mxu1 %v4923_v23  ;;  %3342 = vmatpush1.bf16.msra.mxu0 %v4925_v12  ;;  %v2491_v23 = vld [vmem:[#allocation2 + $0x6d0] sm:$0xff] }
 0x4bb   :  { %3302 = vmatprep.subr.bf16.mxu1 %v4932_v24  ;;  %3343 = vmatprep.subr.bf16.mxu0 %v4934_v25  ;;  %v2495_v12 = vld [vmem:[#allocation2 + $0x6f0] sm:$0xff]  ;;  %v2492_v24 = vld [vmem:[#allocation2 + $0x6d8] sm:$0xff] }
 0x4bc   :  { %v2496_v25 = vld [vmem:[#allocation2 + $0x6f8] sm:$0xff]  ;;  %v4988_v27 = vcombine.high %v2491_v23, %v2495_v12  ;;  %v4987_v34 = vcombine.low %v2491_v23, %v2495_v12  ;;  %v5460_v23 = vld [vmem:[#allocation5 + $0x420] ss:$8 sps:$4 sm:$0xff]  }
 0x4bd   :  { %v4990_v28 = vcombine.high %v2492_v24, %v2496_v25  ;;  %v4989_v35 = vcombine.low %v2492_v24, %v2496_v25  ;;  %v5459_v52 = vld [vmem:[#allocation5 + $0x514] ss:$8 sps:$4 sm:$0xff]   ;;  %v5463_v12 = vld [vmem:[#allocation5 + $0x520] ss:$8 sps:$4 sm:$0xff]  }
 0x4be   :  { %3303 = vmatpush1.bf16.msra.mxu1 %v4931_v30  ;;  %3344 = vmatpush1.bf16.msra.mxu0 %v4933_v31  ;;  %v2499_v30 = vld [vmem:[#allocation2 + $0x710] sm:$0xff] }
 0x4bf   :  { %3304 = vmatprep.subr.bf16.mxu1 %v4940_v32  ;;  %3345 = vmatprep.subr.bf16.mxu0 %v4942_v33  ;;  %v2503_v31 = vld [vmem:[#allocation2 + $0x730] sm:$0xff]  ;;  %v2500_v32 = vld [vmem:[#allocation2 + $0x718] sm:$0xff] }
 0x4c0   :  { %v2504_v33 = vld [vmem:[#allocation2 + $0x738] sm:$0xff]  ;;  %v4996_v36 = vcombine.high %v2499_v30, %v2503_v31  ;;  %v4995_v29 = vcombine.low %v2499_v30, %v2503_v31  ;;  %v5475_v30 = vld [vmem:[#allocation5 + $0x540] ss:$8 sps:$4 sm:$0xff]  }
 0x4c1   :  { %v4998_v40 = vcombine.high %v2500_v32, %v2504_v33  ;;  %v4997_v47 = vcombine.low %v2500_v32, %v2504_v33  ;;  %v5468_v24 = vld [vmem:[#allocation5 + $0x434] ss:$8 sps:$4 sm:$0xff]   ;;  %v5478_v33 = vld [vmem:[#allocation5 + $0x450] ss:$8 sps:$4 sm:$0xff]  }
 0x4c2   :  { %3305 = vmatpush1.bf16.msra.mxu1 %v4939_v41  ;;  %3346 = vmatpush1.bf16.msra.mxu0 %v4941_v42  ;;  %v2507_v41 = vld [vmem:[#allocation2 + $0x750] sm:$0xff] }
 0x4c3   :  { %3306 = vmatprep.subr.bf16.mxu1 %v4948_v43  ;;  %3347 = vmatprep.subr.bf16.mxu0 %v4950_v44  ;;  %v2511_v42 = vld [vmem:[#allocation2 + $0x770] sm:$0xff]  ;;  %v2508_v43 = vld [vmem:[#allocation2 + $0x758] sm:$0xff] }
 0x4c4   :  { %v2512_v44 = vld [vmem:[#allocation2 + $0x778] sm:$0xff]  ;;  %v5004_v49 = vcombine.high %v2507_v41, %v2511_v42  ;;  %v5003_v61 = vcombine.low %v2507_v41, %v2511_v42  ;;  %v5487_v41 = vld [vmem:[#allocation5 + $0x560] ss:$8 sps:$4 sm:$0xff]  }
 0x4c5   :  { %v5006_v50 = vcombine.high %v2508_v43, %v2512_v44  ;;  %v5005_v62 = vcombine.low %v2508_v43, %v2512_v44  ;;  %v5471_v25 = vld [vmem:[#allocation5 + $0x534] ss:$8 sps:$4 sm:$0xff]   ;;  %v5490_v44 = vld [vmem:[#allocation5 + $0x470] ss:$8 sps:$4 sm:$0xff]  }
 0x4c6   :  { %3307 = vmatpush1.bf16.msra.mxu1 %v4947_v55  ;;  %3348 = vmatpush1.bf16.msra.mxu0 %v4949_v56  ;;  %v2515_v55 = vld [vmem:[#allocation2 + $0x790] sm:$0xff] }
 0x4c7   :  { %3308 = vmatprep.subr.bf16.mxu1 %v4956_v59  ;;  %3349 = vmatprep.subr.bf16.mxu0 %v4958_v60  ;;  %v2519_v56 = vld [vmem:[#allocation2 + $0x7b0] sm:$0xff]  ;;  %v2516_v59 = vld [vmem:[#allocation2 + $0x798] sm:$0xff] }
 0x4c8   :  { %v2520_v60 = vld [vmem:[#allocation2 + $0x7b8] sm:$0xff]  ;;  %v5012_v0 = vcombine.high %v2515_v55, %v2519_v56  ;;  %v5011_v8 = vcombine.low %v2515_v55, %v2519_v56  ;;  %v5499_v55 = vld [vmem:[#allocation5 + $0x580] ss:$8 sps:$4 sm:$0xff]  }
 0x4c9   :  { %v5014_v1 = vcombine.high %v2516_v59, %v2520_v60  ;;  %v5013_v9 = vcombine.low %v2516_v59, %v2520_v60  ;;  %v5480_v31 = vld [vmem:[#allocation5 + $0x454] ss:$8 sps:$4 sm:$0xff]   ;;  %v5502_v60 = vld [vmem:[#allocation5 + $0x490] ss:$8 sps:$4 sm:$0xff]  }
 0x4ca   :  { %3309 = vmatpush1.bf16.msra.mxu1 %v4955_v2  ;;  %3350 = vmatpush1.bf16.msra.mxu0 %v4957_v3  ;;  %v2523_v2 = vld [vmem:[#allocation2 + $0x7d0] sm:$0xff] }
 0x4cb   :  { %3310 = vmatprep.subr.bf16.mxu1 %v4964_v4  ;;  %3351 = vmatprep.subr.bf16.mxu0 %v4966_v5  ;;  %v2527_v3 = vld [vmem:[#allocation2 + $0x7f0] sm:$0xff]  ;;  %v2524_v4 = vld [vmem:[#allocation2 + $0x7d8] sm:$0xff] }
 0x4cc   :  { %v2528_v5 = vld [vmem:[#allocation2 + $0x7f8] sm:$0xff]  ;;  %v5020_v10 = vcombine.high %v2523_v2, %v2527_v3 }
 0x4cd   :  { %v5022_v11 = vcombine.high %v2524_v4, %v2528_v5  ;;  %v5483_v32 = vld [vmem:[#allocation5 + $0x554] ss:$8 sps:$4 sm:$0xff]  }
 0x4ce   :  { %3311 = vmatpush1.bf16.msra.mxu1 %v4963_v15  ;;  %3352 = vmatpush1.bf16.msra.mxu0 %v4965_v16  ;;  %v5019_v15 = vcombine.low %v2523_v2, %v2527_v3  ;;  %v5021_v16 = vcombine.low %v2524_v4, %v2528_v5  ;;  %v5492_v42 = vld [vmem:[#allocation5 + $0x474] ss:$8 sps:$4 sm:$0xff]   ;;  %v5511_v2 = vld [vmem:[#allocation5 + $0x5a0] ss:$8 sps:$4 sm:$0xff]   ;;  %v5514_v5 = vld [vmem:[#allocation5 + $0x4b0] ss:$8 sps:$4 sm:$0xff]  }
 0x4cf   :  { %3312 = vmatprep.subr.bf16.mxu1 %v4972_v17  ;;  %3353 = vmatprep.subr.bf16.mxu0 %v4974_v18  ;;  %v5450_v17 = vld [vmem:[#allocation5 + $0x404] ss:$8 sps:$4 sm:$0xff]   ;;  %v5495_v43 = vld [vmem:[#allocation5 + $0x574] ss:$8 sps:$4 sm:$0xff]  }
 0x4d0   :  { %v5453_v18 = vld [vmem:[#allocation5 + $0x504] ss:$8 sps:$4 sm:$0xff]   ;;  %v5504_v56 = vld [vmem:[#allocation5 + $0x494] ss:$8 sps:$4 sm:$0xff]  }
 0x4d1   :  { %v5507_v59 = vld [vmem:[#allocation5 + $0x594] ss:$8 sps:$4 sm:$0xff]  }
 0x4d2   :  { %3313 = vmatpush1.bf16.msra.mxu1 %v4971_v21  ;;  %3354 = vmatpush1.bf16.msra.mxu0 %v4973_v22  ;;  %v5454_v21 = vld [vmem:[#allocation5 + $0x410] ss:$8 sps:$4 sm:$0xff]   ;;  %v5516_v3 = vld [vmem:[#allocation5 + $0x4b4] ss:$8 sps:$4 sm:$0xff]  }
 0x4d3   :  { %3314 = vmatprep.subr.bf16.mxu1 %v4980_v54  ;;  %3355 = vmatprep.subr.bf16.mxu0 %v4982_v7  ;;  %v5457_v22 = vld [vmem:[#allocation5 + $0x510] ss:$8 sps:$4 sm:$0xff]   ;;  %v5462_v54 = vld [vmem:[#allocation5 + $0x424] ss:$8 sps:$4 sm:$0xff]   ;;  %v5519_v4 = vld [vmem:[#allocation5 + $0x5b4] ss:$8 sps:$4 sm:$0xff]  }
 0x4d4   :  { %v5465_v7 = vld [vmem:[#allocation5 + $0x524] ss:$8 sps:$4 sm:$0xff]  }
 0x4d6   :  { %3315 = vmatpush1.bf16.msra.mxu1 %v4979_v13  ;;  %3356 = vmatpush1.bf16.msra.mxu0 %v4981_v26  ;;  %v5466_v13 = vld [vmem:[#allocation5 + $0x430] ss:$8 sps:$4 sm:$0xff]   ;;  %v5474_v26 = vld [vmem:[#allocation5 + $0x444] ss:$8 sps:$4 sm:$0xff]  }
 0x4d7   :  { %3316 = vmatprep.subr.bf16.mxu1 %v4988_v27  ;;  %3357 = vmatprep.subr.bf16.mxu0 %v4990_v28  ;;  %v5477_v27 = vld [vmem:[#allocation5 + $0x544] ss:$8 sps:$4 sm:$0xff]   ;;  %v5472_v28 = vld [vmem:[#allocation5 + $0x440] ss:$8 sps:$4 sm:$0xff]  }
 0x4da   :  { %3317 = vmatpush1.bf16.msra.mxu1 %v4987_v34  ;;  %3358 = vmatpush1.bf16.msra.mxu0 %v4989_v35  ;;  %v5481_v34 = vld [vmem:[#allocation5 + $0x550] ss:$8 sps:$4 sm:$0xff]   ;;  %v5486_v35 = vld [vmem:[#allocation5 + $0x464] ss:$8 sps:$4 sm:$0xff]  }
 0x4db   :  { %3318 = vmatprep.subr.bf16.mxu1 %v4996_v36  ;;  %3359 = vmatprep.subr.bf16.mxu0 %v4998_v40  ;;  %v5489_v36 = vld [vmem:[#allocation5 + $0x564] ss:$8 sps:$4 sm:$0xff]   ;;  %v5484_v40 = vld [vmem:[#allocation5 + $0x460] ss:$8 sps:$4 sm:$0xff]  }
 0x4de   :  { %3319 = vmatpush1.bf16.msra.mxu1 %v4995_v29  ;;  %3360 = vmatpush1.bf16.msra.mxu0 %v4997_v47  ;;  %v5493_v29 = vld [vmem:[#allocation5 + $0x570] ss:$8 sps:$4 sm:$0xff]   ;;  %v5498_v47 = vld [vmem:[#allocation5 + $0x484] ss:$8 sps:$4 sm:$0xff]  }
 0x4df   :  { %3320 = vmatprep.subr.bf16.mxu1 %v5004_v49  ;;  %3361 = vmatprep.subr.bf16.mxu0 %v5006_v50  ;;  %v5501_v49 = vld [vmem:[#allocation5 + $0x584] ss:$8 sps:$4 sm:$0xff]   ;;  %v5496_v50 = vld [vmem:[#allocation5 + $0x480] ss:$8 sps:$4 sm:$0xff]  }
 0x4e2   :  { %3321 = vmatpush1.bf16.msra.mxu1 %v5003_v61  ;;  %3362 = vmatpush1.bf16.msra.mxu0 %v5005_v62  ;;  %v5505_v61 = vld [vmem:[#allocation5 + $0x590] ss:$8 sps:$4 sm:$0xff]   ;;  %v5510_v62 = vld [vmem:[#allocation5 + $0x4a4] ss:$8 sps:$4 sm:$0xff]  }
 0x4e3   :  { %3322 = vmatprep.subr.bf16.mxu1 %v5012_v0  ;;  %3363 = vmatprep.subr.bf16.mxu0 %v5014_v1  ;;  %v5513_v0 = vld [vmem:[#allocation5 + $0x5a4] ss:$8 sps:$4 sm:$0xff]   ;;  %v5508_v1 = vld [vmem:[#allocation5 + $0x4a0] ss:$8 sps:$4 sm:$0xff]  }
 0x4e6   :  { %3323 = vmatpush1.bf16.msra.mxu1 %v5011_v8  ;;  %3364 = vmatpush1.bf16.msra.mxu0 %v5013_v9  ;;  %v5517_v8 = vld [vmem:[#allocation5 + $0x5b0] ss:$8 sps:$4 sm:$0xff]   ;;  %v5522_v9 = vld [vmem:[#allocation5 + $0x4c4] ss:$8 sps:$4 sm:$0xff]  }
 0x4e7   :  { %3324 = vmatprep.subr.bf16.mxu1 %v5020_v10  ;;  %3365 = vmatprep.subr.bf16.mxu0 %v5022_v11  ;;  %v5525_v10 = vld [vmem:[#allocation5 + $0x5c4] ss:$8 sps:$4 sm:$0xff]   ;;  %v5520_v11 = vld [vmem:[#allocation5 + $0x4c0] ss:$8 sps:$4 sm:$0xff]  }
 0x4ea   :  { %3325 = vmatpush1.bf16.msra.mxu1 %v5019_v15  ;;  %3366 = vmatpush1.bf16.msra.mxu0 %v5021_v16  ;;  %v5523_v15 = vld [vmem:[#allocation5 + $0x5c0] ss:$8 sps:$4 sm:$0xff]   ;;  %v5528_v16 = vld [vmem:[#allocation5 + $0x4d4] ss:$8 sps:$4 sm:$0xff]  }
 0x4eb   :  { %4222 = vmatprep.subr.bf16.mxu1 %v5450_v17  ;;  %4263 = vmatprep.subr.bf16.mxu0 %v5453_v18  ;;  %v5531_v17 = vld [vmem:[#allocation5 + $0x5d4] ss:$8 sps:$4 sm:$0xff]   ;;  %v5526_v18 = vld [vmem:[#allocation5 + $0x4d0] ss:$8 sps:$4 sm:$0xff]  }
 0x4ed   :  { %3327 = vmatmul.mubr.bf16.vlgmr.msra.gmra.mrb[20].mxu1 %v6116_v63  ;;  %3368 = vmatmul.mubr.bf16.vlgmr.msra.gmra.mrb[24].mxu0 %v6116_v63  ;;  %v5469_v63 = vld [vmem:[#allocation5 + $0x530] ss:$8 sps:$4 sm:$0xff]  }
 0x4ee   :  { %4223 = vmatpush1.bf16.msra.mxu1 %v5448_v19  ;;  %4264 = vmatpush1.bf16.msra.mxu0 %v5451_v6  ;;  %v5529_v19 = vld [vmem:[#allocation5 + $0x5d0] ss:$8 sps:$4 sm:$0xff]   ;;  %v5534_v6 = vld [vmem:[#allocation5 + $0x4e4] ss:$8 sps:$4 sm:$0xff]  }
 0x4ef   :  { %4224 = vmatprep.subr.bf16.mxu1 %v5456_v20  ;;  %4265 = vmatprep.subr.bf16.mxu0 %v5459_v52  ;;  %v5537_v20 = vld [vmem:[#allocation5 + $0x5e4] ss:$8 sps:$4 sm:$0xff]   ;;  %v5532_v52 = vld [vmem:[#allocation5 + $0x4e0] ss:$8 sps:$4 sm:$0xff]  }
 0x4f2   :  { %4225 = vmatpush1.bf16.msra.mxu1 %v5454_v21  ;;  %4266 = vmatpush1.bf16.msra.mxu0 %v5457_v22  ;;  %v5535_v21 = vld [vmem:[#allocation5 + $0x5e0] ss:$8 sps:$4 sm:$0xff]   ;;  %v5540_v22 = vld [vmem:[#allocation5 + $0x4f4] ss:$8 sps:$4 sm:$0xff]  }
 0x4f3   :  { %4226 = vmatprep.subr.bf16.mxu1 %v5462_v54  ;;  %4267 = vmatprep.subr.bf16.mxu0 %v5465_v7  ;;  %v5543_v54 = vld [vmem:[#allocation5 + $0x5f4] ss:$8 sps:$4 sm:$0xff]   ;;  %v5538_v7 = vld [vmem:[#allocation5 + $0x4f0] ss:$8 sps:$4 sm:$0xff]  }
 0x4f6   :  { %4227 = vmatpush1.bf16.msra.mxu1 %v5460_v23  ;;  %4268 = vmatpush1.bf16.msra.mxu0 %v5463_v12  ;;  %v5541_v23 = vld [vmem:[#allocation5 + $0x5f0] ss:$8 sps:$4 sm:$0xff]   ;;  %v5546_v12 = vld [vmem:[#allocation5 + $0x604] ss:$8 sps:$4 sm:$0xff]  }
 0x4f7   :  { %4228 = vmatprep.subr.bf16.mxu1 %v5468_v24  ;;  %4269 = vmatprep.subr.bf16.mxu0 %v5471_v25  ;;  %v5549_v24 = vld [vmem:[#allocation5 + $0x704] ss:$8 sps:$4 sm:$0xff]  }
 0x4f8   :  { %v6125_v25 = vld [vmem:[%s6241_s6 + $0x8] sm:$0xff] }
 0x4fa   :  { %4229 = vmatpush1.bf16.msra.mxu1 %v5466_v13  ;;  %4270 = vmatpush1.bf16.msra.mxu0 %v5469_v63  ;;  %v2535_v13 = vrot.slane %v6125_v25, %v6000_v46  ;;  %v2543_v63 = vrot.slane %v6125_v25, %v506_v37 }
 0x4fb   :  { %4230 = vmatprep.subr.bf16.mxu1 %v5474_v26  ;;  %4271 = vmatprep.subr.bf16.mxu0 %v5477_v27  ;;  %v2539_v26 = vrot.slane %v6125_v25, %v6006_v48  ;;  %v2547_v27 = vrot.slane %v6125_v25, %v510_v39 }
 0x4fe   :  { %4231 = vmatpush1.bf16.msra.mxu1 %v5472_v28  ;;  %4272 = vmatpush1.bf16.msra.mxu0 %v5475_v30 }
 0x4ff   :  { %4232 = vmatprep.subr.bf16.mxu1 %v5480_v31  ;;  %4273 = vmatprep.subr.bf16.mxu0 %v5483_v32 }
 0x502   :  { %4233 = vmatpush1.bf16.msra.mxu1 %v5478_v33  ;;  %4274 = vmatpush1.bf16.msra.mxu0 %v5481_v34 }
 0x503   :  { %4234 = vmatprep.subr.bf16.mxu1 %v5486_v35  ;;  %4275 = vmatprep.subr.bf16.mxu0 %v5489_v36 }
 0x506   :  { %4235 = vmatpush1.bf16.msra.mxu1 %v5484_v40  ;;  %4276 = vmatpush1.bf16.msra.mxu0 %v5487_v41 }
 0x507   :  { %4236 = vmatprep.subr.bf16.mxu1 %v5492_v42  ;;  %4277 = vmatprep.subr.bf16.mxu0 %v5495_v43 }
 0x50a   :  { %4237 = vmatpush1.bf16.msra.mxu1 %v5490_v44  ;;  %4278 = vmatpush1.bf16.msra.mxu0 %v5493_v29 }
 0x50b   :  { %4238 = vmatprep.subr.bf16.mxu1 %v5498_v47  ;;  %4279 = vmatprep.subr.bf16.mxu0 %v5501_v49 }
 0x50e   :  { %4239 = vmatpush1.bf16.msra.mxu1 %v5496_v50  ;;  %4280 = vmatpush1.bf16.msra.mxu0 %v5499_v55 }
 0x50f   :  { %4240 = vmatprep.subr.bf16.mxu1 %v5504_v56  ;;  %4281 = vmatprep.subr.bf16.mxu0 %v5507_v59 }
 0x512   :  { %4241 = vmatpush1.bf16.msra.mxu1 %v5502_v60  ;;  %4282 = vmatpush1.bf16.msra.mxu0 %v5505_v61 }
 0x513   :  { %4242 = vmatprep.subr.bf16.mxu1 %v5510_v62  ;;  %4283 = vmatprep.subr.bf16.mxu0 %v5513_v0 }
 0x516   :  { %4243 = vmatpush1.bf16.msra.mxu1 %v5508_v1  ;;  %4284 = vmatpush1.bf16.msra.mxu0 %v5511_v2 }
 0x517   :  { %4244 = vmatprep.subr.bf16.mxu1 %v5516_v3  ;;  %4285 = vmatprep.subr.bf16.mxu0 %v5519_v4 }
 0x51a   :  { %4245 = vmatpush1.bf16.msra.mxu1 %v5514_v5  ;;  %4286 = vmatpush1.bf16.msra.mxu0 %v5517_v8 }
 0x51b   :  { %4246 = vmatprep.subr.bf16.mxu1 %v5522_v9  ;;  %4287 = vmatprep.subr.bf16.mxu0 %v5525_v10  ;;  %v5544_v10 = vld [vmem:[#allocation5 + $0x600] ss:$8 sps:$4 sm:$0xff]  }
 0x51e   :  { %4247 = vmatpush1.bf16.msra.mxu1 %v5520_v11  ;;  %4288 = vmatpush1.bf16.msra.mxu0 %v5523_v15 }
 0x51f   :  { %4248 = vmatprep.subr.bf16.mxu1 %v5528_v16  ;;  %4289 = vmatprep.subr.bf16.mxu0 %v5531_v17  ;;  %v5547_v16 = vld [vmem:[#allocation5 + $0x700] ss:$8 sps:$4 sm:$0xff]   ;;  %v5552_v17 = vld [vmem:[#allocation5 + $0x614] ss:$8 sps:$4 sm:$0xff]  }
 0x522   :  { %4249 = vmatpush1.bf16.msra.mxu1 %v5526_v18  ;;  %4290 = vmatpush1.bf16.msra.mxu0 %v5529_v19  ;;  %v5555_v19 = vld [vmem:[#allocation5 + $0x714] ss:$8 sps:$4 sm:$0xff]  }
 0x523   :  { %4250 = vmatprep.subr.bf16.mxu1 %v5534_v6  ;;  %4291 = vmatprep.subr.bf16.mxu0 %v5537_v20  ;;  %v5550_v6 = vld [vmem:[#allocation5 + $0x610] ss:$8 sps:$4 sm:$0xff]  }
 0x524   :  { %v5553_v20 = vld [vmem:[#allocation5 + $0x710] ss:$8 sps:$4 sm:$0xff]  }
 0x526   :  { %4251 = vmatpush1.bf16.msra.mxu1 %v5532_v52  ;;  %4292 = vmatpush1.bf16.msra.mxu0 %v5535_v21  ;;  %v5558_v52 = vld [vmem:[#allocation5 + $0x624] ss:$8 sps:$4 sm:$0xff]  }
 0x527   :  { %4252 = vmatprep.subr.bf16.mxu1 %v5540_v22  ;;  %4293 = vmatprep.subr.bf16.mxu0 %v5543_v54  ;;  %v5561_v21 = vld [vmem:[#allocation5 + $0x724] ss:$8 sps:$4 sm:$0xff]   ;;  %v5556_v22 = vld [vmem:[#allocation5 + $0x620] ss:$8 sps:$4 sm:$0xff]  }
 0x528   :  { %v5559_v54 = vld [vmem:[#allocation5 + $0x720] ss:$8 sps:$4 sm:$0xff]  }
 0x52a   :  { %4253 = vmatpush1.bf16.msra.mxu1 %v5538_v7  ;;  %4294 = vmatpush1.bf16.msra.mxu0 %v5541_v23  ;;  %v5564_v7 = vld [vmem:[#allocation5 + $0x634] ss:$8 sps:$4 sm:$0xff]  }
 0x52b   :  { %4304 = vmatprep.subr.bf16.mxu1 %v5546_v12  ;;  %4345 = vmatprep.subr.bf16.mxu0 %v5549_v24  ;;  %v5567_v23 = vld [vmem:[#allocation5 + $0x734] ss:$8 sps:$4 sm:$0xff]   ;;  %v5562_v12 = vld [vmem:[#allocation5 + $0x630] ss:$8 sps:$4 sm:$0xff]  }
 0x52c   :  { %v5565_v24 = vld [vmem:[#allocation5 + $0x730] ss:$8 sps:$4 sm:$0xff]  }
 0x580   :  { %v3246_v28 = vpop.f32.mrb[16].mxu1  ;;  %v3287_v30 = vpop.f32.mrb[20].mxu0 }
 0x581   :  { %v3247_v31 = vadd.f32 %v3246_v28, %v2535_v13  ;;  %v3288_v32 = vadd.f32 %v3287_v30, %v2543_v63  ;;  %v3248_v33 = vpop.f32.mrb[17].mxu1  ;;  %v3289_v34 = vpop.f32.mrb[21].mxu0  ;;  %v5570_v13 = vld [vmem:[#allocation5 + $0x644] ss:$8 sps:$4 sm:$0xff]   ;;  %v5576_v28 = vld [vmem:[#allocation5 + $0x654] ss:$8 sps:$4 sm:$0xff]  }
 0x582   :  { %v3249_v35 = vadd.f32 %v3248_v33, %v2539_v26  ;;  %v3290_v36 = vadd.f32 %v3289_v34, %v2547_v27  ;;  %v3250_v40 = vpop.f32.mrb[18].mxu1  ;;  %v3291_v41 = vpop.f32.mrb[22].mxu0  ;;  %v5573_v63 = vld [vmem:[#allocation5 + $0x744] ss:$8 sps:$4 sm:$0xff]   ;;  %v5568_v26 = vld [vmem:[#allocation5 + $0x640] ss:$8 sps:$4 sm:$0xff]  }
 0x583   :  { %v5023_v42 = vmul.f32 -1.442695, %v3247_v31  ;;  %v5025_v43 = vmul.f32 -1.442695, %v3288_v32  ;;  %v3251_v37 = vpop.f32.mrb[19].mxu1  ;;  %v3292_v44 = vpop.f32.mrb[23].mxu0 }
 0x584   :  { %v5024_v29 = vmul.f32 -1.442695, %v3249_v35  ;;  %v5026_v47 = vmul.f32 -1.442695, %v3290_v36  ;;  %v5571_v27 = vld [vmem:[#allocation5 + $0x740] ss:$8 sps:$4 sm:$0xff]   ;;  %v2559_v37 = vrot.slane %v6125_v25, %v522_v53 }
 0x585   :  { %5692 = vpow2.f32 %v5023_v42  ;;  %v5579_v30 = vld [vmem:[#allocation5 + $0x754] ss:$8 sps:$4 sm:$0xff]   ;;  %v5582_v33 = vld [vmem:[#allocation5 + $0x664] ss:$8 sps:$4 sm:$0xff]   ;;  %v5586_v42 = vld [vmem:[#allocation5 + $0x670] ss:$8 sps:$4 sm:$0xff]  }
 0x586   :  { %5694 = vpow2.f32 %v5025_v43  ;;  %v5585_v34 = vld [vmem:[#allocation5 + $0x764] ss:$8 sps:$4 sm:$0xff]   ;;  %v5588_v40 = vld [vmem:[#allocation5 + $0x674] ss:$8 sps:$4 sm:$0xff]   ;;  %v2551_v43 = vrot.slane %v6125_v25, %v514_v51  ;;  %v5589_v44 = vld [vmem:[#allocation5 + $0x770] ss:$8 sps:$4 sm:$0xff]  }
 0x587   :  { %5696 = vpow2.f32 %v5024_v29  ;;  %v5591_v41 = vld [vmem:[#allocation5 + $0x774] ss:$8 sps:$4 sm:$0xff]   ;;  %v2555_v29 = vrot.slane %v6125_v25, %v518_v57 }
 0x588   :  { %5698 = vpow2.f32 %v5026_v47  ;;  %v2563_v47 = vrot.slane %v6125_v25, %v526_v58 }
 0x58f   :  { %v5693_v39 = vpop.eup %5692 }
 0x590   :  { %v5695_v49 = vpop.eup %5694  ;;  %v3400_v50 = vadd.f32 1.0, %v5693_v39  ;;  %v5594_v39 = vld [vmem:[#allocation5 + $0x684] ss:$8 sps:$4 sm:$0xff]  }
 0x591   :  { %v5697_v55 = vpop.eup %5696  ;;  %v3402_v56 = vadd.f32 1.0, %v5695_v49  ;;  %v5597_v49 = vld [vmem:[#allocation5 + $0x784] ss:$8 sps:$4 sm:$0xff]  }
 0x592   :  { %v5699_v59 = vpop.eup %5698  ;;  %5700 = vrcp.f32 %v3400_v50  ;;  %v3401_v60 = vadd.f32 1.0, %v5697_v55 }
 0x593   :  { %5702 = vrcp.f32 %v3402_v56  ;;  %v3403_v61 = vadd.f32 1.0, %v5699_v59 }
 0x594   :  { %5704 = vrcp.f32 %v3401_v60  ;;  %v5592_v60 = vld [vmem:[#allocation5 + $0x680] ss:$8 sps:$4 sm:$0xff]  }
 0x595   :  { %5706 = vrcp.f32 %v3403_v61  ;;  %v5595_v61 = vld [vmem:[#allocation5 + $0x780] ss:$8 sps:$4 sm:$0xff]  }
 0x59c   :  { %v5701_v62 = vpop.eup %5700 }
 0x59d   :  { %v5703_v0 = vpop.eup %5702  ;;  %v3424_v2 = vmul.f32 %v5701_v62, %v3247_v31  ;;  %v5574_v31 = vld [vmem:[#allocation5 + $0x650] ss:$8 sps:$4 sm:$0xff]   ;;  %v5600_v62 = vld [vmem:[#allocation5 + $0x694] ss:$8 sps:$4 sm:$0xff]  }
 0x59e   :  { %v5705_v1 = vpop.eup %5704  ;;  %v3426_v4 = vmul.f32 %v5703_v0, %v3288_v32  ;;  %v5577_v32 = vld [vmem:[#allocation5 + $0x750] ss:$8 sps:$4 sm:$0xff]   ;;  %v5603_v0 = vld [vmem:[#allocation5 + $0x794] ss:$8 sps:$4 sm:$0xff]  }
 0x59f   :  { %v5707_v3 = vpop.eup %5706  ;;  %v3425_v5 = vmul.f32 %v5705_v1, %v3249_v35  ;;  %v3432_v11 = vpack.c.bf16 %v3424_v2, %v3424_v2  ;;  %v5580_v35 = vld [vmem:[#allocation5 + $0x660] ss:$8 sps:$4 sm:$0xff]  }
 0x5a0   :  { %v3427_v8 = vmul.f32 %v5707_v3, %v3290_v36  ;;  %v3434_v18 = vpack.c.bf16 %v3426_v4, %v3426_v4  ;;  %v5583_v36 = vld [vmem:[#allocation5 + $0x760] ss:$8 sps:$4 sm:$0xff]  }
 0x5a1   :  { %v3433_v9 = vpack.c.bf16 %v3425_v5, %v3425_v5 }
 0x5a2   :  { %v3435_v15 = vpack.c.bf16 %v3427_v8, %v3427_v8 }
 0x5a3   :  { %4254 = vmatprep.mubr.bf16.mxu1 %v3433_v9  ;;  %v5598_v9 = vld [vmem:[#allocation5 + $0x690] ss:$8 sps:$4 sm:$0xff]  }
 0x5a4   :  { %4295 = vmatprep.mubr.bf16.mxu0 %v3435_v15  ;;  %4255 = vmatmul.mubr.bf16.vlgmr.msra.gmra.mrb[24].mxu1 %v3432_v11  ;;  %v5606_v11 = vld [vmem:[#allocation5 + $0x6a4] ss:$8 sps:$4 sm:$0xff]  }
 0x5a5   :  { %4296 = vmatmul.mubr.bf16.vlgmr.msra.gmra.mrb[28].mxu0 %v3434_v18  ;;  %4305 = vmatpush1.bf16.msra.mxu1 %v5544_v10  ;;  %v5601_v10 = vld [vmem:[#allocation5 + $0x790] ss:$8 sps:$4 sm:$0xff]   ;;  %v5609_v15 = vld [vmem:[#allocation5 + $0x7a4] ss:$8 sps:$4 sm:$0xff]   ;;  %v5612_v18 = vld [vmem:[#allocation5 + $0x6b4] ss:$8 sps:$4 sm:$0xff]  }
 0x5a6   :  { %4346 = vmatpush1.bf16.msra.mxu0 %v5547_v16  ;;  %4306 = vmatprep.subr.bf16.mxu1 %v5552_v17  ;;  %v5604_v16 = vld [vmem:[#allocation5 + $0x6a0] ss:$8 sps:$4 sm:$0xff]  }
 0x5a7   :  { %4347 = vmatprep.subr.bf16.mxu0 %v5555_v19  ;;  %v5607_v17 = vld [vmem:[#allocation5 + $0x7a0] ss:$8 sps:$4 sm:$0xff]   ;;  %v5615_v19 = vld [vmem:[#allocation5 + $0x7b4] ss:$8 sps:$4 sm:$0xff]  }
 0x5a9   :  { %4307 = vmatpush1.bf16.msra.mxu1 %v5550_v6  ;;  %v5610_v6 = vld [vmem:[#allocation5 + $0x6b0] ss:$8 sps:$4 sm:$0xff]  }
 0x5aa   :  { %4348 = vmatpush1.bf16.msra.mxu0 %v5553_v20  ;;  %4308 = vmatprep.subr.bf16.mxu1 %v5558_v52  ;;  %v5613_v20 = vld [vmem:[#allocation5 + $0x7b0] ss:$8 sps:$4 sm:$0xff]   ;;  %v5618_v52 = vld [vmem:[#allocation5 + $0x6c4] ss:$8 sps:$4 sm:$0xff]  }
 0x5ab   :  { %4349 = vmatprep.subr.bf16.mxu0 %v5561_v21 }
 0x5ad   :  { %4309 = vmatpush1.bf16.msra.mxu1 %v5556_v22  ;;  %v5621_v22 = vld [vmem:[#allocation5 + $0x7c4] ss:$8 sps:$4 sm:$0xff]  }
 0x5ae   :  { %4350 = vmatpush1.bf16.msra.mxu0 %v5559_v54  ;;  %4310 = vmatprep.subr.bf16.mxu1 %v5564_v7 }
 0x5af   :  { %4351 = vmatprep.subr.bf16.mxu0 %v5567_v23 }
 0x5b1   :  { %4311 = vmatpush1.bf16.msra.mxu1 %v5562_v12 }
 0x5b2   :  { %4352 = vmatpush1.bf16.msra.mxu0 %v5565_v24  ;;  %4312 = vmatprep.subr.bf16.mxu1 %v5570_v13  ;;  %v5616_v24 = vld [vmem:[#allocation5 + $0x6c0] ss:$8 sps:$4 sm:$0xff]  }
 0x5b3   :  { %4353 = vmatprep.subr.bf16.mxu0 %v5573_v63 }
 0x5b5   :  { %4313 = vmatpush1.bf16.msra.mxu1 %v5568_v26  ;;  %v5619_v26 = vld [vmem:[#allocation5 + $0x7c0] ss:$8 sps:$4 sm:$0xff]  }
 0x5b6   :  { %4354 = vmatpush1.bf16.msra.mxu0 %v5571_v27  ;;  %4314 = vmatprep.subr.bf16.mxu1 %v5576_v28  ;;  %v5624_v27 = vld [vmem:[#allocation5 + $0x6d4] ss:$8 sps:$4 sm:$0xff]  }
 0x5b7   :  { %4355 = vmatprep.subr.bf16.mxu0 %v5579_v30  ;;  %v5627_v30 = vld [vmem:[#allocation5 + $0x7d4] ss:$8 sps:$4 sm:$0xff]  }
 0x5b9   :  { %4315 = vmatpush1.bf16.msra.mxu1 %v5574_v31  ;;  %v5622_v31 = vld [vmem:[#allocation5 + $0x6d0] ss:$8 sps:$4 sm:$0xff]  }
 0x5ba   :  { %4356 = vmatpush1.bf16.msra.mxu0 %v5577_v32  ;;  %4316 = vmatprep.subr.bf16.mxu1 %v5582_v33  ;;  %v5625_v32 = vld [vmem:[#allocation5 + $0x7d0] ss:$8 sps:$4 sm:$0xff]   ;;  %v5630_v33 = vld [vmem:[#allocation5 + $0x6e4] ss:$8 sps:$4 sm:$0xff]  }
 0x5bb   :  { %4357 = vmatprep.subr.bf16.mxu0 %v5585_v34  ;;  %v5633_v34 = vld [vmem:[#allocation5 + $0x7e4] ss:$8 sps:$4 sm:$0xff]  }
 0x5bd   :  { %4317 = vmatpush1.bf16.msra.mxu1 %v5580_v35  ;;  %v5628_v35 = vld [vmem:[#allocation5 + $0x6e0] ss:$8 sps:$4 sm:$0xff]  }
 0x5be   :  { %4358 = vmatpush1.bf16.msra.mxu0 %v5583_v36  ;;  %4318 = vmatprep.subr.bf16.mxu1 %v5588_v40  ;;  %v5631_v36 = vld [vmem:[#allocation5 + $0x7e0] ss:$8 sps:$4 sm:$0xff]   ;;  %v5636_v40 = vld [vmem:[#allocation5 + $0x6f4] ss:$8 sps:$4 sm:$0xff]  }
 0x5bf   :  { %4359 = vmatprep.subr.bf16.mxu0 %v5591_v41  ;;  %v5639_v41 = vld [vmem:[#allocation5 + $0x7f4] ss:$8 sps:$4 sm:$0xff]  }
 0x5c0   :  { %v3328_v50 = vpop.f32.mrb[20].mxu1  ;;  %v3369_v51 = vpop.f32.mrb[24].mxu0 }
 0x5c1   :  { %v6149_v55 = vadd.f32 %v3328_v50, %v2551_v43  ;;  %v6151_v56 = vadd.f32 %v3369_v51, %v2559_v37  ;;  %4319 = vmatpush1.bf16.msra.mxu1 %v5586_v42  ;;  %v3330_v53 = vpop.f32.mrb[21].mxu1  ;;  %v3371_v59 = vpop.f32.mrb[25].mxu0  ;;  %v5634_v37 = vld [vmem:[#allocation5 + $0x6f0] ss:$8 sps:$4 sm:$0xff]  }
 0x5c2   :  { %4360 = vmatpush1.bf16.msra.mxu0 %v5589_v44  ;;  %v6153_v57 = vadd.f32 %v3330_v53, %v2555_v29  ;;  %v6155_v45 = vadd.f32 %v3371_v59, %v2563_v47  ;;  %v3332_v58 = vpop.f32.mrb[22].mxu1  ;;  %v3373_v25 = vpop.f32.mrb[26].mxu0  ;;  %4320 = vmatprep.subr.bf16.mxu1 %v5594_v39  ;;  %v5637_v47 = vld [vmem:[#allocation5 + $0x7f0] ss:$8 sps:$4 sm:$0xff]  }
 0x5c3   :  { %v5027_v1 = vmul.f32 -1.442695, %v6149_v55  ;;  %v5029_v2 = vmul.f32 -1.442695, %v6151_v56  ;;  %v3333_v3 = vpop.f32.mrb[23].mxu1  ;;  %v3374_v4 = vpop.f32.mrb[27].mxu0  ;;  %4361 = vmatprep.subr.bf16.mxu0 %v5597_v49 }
 0x5c4   :  { %v5028_v5 = vmul.f32 -1.442695, %v6153_v57  ;;  %v5030_v8 = vmul.f32 -1.442695, %v6155_v45  ;;  %v5644_v58 = vld [vmem:[%s6244_s9 + $0x50] sm:$0xff]   ;;  %v5650_v3 = vld [vmem:[%s6244_s9 + $0x68] sm:$0xff]  }
 0x5c5   :  { %5708 = vpow2.f32 %v5027_v1  ;;  %4321 = vmatpush1.bf16.msra.mxu1 %v5592_v60  ;;  %v5645_v25 = vld [vmem:[%s6244_s9 + $0x10] sm:$0xff]   ;;  %v5648_v1 = vld [vmem:[%s6244_s9 + $0x60] sm:$0xff]   ;;  %v5651_v4 = vld [vmem:[%s6244_s9 + $0x28] sm:$0xff]  }
 0x5c6   :  { %5710 = vpow2.f32 %v5029_v2  ;;  %4362 = vmatpush1.bf16.msra.mxu0 %v5595_v61  ;;  %4322 = vmatprep.subr.bf16.mxu1 %v5600_v62  ;;  %v5646_v62 = vld [vmem:[%s6244_s9 + $0x58] sm:$0xff]   ;;  %v5649_v2 = vld [vmem:[%s6244_s9 + $0x20] sm:$0xff]  }
 0x5c7   :  { %5712 = vpow2.f32 %v5028_v5  ;;  %4363 = vmatprep.subr.bf16.mxu0 %v5603_v0  ;;  %v5647_v0 = vld [vmem:[%s6244_s9 + $0x18] sm:$0xff]   ;;  %v5652_v5 = vld [vmem:[%s6244_s9 + $0x70] sm:$0xff]  }
 0x5c8   :  { %5714 = vpow2.f32 %v5030_v8  ;;  %v5653_v8 = vld [vmem:[%s6244_s9 + $0x30] sm:$0xff]  }
 0x5c9   :  { %4323 = vmatpush1.bf16.msra.mxu1 %v5598_v9  ;;  %v5654_v9 = vld [vmem:[%s6244_s9 + $0x78] sm:$0xff]  }
 0x5ca   :  { %4364 = vmatpush1.bf16.msra.mxu0 %v5601_v10  ;;  %4324 = vmatprep.subr.bf16.mxu1 %v5606_v11  ;;  %v5655_v10 = vld [vmem:[%s6244_s9 + $0x38] sm:$0xff]   ;;  %v5031_v11 = vld [vmem:[%s6243_s8 + $0x2] sm:$0x3] }
 0x5cb   :  { %4365 = vmatprep.subr.bf16.mxu0 %v5609_v15  ;;  %v3575_v15 = vrot.slane %v5031_v11, %v6000_v46 }
 0x5cd   :  { %4325 = vmatpush1.bf16.msra.mxu1 %v5604_v16  ;;  %v3579_v16 = vrot.slane %v5031_v11, %v6006_v48 }
 0x5ce   :  { %4366 = vmatpush1.bf16.msra.mxu0 %v5607_v17  ;;  %4326 = vmatprep.subr.bf16.mxu1 %v5612_v18 }
 0x5cf   :  { %v5709_v21 = vpop.eup %5708  ;;  %4367 = vmatprep.subr.bf16.mxu0 %v5615_v19 }
 0x5d0   :  { %v5711_v54 = vpop.eup %5710  ;;  %v3404_v7 = vadd.f32 1.0, %v5709_v21 }
 0x5d1   :  { %v5713_v23 = vpop.eup %5712  ;;  %v3406_v12 = vadd.f32 1.0, %v5711_v54  ;;  %4327 = vmatpush1.bf16.msra.mxu1 %v5610_v6 }
 0x5d2   :  { %v5715_v13 = vpop.eup %5714  ;;  %5716 = vrcp.f32 %v3404_v7  ;;  %v3405_v63 = vadd.f32 1.0, %v5713_v23  ;;  %4368 = vmatpush1.bf16.msra.mxu0 %v5613_v20  ;;  %4328 = vmatprep.subr.bf16.mxu1 %v5618_v52 }
 0x5d3   :  { %5718 = vrcp.f32 %v3406_v12  ;;  %v3407_v28 = vadd.f32 1.0, %v5715_v13  ;;  %4369 = vmatprep.subr.bf16.mxu0 %v5621_v22 }
 0x5d4   :  { %5720 = vrcp.f32 %v3405_v63 }
 0x5d5   :  { %5722 = vrcp.f32 %v3407_v28  ;;  %4329 = vmatpush1.bf16.msra.mxu1 %v5616_v24 }
 0x5d6   :  { %4370 = vmatpush1.bf16.msra.mxu0 %v5619_v26  ;;  %4330 = vmatprep.subr.bf16.mxu1 %v5624_v27 }
 0x5d7   :  { %4371 = vmatprep.subr.bf16.mxu0 %v5627_v30 }
 0x5d9   :  { %4331 = vmatpush1.bf16.msra.mxu1 %v5622_v31 }
 0x5da   :  { %4372 = vmatpush1.bf16.msra.mxu0 %v5625_v32  ;;  %4332 = vmatprep.subr.bf16.mxu1 %v5630_v33 }
 0x5db   :  { %4373 = vmatprep.subr.bf16.mxu0 %v5633_v34 }
 0x5dc   :  { %v5717_v42 = vpop.eup %5716 }
 0x5dd   :  { %v5719_v43 = vpop.eup %5718  ;;  %4333 = vmatpush1.bf16.msra.mxu1 %v5628_v35  ;;  %v3428_v29 = vmul.f32 %v5717_v42, %v6149_v55  ;;  %v5640_v55 = vld [vmem:[%s6244_s9 + $0x40] sm:$0xff]  }
 0x5de   :  { %v5721_v44 = vpop.eup %5720  ;;  %4374 = vmatpush1.bf16.msra.mxu0 %v5631_v36  ;;  %4334 = vmatprep.subr.bf16.mxu1 %v5636_v40  ;;  %v3430_v49 = vmul.f32 %v5719_v43, %v6151_v56  ;;  %v5641_v56 = vld [vmem:[%s6244_s9] sm:$0xff]  }
 0x5df   :  { %v5723_v39 = vpop.eup %5722  ;;  %v3429_v50 = vmul.f32 %v5721_v44, %v6153_v57  ;;  %4375 = vmatprep.subr.bf16.mxu0 %v5639_v41  ;;  %v3436_v59 = vpack.c.bf16 %v3428_v29, %v3428_v29  ;;  %v5642_v57 = vld [vmem:[%s6244_s9 + $0x48] sm:$0xff]  }
 0x5e0   :  { %v3431_v51 = vmul.f32 %v5723_v39, %v6155_v45  ;;  %v3438_v61 = vpack.c.bf16 %v3430_v49, %v3430_v49  ;;  %v5643_v45 = vld [vmem:[%s6244_s9 + $0x8] sm:$0xff]  }
 0x5e1   :  { %v3437_v53 = vpack.c.bf16 %v3429_v50, %v3429_v50  ;;  %4335 = vmatpush1.bf16.msra.mxu1 %v5634_v37 }
 0x5e2   :  { %v3439_v60 = vpack.c.bf16 %v3431_v51, %v3431_v51  ;;  %4376 = vmatpush1.bf16.msra.mxu0 %v5637_v47  ;;  %5179 = vmatprep.subr.bf16.mxu1 %v5640_v55 }
 0x5e3   :  { %4336 = vmatprep.mubr.bf16.mxu1 %v3437_v53 }
 0x5e4   :  { %4377 = vmatprep.mubr.bf16.mxu0 %v3439_v60  ;;  %4337 = vmatmul.mubr.bf16.vlgmr.msra.gmra.mrb[28].mxu1 %v3436_v59 }
 0x5e5   :  { %4378 = vmatmul.mubr.bf16.vlgmr.msra.gmra.mrb[32].mxu0 %v3438_v61  ;;  %5180 = vmatpush3.bf16.msra.mxu1 %v5641_v56 }
 0x5e6   :  { %5181 = vmatprep.subr.bf16.mxu1 %v5642_v57 }
 0x5e9   :  { %5182 = vmatpush3.bf16.msra.mxu1 %v5643_v45 }
 0x5ea   :  { %5183 = vmatprep.subr.bf16.mxu1 %v5644_v58 }
 0x5ed   :  { %5184 = vmatpush3.bf16.msra.mxu1 %v5645_v25 }
 0x5ee   :  { %5185 = vmatprep.subr.bf16.mxu1 %v5646_v62 }
 0x5f1   :  { %5186 = vmatpush3.bf16.msra.mxu1 %v5647_v0 }
 0x5f2   :  { %5187 = vmatprep.subr.bf16.mxu1 %v5648_v1 }
 0x5f5   :  { %5188 = vmatpush3.bf16.msra.mxu1 %v5649_v2 }
 0x5f6   :  { %5189 = vmatprep.subr.bf16.mxu1 %v5650_v3 }
 0x5f9   :  { %5190 = vmatpush3.bf16.msra.mxu1 %v5651_v4 }
 0x5fa   :  { %5191 = vmatprep.subr.bf16.mxu1 %v5652_v5 }
 0x5fd   :  { %5192 = vmatpush3.bf16.msra.mxu1 %v5653_v8 }
 0x5fe   :  { %5193 = vmatprep.subr.bf16.mxu1 %v5654_v9 }
 0x601   :  { %5194 = vmatpush3.bf16.msra.mxu1 %v5655_v10 }
 0x677   :  { %v4256_v17 = vpop.f32.mrb[24].mxu1 }
 0x678   :  { %v4257_v18 = vadd.f32 %v4256_v17, %v3575_v15  ;;  %v4297_v19 = vpop.f32.mrb[28].mxu0  ;;  %v4258_v6 = vpop.f32.mrb[25].mxu1 }
 0x679   :  { %v4259_v20 = vadd.f32 %v4258_v6, %v3579_v16  ;;  %v4299_v52 = vpop.f32.mrb[29].mxu0  ;;  %v4260_v21 = vpop.f32.mrb[26].mxu1 }
 0x67a   :  { %v4298_v22 = vadd.f32 %v4297_v19, %v4257_v18  ;;  %v4301_v54 = vpop.f32.mrb[30].mxu0  ;;  %v4261_v7 = vpop.f32.mrb[27].mxu1 }
 0x67b   :  { %v4300_v23 = vadd.f32 %v4299_v52, %v4259_v20  ;;  %v4302_v12 = vpop.f32.mrb[31].mxu0 }
 0x6b7   :  { %v4338_v24 = vpop.f32.mrb[28].mxu1 }
 0x6b8   :  { %v4339_v13 = vadd.f32 %v4338_v24, %v4298_v22  ;;  %v4379_v63 = vpop.f32.mrb[32].mxu0  ;;  %v4340_v26 = vpop.f32.mrb[29].mxu1 }
 0x6b9   :  { %v4341_v27 = vadd.f32 %v4340_v26, %v4300_v23  ;;  %v4381_v46 = vpop.f32.mrb[33].mxu0  ;;  %v4342_v28 = vpop.f32.mrb[30].mxu1 }
 0x6ba   :  { %v4380_v48 = vadd.f32 %v4379_v63, %v4339_v13  ;;  %v4383_v30 = vpop.f32.mrb[34].mxu0  ;;  %v4343_v31 = vpop.f32.mrb[31].mxu1 }
 0x6bb   :  { %v4382_v32 = vadd.f32 %v4381_v46, %v4341_v27  ;;  %v4384_v33 = vpop.f32.mrb[35].mxu0 }
 0x6bc   :  { %v4386_v34 = vadd.f32 %v4380_v48, %v6093_v38 }
 0x6bd   :  { %v4387_v35 = vadd.f32 %v4382_v32, %v6096_v14  ;;  %v5162_v14 = vld [vmem:[%s6245_s10] ss:$0 sm:$0xff] }
 0x6be   :  { %v5160_v36 = vmul.f32 -1.442695, %v4386_v34 }
 0x6bf   :  { %v5161_v40 = vmul.f32 -1.442695, %v4387_v35 }
 0x6c0   :  { %5724 = vpow2.f32 %v5160_v36 }
 0x6c1   :  { %5726 = vpow2.f32 %v5161_v40 }
 0x6ca   :  { %v5725_v41 = vpop.eup %5724 }
 0x6cb   :  { %v5727_v42 = vpop.eup %5726  ;;  %v4394_v43 = vadd.f32 1.0, %v5725_v41 }
 0x6cc   :  { %v4395_v37 = vadd.f32 1.0, %v5727_v42 }
 0x6cd   :  { %5728 = vrcp.f32 %v4394_v43 }
 0x6ce   :  { %5730 = vrcp.f32 %v4395_v37 }
 0x6d7   :  { %v5729_v44 = vpop.eup %5728 }
 0x6d8   :  { %v5731_v29 = vpop.eup %5730  ;;  %v4400_v47 = vmul.f32 %v5729_v44, %v4386_v34 }
 0x6d9   :  { %v4401_v39 = vmul.f32 %v5731_v29, %v4387_v35 }
 0x6da   :  { %v4402_v50 = vpack.c.bf16 %v4400_v47, %v4400_v47 }
 0x6db   :  { %v4403_v49 = vpack.c.bf16 %v4401_v39, %v4401_v39 }
 0x6dd   :  { %4571 = vmatprep.mubr.bf16.mxu1 %v4403_v49 }
 0x6de   :  { %4572 = vmatmul.mubr.bf16.vlgmr.msra.gmra.mrb[32].mxu1 %v4402_v50 }
 0x7b1   :  { %v5195_v38 = vpop.f32.mrb[32].mxu1 }
 0x7b2   :  { %v5196_v51 = vpop.f32.mrb[33].mxu1 }
 0x7b3   :  { %v5197_v53 = vadd.f32 %v5196_v51, %v5195_v38  ;;  %v5198_v59 = vpop.f32.mrb[34].mxu1 }
 0x7b4   :  { %v5199_v60 = vpop.f32.mrb[35].mxu1 }
 0x7b5   :  { %v4574_v61 = vadd.f32 %v5197_v53, %v5162_v14 }
 0x7b7   :  { %4579 = vst [vmem:[#allocation7] sm:$0xff] %v4574_v61 }
 0x7b8   :  { %5787 = shalt.err (!%p5784_p6)
}
 0x7b9   :  { %s5788_s10 = scalar_lea.hbm %s6246_s11, 128 }
 0x7ba   :  { %p5789_p7 = scmp.ne.s32.totalorder %s6246_s11, %s5788_s10  ;;  %p5792_p8 = scmp.lt.u32.totalorder %s5788_s10, %s6246_s11 }
 0x7bc   :  { %p5794_p9 = pnand %p5792_p8, %p5789_p7 }
 0x7be   :  { %5797 = shalt.err (!%p5794_p9)
}
 0x7bf   :  { %4589 = dma.vmem_to_hbm [thread:$0]  %s4587_s27, 128, %s6246_s11, [#allocation4]  }
 0x7c0   :  { %5802 = dma.done.wait [#allocation4], 128  }
 0x7c1   :  { %5803 = vsyncadd [#allocation4], 4294967168 }
 0x7c2   :  { %4593 = vsyncpa [#allocation3], 1 }
 0x7c3   :  { %4594 = vsyncpa [#allocation6], 1 }
 0x7c4   :  { %4595 = vsyncpa [#allocation4], 1 }

</bundles_post_ra>
